<compile_context>
chip_gen: v7x
topology: tpu7x:2x2x1
jax: 0.10.0
libtpu: 0.0.40
codegen_flags: <defaults>
</compile_context>

<pallas_src>
import functools
import numpy as np

import jax
import jax.numpy as jnp
from jax import lax
from jax.experimental import pallas as pl
from jax.experimental.pallas import tpu as pltpu


# ----------------------------------------------------------------------------
# small helpers
# ----------------------------------------------------------------------------

def _vmem_capacity_bytes():
    try:
        cap = int(getattr(pltpu.get_tpu_info(), "vmem_capacity_bytes", 0))
        if cap > 0:
            return cap
    except Exception:
        pass
    return 128 * 1024 * 1024


def _compiler_params(semantics, vmem_estimate_bytes):
    kwargs = dict(dimension_semantics=tuple(semantics))
    # v5e default scoped VMEM is 16 MiB; raise when needed, capped at ~90% of
    # physical VMEM (64 MiB v7x, 128 MiB v5e/v6e).
    if vmem_estimate_bytes > 12 * 1024 * 1024:
        cap = int(0.9 * _vmem_capacity_bytes())
        want = int(2 * vmem_estimate_bytes)
        kwargs["vmem_limit_bytes"] = max(32 * 1024 * 1024, min(want, cap))
    return pltpu.CompilerParams(**kwargs)


def _largest_divisor(n, cap, multiple_of=1):
    """Largest divisor of n that is <= cap.  Prefers multiples of
    `multiple_of`; falls back to the largest unaligned divisor <= cap."""
    cap = int(max(1, min(cap, n)))
    best_aligned, best_any = 0, 1
    for g in range(1, cap + 1):
        if n % g == 0:
            best_any = g
            if g % multiple_of == 0:
                best_aligned = g
    return best_aligned if best_aligned else best_any


def _sublane_multiple(dtype):
    # min second-minor tile: 8 for 4-byte dtypes, 16 for bf16.
    return 8 * max(1, 4 // jnp.dtype(dtype).itemsize)


def _gelu_tanh(x):
    # matches torch.nn.GELU(approximate="tanh")
    return 0.5 * x * (1.0 + jnp.tanh(0.7978845608028654 *
                                     (x + 0.044715 * x * x * x)))


def _ln_modulate(xb, shift, scale, eps):
    mu = jnp.mean(xb, axis=-1, keepdims=True)
    var = jnp.mean(jnp.square(xb - mu), axis=-1, keepdims=True)
    return (xb - mu) * lax.rsqrt(var + eps) * (1.0 + scale) + shift


# ----------------------------------------------------------------------------
# Kernel 1: LayerNorm + t2i_modulate + fused QKV projection (q pre-scaled)
# ----------------------------------------------------------------------------

def _qkv_kernel(x_ref, p_ref, w_ref, b_ref, q_ref, k_ref, v_ref, *,
                eps, qk_scale):
    cdt = w_ref.dtype
    GF, TS, C = x_ref.shape
    xb = x_ref[...].astype(jnp.float32)                       # (GF, TS, C)
    pv = p_ref[...].astype(jnp.float32)                       # (GF, 3, C)
    xm = _ln_modulate(xb, pv[:, 0:1, :], pv[:, 1:2, :], eps)  # (GF, TS, C)

    qkv = jnp.dot(xm.reshape(GF * TS, C).astype(cdt), w_ref[...],
                  preferred_element_type=jnp.float32)
    qkv = qkv + b_ref[...].astype(jnp.float32)                # (GF*TS, 3C)

    q_ref[...] = (qkv[:, 0 * C:1 * C] * qk_scale).reshape(GF, TS, C
                                                          ).astype(q_ref.dtype)
    k_ref[...] = qkv[:, 1 * C:2 * C].reshape(GF, TS, C).astype(k_ref.dtype)
    v_ref[...] = qkv[:, 2 * C:3 * C].reshape(GF, TS, C).astype(v_ref.dtype)


def _qkv_projection(x4, mod_p, wqkv, bqkv, *, qk_scale, token_tile=512):
    B, T, S, C = x4.shape
    cdt = wqkv.dtype
    sub = max(_sublane_multiple(x4.dtype), _sublane_multiple(cdt))
    TS = _largest_divisor(S, cap=token_tile, multiple_of=sub)
    GF = _largest_divisor(T, cap=max(1, token_tile // TS))
    grid = (B, T // GF, S // TS)

    x_spec = pl.BlockSpec((None, GF, TS, C), lambda b, f, s: (b, f, s, 0))
    p_spec = pl.BlockSpec((None, GF, 3, C), lambda b, f, s: (b, f, 0, 0))
    o_spec = pl.BlockSpec((None, GF, TS, C), lambda b, f, s: (b, f, s, 0))

    w_itm = jnp.dtype(cdt).itemsize
    ntok = GF * TS
    vmem_est = (2 * (wqkv.size + bqkv.size) * w_itm
                + 2 * ntok * C * jnp.dtype(x4.dtype).itemsize
                + 2 * 3 * ntok * C * w_itm
                + 20 * ntok * C)                      # f32 temporaries

    kernel = functools.partial(_qkv_kernel, eps=1e-6, qk_scale=qk_scale)
    out_shape = tuple(jax.ShapeDtypeStruct((B, T, S, C), cdt) for _ in range(3))
    return pl.pallas_call(
        kernel,
        out_shape=out_shape,
        grid=grid,
        in_specs=[x_spec, p_spec,
                  pl.BlockSpec((C, 3 * C), lambda b, f, s: (0, 0)),
                  pl.BlockSpec((1, 3 * C), lambda b, f, s: (0, 0))],
        out_specs=[o_spec, o_spec, o_spec],
        compiler_params=_compiler_params(("parallel",) * 3, vmem_est),
    )(x4, mod_p, wqkv, bqkv)


# ----------------------------------------------------------------------------
# Kernel 2: flash attention (online softmax over a KV grid axis)
#           + out-projection + gate + residual at finalize
# ----------------------------------------------------------------------------

def _flash_attn_kernel(q_ref, k_ref, v_ref, x_ref, p_ref, wp_ref, bp_ref,
                       o_ref, m_sc, l_sc, acc_sc, *, num_heads, head_dim,
                       temporal, mask_value):
    ki = pl.program_id(3)
    n_kv = pl.num_programs(3)
    H, Dh = num_heads, head_dim

    def seq_major(a):          # temporal blocks arrive as (L, G, C)
        return jnp.swapaxes(a, 0, 1) if temporal else a

    q = seq_major(q_ref[...])  # (G, TQ, C)
    k = seq_major(k_ref[...])  # (G, TK, C)
    v = seq_major(v_ref[...])
    G, TQ, C = q.shape
    TK = k.shape[1]

    def split_heads(a):        # (G, L, C) -> (H*G, L, Dh); lane slices only
        hs = [a[:, :, h * Dh:(h + 1) * Dh] for h in range(H)]
        return jnp.stack(hs, axis=0).reshape(H * G, a.shape[1], Dh)

    @pl.when(ki == 0)
    def _():
        m_sc[...] = jnp.full_like(m_sc, -jnp.inf)
        l_sc[...] = jnp.zeros_like(l_sc)
        acc_sc[...] = jnp.zeros_like(acc_sc)

    qh = split_heads(q)        # (HG, TQ, Dh)
    kh = split_heads(k)        # (HG, TK, Dh)
    vh = split_heads(v)

    s = jnp.einsum("bqd,bkd->bqk", qh, kh,
                   preferred_element_type=jnp.float32)       # (HG, TQ, TK)

    if temporal:               # causal within each length-T sequence
        qi = pl.program_id(2)
        row = qi * TQ + lax.broadcasted_iota(jnp.int32, (TQ, TK), 0)
        col = ki * TK + lax.broadcasted_iota(jnp.int32, (TQ, TK), 1)
        s = jnp.where((col <= row)[None], s, mask_value)

    m_prev = m_sc[...]                                       # (HG, TQ, 1)
    m_cur = jnp.max(s, axis=-1, keepdims=True)
    m_new = jnp.maximum(m_prev, m_cur)
    alpha = jnp.exp(m_prev - m_new)
    p = jnp.exp(s - m_new)
    l_sc[...] = alpha * l_sc[...] + jnp.sum(p, axis=-1, keepdims=True)
    acc_sc[...] = alpha * acc_sc[...] + jnp.einsum(
        "bqk,bkd->bqd", p.astype(vh.dtype), vh,
        preferred_element_type=jnp.float32)                  # (HG, TQ, Dh)
    m_sc[...] = m_new

    @pl.when(ki == n_kv - 1)
    def _():
        cdt = wp_ref.dtype
        inv_l = pl.reciprocal(l_sc[...], approx=True)        # (HG, TQ, 1)
        att = (acc_sc[...] * inv_l).reshape(H, G, TQ, Dh)
        att = jnp.concatenate([att[h] for h in range(H)], axis=-1)  # (G,TQ,C)
        y = jnp.dot(att.reshape(G * TQ, C).astype(cdt), wp_ref[...],
                    preferred_element_type=jnp.float32)
        y = (y + bp_ref[...].astype(jnp.float32)).reshape(G, TQ, C)
        gate = p_ref[...].astype(jnp.float32)[:, 2:3, :]     # (F, 1, C)
        xb = x_ref[...].astype(jnp.float32)                  # same layout as o
        if temporal:
            y = jnp.swapaxes(y, 0, 1)                        # (TQ, G, C)
        o_ref[...] = (xb + gate * y).astype(o_ref.dtype)


def _flash_attention(q, k, v, x4, mod_p, wproj, bproj, *, num_heads, temporal,
                     seq_tile=512, block_tokens=512):
    B, T, S, C = x4.shape
    Dh = C // num_heads
    cdt = q.dtype
    sub = max(_sublane_multiple(x4.dtype), _sublane_multiple(cdt))

    if temporal:
        # sequences run over T for each spatial position; G positions batched.
        TQ = _largest_divisor(T, cap=seq_tile)
        TK = _largest_divisor(T, cap=seq_tile)
        G = _largest_divisor(S, cap=max(1, block_tokens // max(TQ, TK)),
                             multiple_of=sub)
        grid = (B, S // G, T // TQ, T // TK)
        q_spec = pl.BlockSpec((None, TQ, G, C), lambda b, g, qi, ki: (b, qi, g, 0))
        kv_spec = pl.BlockSpec((None, TK, G, C), lambda b, g, qi, ki: (b, ki, g, 0))
        x_spec = pl.BlockSpec((None, TQ, G, C), lambda b, g, qi, ki: (b, qi, g, 0))
        p_spec = pl.BlockSpec((None, TQ, 3, C), lambda b, g, qi, ki: (b, qi, 0, 0))
    else:
        # sequences run over S within a frame; G frames batched per step.
        TQ = _largest_divisor(S, cap=seq_tile, multiple_of=sub)
        TK = _largest_divisor(S, cap=seq_tile, multiple_of=sub)
        G = _largest_divisor(T, cap=max(1, block_tokens // max(TQ, TK)))
        grid = (B, T // G, S // TQ, S // TK)
        q_spec = pl.BlockSpec((None, G, TQ, C), lambda b, g, qi, ki: (b, g, qi, 0))
        kv_spec = pl.BlockSpec((None, G, TK, C), lambda b, g, qi, ki: (b, g, ki, 0))
        x_spec = pl.BlockSpec((None, G, TQ, C), lambda b, g, qi, ki: (b, g, qi, 0))
        p_spec = pl.BlockSpec((None, G, 3, C), lambda b, g, qi, ki: (b, g, 0, 0))

    HG = num_heads * G
    c_itm = jnp.dtype(cdt).itemsize
    x_itm = jnp.dtype(x4.dtype).itemsize
    vmem_est = (2 * (wproj.size + bproj.size) * jnp.dtype(wproj.dtype).itemsize
                + 2 * (G * TQ + 2 * G * TK) * C * c_itm
                + 4 * G * TQ * C * x_itm
                + 3 * HG * TQ * TK * 4
                + HG * TQ * (Dh + 2 * 128) * 4
                + 3 * (G * TQ + 2 * G * TK) * C * 4)

    kernel = functools.partial(_flash_attn_kernel, num_heads=num_heads,
                               head_dim=Dh, temporal=temporal,
                               mask_value=-1e30)
    return pl.pallas_call(
        kernel,
        out_shape=jax.ShapeDtypeStruct((B, T, S, C), x4.dtype),
        grid=grid,
        in_specs=[q_spec, kv_spec, kv_spec, x_spec, p_spec,
                  pl.BlockSpec((C, C), lambda b, g, qi, ki: (0, 0)),
                  pl.BlockSpec((1, C), lambda b, g, qi, ki: (0, 0))],
        out_specs=x_spec,
        scratch_shapes=[pltpu.VMEM((HG, TQ, 1), jnp.float32),
                        pltpu.VMEM((HG, TQ, 1), jnp.float32),
                        pltpu.VMEM((HG, TQ, Dh), jnp.float32)],
        input_output_aliases={3: 0},      # residual added in place
        compiler_params=_compiler_params(
            ("parallel", "parallel", "parallel", "arbitrary"), vmem_est),
    )(q, k, v, x4, mod_p, wproj, bproj)


# ----------------------------------------------------------------------------
# Kernel 3: LN + modulate + MLP (hidden-dim tiled) + gate + residual (in place)
# ----------------------------------------------------------------------------

def _mlp_kernel(x_ref, p_ref, w1_ref, b1_ref, w2_ref, b2_ref, o_ref,
                xm_sc, acc_sc, *, eps):
    hi = pl.program_id(3)
    nh = pl.num_programs(3)
    cdt = w1_ref.dtype
    GF, TS, C = x_ref.shape

    @pl.when(hi == 0)
    def _():
        xb = x_ref[...].astype(jnp.float32)
        pv = p_ref[...].astype(jnp.float32)
        xm_sc[...] = _ln_modulate(xb, pv[:, 0:1, :], pv[:, 1:2, :], eps
                                  ).reshape(GF * TS, C)
        acc_sc[...] = jnp.zeros_like(acc_sc)

    h = jnp.dot(xm_sc[...].astype(cdt), w1_ref[...],
                preferred_element_type=jnp.float32)
    h = _gelu_tanh(h + b1_ref[...].astype(jnp.float32))
    acc_sc[...] += jnp.dot(h.astype(cdt), w2_ref[...],
                           preferred_element_type=jnp.float32)

    @pl.when(hi == nh - 1)
    def _():
        xb = x_ref[...].astype(jnp.float32)
        gate = p_ref[...].astype(jnp.float32)[:, 2:3, :]      # (GF, 1, C)
        y = (acc_sc[...] + b2_ref[...].astype(jnp.float32)).reshape(GF, TS, C)
        o_ref[...] = (xb + gate * y).astype(o_ref.dtype)


def _fused_mlp(x4, mod_p, w1, b1, w2, b2, *, token_tile=256, hidden_tile=2048):
    B, T, S, C = x4.shape
    Hm = w1.shape[1]
    cdt = w1.dtype
    TS = _largest_divisor(S, cap=token_tile,
                          multiple_of=_sublane_multiple(x4.dtype))
    GF = _largest_divisor(T, cap=max(1, token_tile // TS))
    HT = _largest_divisor(Hm, cap=hidden_tile, multiple_of=128)
    grid = (B, T // GF, S // TS, Hm // HT)

    x_spec = pl.BlockSpec((None, GF, TS, C), lambda b, f, s, h: (b, f, s, 0))
    p_spec = pl.BlockSpec((None, GF, 3, C), lambda b, f, s, h: (b, f, 0, 0))

    w_itm = jnp.dtype(cdt).itemsize
    ntok = GF * TS
    vmem_est = (2 * (C * HT + HT * C + HT + C) * w_itm
                + 4 * ntok * C * jnp.dtype(x4.dtype).itemsize
                + 2 * ntok * HT * 4
                + 2 * ntok * C * 4)

    kernel = functools.partial(_mlp_kernel, eps=1e-6)
    return pl.pallas_call(
        kernel,
        out_shape=jax.ShapeDtypeStruct((B, T, S, C), x4.dtype),
        grid=grid,
        in_specs=[x_spec, p_spec,
                  pl.BlockSpec((C, HT), lambda b, f, s, h: (0, h)),
                  pl.BlockSpec((1, HT), lambda b, f, s, h: (0, h)),
                  pl.BlockSpec((HT, C), lambda b, f, s, h: (h, 0)),
                  pl.BlockSpec((1, C), lambda b, f, s, h: (0, 0))],
        out_specs=x_spec,
        scratch_shapes=[pltpu.VMEM((GF * TS, C), jnp.float32),
                        pltpu.VMEM((GF * TS, C), jnp.float32)],
        input_output_aliases={0: 0},      # residual added in place
        compiler_params=_compiler_params(
            ("parallel", "parallel", "parallel", "arbitrary"), vmem_est),
    )(x4, mod_p, w1, b1, w2, b2)


# ----------------------------------------------------------------------------
# STDiT3Block forward (Pallas-backed)
# ----------------------------------------------------------------------------

@functools.partial(jax.jit, static_argnames=(
    "T", "S", "num_heads", "temporal", "attn_seq_tile", "attn_block_tokens",
    "qkv_token_tile", "mlp_token_tile", "mlp_hidden_tile"))
def stdit3_block_forward(params, x, t, *, T, S, num_heads, temporal=False,
                         x_mask=None, t0=None,
                         attn_seq_tile=512, attn_block_tokens=512,
                         qkv_token_tile=512, mlp_token_tile=256,
                         mlp_hidden_tile=2048):
    B, N, C = x.shape
    assert N == T * S and C % num_heads == 0

    # adaLN parameters; optional x_mask select done on the tiny (B, T, 6, C)
    # tensor (exactly equivalent to masking the modulated x / gated outputs).
    sst = params["scale_shift_table"].astype(jnp.float32)
    ada = sst[None] + t.reshape(B, 6, C).astype(jnp.float32)
    if x_mask is not None:
        ada0 = sst[None] + t0.reshape(B, 6, C).astype(jnp.float32)
        sel = x_mask[:, :, None, None]
        ada_bt = jnp.where(sel, ada[:, None], ada0[:, None])     # (B, T, 6, C)
    else:
        ada_bt = jnp.broadcast_to(ada[:, None], (B, T, 6, C))
    msa_p = ada_bt[:, :, 0:3, :]
    mlp_p = ada_bt[:, :, 3:6, :]

    x4 = x.reshape(B, T, S, C)

    # LN + modulate + fused QKV projection (q pre-scaled by 1/sqrt(Dh)).
    q, k, v = _qkv_projection(x4, msa_p, params["w_qkv"], params["b_qkv"],
                              qk_scale=(C // num_heads) ** -0.5,
                              token_tile=qkv_token_tile)

    # Flash attention (+ projection + gate + residual, in place).
    x4 = _flash_attention(q, k, v, x4, msa_p, params["w_proj"],
                          params["b_proj"], num_heads=num_heads,
                          temporal=temporal, seq_tile=attn_seq_tile,
                          block_tokens=attn_block_tokens)

    # LN + modulate + MLP (+ gate + residual, in place).
    x4 = _fused_mlp(x4, mlp_p, params["w_fc1"], params["b_fc1"],
                    params["w_fc2"], params["b_fc2"],
                    token_tile=mlp_token_tile, hidden_tile=mlp_hidden_tile)

    return x4.reshape(B, N, C)


# ----------------------------------------------------------------------------
# Pure-JAX reference (correctness check)
# ----------------------------------------------------------------------------

def reference_forward(params, x, t, *, T, S, num_heads, temporal=False,
                      x_mask=None, t0=None):
    hp = lax.Precision.HIGHEST
    B, N, C = x.shape
    Dh = C // num_heads
    sst = params["scale_shift_table"]
    ada = sst[None] + t.reshape(B, 6, C)
    sm, cm, gm, sp, cp, gp = [ada[:, i:i + 1] for i in range(6)]
    if x_mask is not None:
        ada0 = sst[None] + t0.reshape(B, 6, C)
        sm0, cm0, gm0, sp0, cp0, gp0 = [ada0[:, i:i + 1] for i in range(6)]

    def ln(v):
        mu = v.mean(-1, keepdims=True)
        var = ((v - mu) ** 2).mean(-1, keepdims=True)
        return (v - mu) * lax.rsqrt(var + 1e-6)

    def mod(v, sh, sc):
        return v * (1.0 + sc) + sh

    def tsel(a, b):
        a4 = a.reshape(B, T, S, C)
        b4 = b.reshape(B, T, S, C)
        return jnp.where(x_mask[:, :, None, None], a4, b4).reshape(B, N, C)

    def attn(xs, causal):
        G, L, _ = xs.shape
        qkv = jnp.dot(xs, params["w_qkv"], precision=hp) + params["b_qkv"][0]
        q, k, v = jnp.split(qkv, 3, axis=-1)
        q = q.reshape(G, L, num_heads, Dh).transpose(0, 2, 1, 3)
        k = k.reshape(G, L, num_heads, Dh).transpose(0, 2, 1, 3)
        v = v.reshape(G, L, num_heads, Dh).transpose(0, 2, 1, 3)
        s = jnp.einsum("ghqd,ghkd->ghqk", q * (Dh ** -0.5), k, precision=hp)
        if causal:
            msk = jnp.tril(jnp.ones((L, L), bool))
            s = jnp.where(msk, s, -jnp.inf)
        p = jax.nn.softmax(s, axis=-1)
        o = jnp.einsum("ghqk,ghkd->ghqd", p, v, precision=hp)
        o = o.transpose(0, 2, 1, 3).reshape(G, L, C)
        return jnp.dot(o, params["w_proj"], precision=hp) + params["b_proj"][0]

    x_m = mod(ln(x), sm, cm)
    if x_mask is not None:
        x_m = tsel(x_m, mod(ln(x), sm0, cm0))
    if temporal:
        xr = x_m.reshape(B, T, S, C).transpose(0, 2, 1, 3).reshape(B * S, T, C)
        a = attn(xr, True).reshape(B, S, T, C).transpose(0, 2, 1, 3).reshape(B, N, C)
    else:
        xr = x_m.reshape(B * T, S, C)
        a = attn(xr, False).reshape(B, N, C)
    xms = gm * a
    if x_mask is not None:
        xms = tsel(xms, gm0 * a)
    x = x + xms

    x_m = mod(ln(x), sp, cp)
    if x_mask is not None:
        x_m = tsel(x_m, mod(ln(x), sp0, cp0))
    h = jnp.dot(x_m, params["w_fc1"], precision=hp) + params["b_fc1"][0]
    h = _gelu_tanh(h)
    y = jnp.dot(h, params["w_fc2"], precision=hp) + params["b_fc2"][0]
    xms = gp * y
    if x_mask is not None:
        xms = tsel(xms, gp0 * y)
    return x + xms


# ----------------------------------------------------------------------------
# Deterministic parameter init (shapes from STDiT3Block.__init__)
# ----------------------------------------------------------------------------

def init_params(key, hidden_size, mlp_ratio=4.0):
    C = hidden_size
    Hm = int(C * mlp_ratio)
    ks = jax.random.split(key, 9)

    def dense(k, fan_in, shape):
        return (jax.random.normal(k, shape, jnp.float32) / np.sqrt(fan_in))

    return dict(
        scale_shift_table=(jax.random.normal(ks[0], (6, C), jnp.float32)
                           / np.sqrt(C)),
        w_qkv=dense(ks[1], C, (C, 3 * C)),
        b_qkv=0.01 * jax.random.normal(ks[2], (1, 3 * C), jnp.float32),
        w_proj=dense(ks[3], C, (C, C)),
        b_proj=0.01 * jax.random.normal(ks[4], (1, C), jnp.float32),
        w_fc1=dense(ks[5], C, (C, Hm)),
        b_fc1=0.01 * jax.random.normal(ks[6], (1, Hm), jnp.float32),
        w_fc2=dense(ks[7], Hm, (Hm, C)),
        b_fc2=0.01 * jax.random.normal(ks[8], (1, C), jnp.float32),
    )


# ----------------------------------------------------------------------------
# Demo / test
# ----------------------------------------------------------------------------

if __name__ == "__main__":
    B, T, S = 2, 4, 16
    hidden_size, num_heads = 64, 4
    N = T * S

    key = jax.random.PRNGKey(0)
    kp, kx, kt, kt0 = jax.random.split(key, 4)
    params = init_params(kp, hidden_size)
    params_bf16 = dict(params)
    for name in ("w_qkv", "w_proj", "w_fc1", "w_fc2"):
        params_bf16[name] = params[name].astype(jnp.bfloat16)

    x = jax.random.normal(kx, (B, N, hidden_size), jnp.float32)
    t = jax.random.normal(kt, (B, 6 * hidden_size), jnp.float32)
    t0 = jax.random.normal(kt0, (B, 6 * hidden_size), jnp.float32)
    x_mask = jnp.array([[True, True, False, False],
                        [True, False, True, True]])

    # Small-tile overrides exercise the multi-step online-softmax (kv tiling),
    # the causal cross-tile mask and the MLP hidden-dim accumulation.
    small_s = dict(attn_seq_tile=8, qkv_token_tile=8,
                   mlp_token_tile=8, mlp_hidden_tile=128)
    small_t = dict(attn_seq_tile=2, qkv_token_tile=8,
                   mlp_token_tile=8, mlp_hidden_tile=128)

    configs = [
        (dict(temporal=False), {}, params, 2e-2),
        (dict(temporal=True), {}, params, 2e-2),
        (dict(temporal=False, x_mask=x_mask, t0=t0), small_s, params, 2e-2),
        (dict(temporal=True, x_mask=x_mask, t0=t0), small_t, params, 2e-2),
        (dict(temporal=False), {}, params_bf16, 6e-2),   # bf16 MXU operands
    ]

    for sem_kwargs, tile_kwargs, prm, tol in configs:
        out = stdit3_block_forward(prm, x, t, T=T, S=S, num_heads=num_heads,
                                   **sem_kwargs, **tile_kwargs)
        out = jax.block_until_ready(out)
        ref = reference_forward(params, x, t, T=T, S=S, num_heads=num_heads,
                                **sem_kwargs)
        np.testing.assert_allclose(np.asarray(out), np.asarray(ref),
                                   atol=tol, rtol=tol)

    print("KERNEL_OK")
</pallas_src>

<mosaic_0001>
module attributes {stable_mosaic.version = 11 : i64} {
  func.func @_qkv_kernel(%arg0: i32, %arg1: i32, %arg2: i32, %arg3: memref<1x4x16x64xf32, #tpu.memory_space<vmem>>, %arg4: memref<1x4x3x64xf32, #tpu.memory_space<vmem>>, %arg5: memref<64x192xf32, #tpu.memory_space<vmem>>, %arg6: memref<1x192xf32, #tpu.memory_space<vmem>>, %arg7: memref<1x4x16x64xf32, #tpu.memory_space<vmem>>, %arg8: memref<1x4x16x64xf32, #tpu.memory_space<vmem>>, %arg9: memref<1x4x16x64xf32, #tpu.memory_space<vmem>>) attributes {dimension_semantics = [#tpu.dimension_semantics<parallel>, #tpu.dimension_semantics<parallel>, #tpu.dimension_semantics<parallel>], iteration_bounds = array<i64: 2, 1, 1>, scalar_prefetch = 0 : i64, scratch_operands = 0 : i64, tpu.core_type = #tpu.core_type<tc>, window_params = [{transform_indices = @transform_0, window_bounds = array<i64: 1, 4, 16, 64>}, {transform_indices = @transform_1, window_bounds = array<i64: 1, 4, 3, 64>}, {pipeline_mode = #tpu.pipeline_mode<synchronous>, transform_indices = @transform_2, window_bounds = array<i64: 64, 192>}, {pipeline_mode = #tpu.pipeline_mode<synchronous>, transform_indices = @transform_3, window_bounds = array<i64: 1, 192>}, {transform_indices = @transform_4, window_bounds = array<i64: 1, 4, 16, 64>}, {transform_indices = @transform_5, window_bounds = array<i64: 1, 4, 16, 64>}, {transform_indices = @transform_6, window_bounds = array<i64: 1, 4, 16, 64>}]} {
    %c0 = arith.constant 0 : index
    %c0_0 = arith.constant 0 : index
    %c0_1 = arith.constant 0 : index
    %c0_2 = arith.constant 0 : index
    %0 = vector.load %arg3[%c0, %c0_0, %c0_1, %c0_2] : memref<1x4x16x64xf32, #tpu.memory_space<vmem>>, vector<1x4x16x64xf32>
    %1 = vector.shape_cast %0 : vector<1x4x16x64xf32> to vector<4x16x64xf32>
    %c0_3 = arith.constant 0 : index
    %c0_4 = arith.constant 0 : index
    %c0_5 = arith.constant 0 : index
    %c0_6 = arith.constant 0 : index
    %2 = vector.load %arg4[%c0_3, %c0_4, %c0_5, %c0_6] : memref<1x4x3x64xf32, #tpu.memory_space<vmem>>, vector<1x4x3x64xf32>
    %3 = vector.shape_cast %2 : vector<1x4x3x64xf32> to vector<4x3x64xf32>
    %4 = vector.extract_strided_slice %3 {offsets = [0, 0, 0], sizes = [4, 1, 64], strides = [1, 1, 1]} : vector<4x3x64xf32> to vector<4x1x64xf32>
    %5 = vector.extract_strided_slice %3 {offsets = [0, 1, 0], sizes = [4, 1, 64], strides = [1, 1, 1]} : vector<4x3x64xf32> to vector<4x1x64xf32>
    %cst = arith.constant dense<0.000000e+00> : vector<4x16xf32>
    %6 = vector.multi_reduction <add>, %1, %cst [2] : vector<4x16x64xf32> to vector<4x16xf32>
    %7 = vector.shape_cast %6 : vector<4x16xf32> to vector<4x16x1xf32>
    %cst_7 = arith.constant 6.400000e+01 : f32
    %8 = vector.broadcast %cst_7 : f32 to vector<4x16x1xf32>
    %9 = arith.divf %7, %8 : vector<4x16x1xf32>
    %10 = vector.broadcast %9 : vector<4x16x1xf32> to vector<4x16x64xf32>
    %11 = arith.subf %1, %10 : vector<4x16x64xf32>
    %12 = arith.mulf %11, %11 : vector<4x16x64xf32>
    %cst_8 = arith.constant dense<0.000000e+00> : vector<4x16xf32>
    %13 = vector.multi_reduction <add>, %12, %cst_8 [2] : vector<4x16x64xf32> to vector<4x16xf32>
    %14 = vector.shape_cast %13 : vector<4x16xf32> to vector<4x16x1xf32>
    %cst_9 = arith.constant 6.400000e+01 : f32
    %15 = vector.broadcast %cst_9 : f32 to vector<4x16x1xf32>
    %16 = arith.divf %14, %15 : vector<4x16x1xf32>
    %17 = vector.broadcast %9 : vector<4x16x1xf32> to vector<4x16x64xf32>
    %18 = arith.subf %1, %17 : vector<4x16x64xf32>
    %cst_10 = arith.constant 9.99999997E-7 : f32
    %19 = vector.broadcast %cst_10 : f32 to vector<4x16x1xf32>
    %20 = arith.addf %16, %19 : vector<4x16x1xf32>
    %21 = math.rsqrt %20 : vector<4x16x1xf32>
    %22 = vector.broadcast %21 : vector<4x16x1xf32> to vector<4x16x64xf32>
    %23 = arith.mulf %18, %22 : vector<4x16x64xf32>
    %cst_11 = arith.constant 1.000000e+00 : f32
    %24 = vector.broadcast %cst_11 : f32 to vector<4x1x64xf32>
    %25 = arith.addf %24, %5 : vector<4x1x64xf32>
    %26 = vector.broadcast %25 : vector<4x1x64xf32> to vector<4x16x64xf32>
    %27 = arith.mulf %23, %26 : vector<4x16x64xf32>
    %28 = vector.broadcast %4 : vector<4x1x64xf32> to vector<4x16x64xf32>
    %29 = arith.addf %27, %28 : vector<4x16x64xf32>
    %30 = vector.shape_cast %29 : vector<4x16x64xf32> to vector<64x64xf32>
    %c0_12 = arith.constant 0 : index
    %c0_13 = arith.constant 0 : index
    %31 = vector.load %arg5[%c0_12, %c0_13] : memref<64x192xf32, #tpu.memory_space<vmem>>, vector<64x192xf32>
    %cst_14 = arith.constant dense<0.000000e+00> : vector<64x192xf32>
    %32 = tpu.matmul %30, %31, %cst_14 {dimension_numbers = #tpu.dot_dimension_numbers<[1], [0], [0], [1], [0, 0, 1, 1], [], []>} : vector<64x64xf32>, vector<64x192xf32>, vector<64x192xf32> -> vector<64x192xf32>
    %c0_15 = arith.constant 0 : index
    %c0_16 = arith.constant 0 : index
    %33 = vector.load %arg6[%c0_15, %c0_16] : memref<1x192xf32, #tpu.memory_space<vmem>>, vector<1x192xf32>
    %34 = vector.broadcast %33 : vector<1x192xf32> to vector<64x192xf32>
    %35 = arith.addf %32, %34 : vector<64x192xf32>
    %36 = vector.extract_strided_slice %35 {offsets = [0, 0], sizes = [64, 64], strides = [1, 1]} : vector<64x192xf32> to vector<64x64xf32>
    %cst_17 = arith.constant 2.500000e-01 : f32
    %37 = vector.broadcast %cst_17 : f32 to vector<64x64xf32>
    %38 = arith.mulf %36, %37 : vector<64x64xf32>
    %39 = vector.shape_cast %38 : vector<64x64xf32> to vector<4x16x64xf32>
    %c0_18 = arith.constant 0 : index
    %c0_19 = arith.constant 0 : index
    %c0_20 = arith.constant 0 : index
    %c0_21 = arith.constant 0 : index
    %40 = vector.load %arg7[%c0_18, %c0_19, %c0_20, %c0_21] : memref<1x4x16x64xf32, #tpu.memory_space<vmem>>, vector<1x4x16x64xf32>
    %41 = vector.shape_cast %40 : vector<1x4x16x64xf32> to vector<4x16x64xf32>
    %42 = vector.shape_cast %39 : vector<4x16x64xf32> to vector<1x4x16x64xf32>
    tpu.vector_store %arg7[%c0_18, %c0_19, %c0_20, %c0_21], %42 {strides = array<i32>} : memref<1x4x16x64xf32, #tpu.memory_space<vmem>>, vector<1x4x16x64xf32>,
    %43 = vector.extract_strided_slice %35 {offsets = [0, 64], sizes = [64, 64], strides = [1, 1]} : vector<64x192xf32> to vector<64x64xf32>
    %44 = vector.shape_cast %43 : vector<64x64xf32> to vector<4x16x64xf32>
    %c0_22 = arith.constant 0 : index
    %c0_23 = arith.constant 0 : index
    %c0_24 = arith.constant 0 : index
    %c0_25 = arith.constant 0 : index
    %45 = vector.load %arg8[%c0_22, %c0_23, %c0_24, %c0_25] : memref<1x4x16x64xf32, #tpu.memory_space<vmem>>, vector<1x4x16x64xf32>
    %46 = vector.shape_cast %45 : vector<1x4x16x64xf32> to vector<4x16x64xf32>
    %47 = vector.shape_cast %44 : vector<4x16x64xf32> to vector<1x4x16x64xf32>
    tpu.vector_store %arg8[%c0_22, %c0_23, %c0_24, %c0_25], %47 {strides = array<i32>} : memref<1x4x16x64xf32, #tpu.memory_space<vmem>>, vector<1x4x16x64xf32>,
    %48 = vector.extract_strided_slice %35 {offsets = [0, 128], sizes = [64, 64], strides = [1, 1]} : vector<64x192xf32> to vector<64x64xf32>
    %49 = vector.shape_cast %48 : vector<64x64xf32> to vector<4x16x64xf32>
    %c0_26 = arith.constant 0 : index
    %c0_27 = arith.constant 0 : index
    %c0_28 = arith.constant 0 : index
    %c0_29 = arith.constant 0 : index
    %50 = vector.load %arg9[%c0_26, %c0_27, %c0_28, %c0_29] : memref<1x4x16x64xf32, #tpu.memory_space<vmem>>, vector<1x4x16x64xf32>
    %51 = vector.shape_cast %50 : vector<1x4x16x64xf32> to vector<4x16x64xf32>
    %52 = vector.shape_cast %49 : vector<4x16x64xf32> to vector<1x4x16x64xf32>
    tpu.vector_store %arg9[%c0_26, %c0_27, %c0_28, %c0_29], %52 {strides = array<i32>} : memref<1x4x16x64xf32, #tpu.memory_space<vmem>>, vector<1x4x16x64xf32>,
    return
  }
  func.func @transform_0(%arg0: i32, %arg1: i32, %arg2: i32) -> (i32, i32, i32, i32) {
    %c0_i32 = arith.constant 0 : i32
    %c0_i32_0 = arith.constant 0 : i32
    return %arg0, %arg1, %arg2, %c0_i32 : i32, i32, i32, i32
  }
  func.func @transform_1(%arg0: i32, %arg1: i32, %arg2: i32) -> (i32, i32, i32, i32) {
    %c0_i32 = arith.constant 0 : i32
    %c0_i32_0 = arith.constant 0 : i32
    %c0_i32_1 = arith.constant 0 : i32
    return %arg0, %arg1, %c0_i32, %c0_i32_0 : i32, i32, i32, i32
  }
  func.func @transform_2(%arg0: i32, %arg1: i32, %arg2: i32) -> (i32, i32) {
    %c0_i32 = arith.constant 0 : i32
    %c0_i32_0 = arith.constant 0 : i32
    %c0_i32_1 = arith.constant 0 : i32
    return %c0_i32, %c0_i32_0 : i32, i32
  }
  func.func @transform_3(%arg0: i32, %arg1: i32, %arg2: i32) -> (i32, i32) {
    %c0_i32 = arith.constant 0 : i32
    %c0_i32_0 = arith.constant 0 : i32
    %c0_i32_1 = arith.constant 0 : i32
    return %c0_i32, %c0_i32_0 : i32, i32
  }
  func.func @transform_4(%arg0: i32, %arg1: i32, %arg2: i32) -> (i32, i32, i32, i32) {
    %c0_i32 = arith.constant 0 : i32
    %c0_i32_0 = arith.constant 0 : i32
    return %arg0, %arg1, %arg2, %c0_i32 : i32, i32, i32, i32
  }
  func.func @transform_5(%arg0: i32, %arg1: i32, %arg2: i32) -> (i32, i32, i32, i32) {
    %c0_i32 = arith.constant 0 : i32
    %c0_i32_0 = arith.constant 0 : i32
    return %arg0, %arg1, %arg2, %c0_i32 : i32, i32, i32, i32
  }
  func.func @transform_6(%arg0: i32, %arg1: i32, %arg2: i32) -> (i32, i32, i32, i32) {
    %c0_i32 = arith.constant 0 : i32
    %c0_i32_0 = arith.constant 0 : i32
    return %arg0, %arg1, %arg2, %c0_i32 : i32, i32, i32, i32
  }
}

module attributes {stable_mosaic.version = 11 : i64} {
  func.func @_mlp_kernel(%arg0: i32, %arg1: i32, %arg2: i32, %arg3: i32, %arg4: memref<1x4x16x64xf32, #tpu.memory_space<vmem>>, %arg5: memref<1x4x3x64xf32, #tpu.memory_space<vmem>>, %arg6: memref<64x256xf32, #tpu.memory_space<vmem>>, %arg7: memref<1x256xf32, #tpu.memory_space<vmem>>, %arg8: memref<256x64xf32, #tpu.memory_space<vmem>>, %arg9: memref<1x64xf32, #tpu.memory_space<vmem>>, %arg10: memref<1x4x16x64xf32, #tpu.memory_space<vmem>>, %arg11: memref<64x64xf32, #tpu.memory_space<vmem>>, %arg12: memref<64x64xf32, #tpu.memory_space<vmem>>) attributes {dimension_semantics = [#tpu.dimension_semantics<parallel>, #tpu.dimension_semantics<parallel>, #tpu.dimension_semantics<parallel>, #tpu.dimension_semantics<arbitrary>], iteration_bounds = array<i64: 2, 1, 1, 1>, scalar_prefetch = 0 : i64, scratch_operands = 2 : i64, tpu.core_type = #tpu.core_type<tc>, window_params = [{transform_indices = @transform_0, window_bounds = array<i64: 1, 4, 16, 64>}, {transform_indices = @transform_1, window_bounds = array<i64: 1, 4, 3, 64>}, {transform_indices = @transform_2, window_bounds = array<i64: 64, 256>}, {transform_indices = @transform_3, window_bounds = array<i64: 1, 256>}, {transform_indices = @transform_4, window_bounds = array<i64: 256, 64>}, {pipeline_mode = #tpu.pipeline_mode<synchronous>, transform_indices = @transform_5, window_bounds = array<i64: 1, 64>}, {transform_indices = @transform_6, window_bounds = array<i64: 1, 4, 16, 64>}]} {
    %c0_i32 = arith.constant 0 : i32
    %0 = arith.cmpi eq, %arg3, %c0_i32 : i32
    %1 = arith.extui %0 : i1 to i32
    %c0_i32_0 = arith.constant 0 : i32
    %2 = arith.cmpi ne, %1, %c0_i32_0 : i32
    scf.if %2 {
      %c0_19 = arith.constant 0 : index
      %c0_20 = arith.constant 0 : index
      %c0_21 = arith.constant 0 : index
      %c0_22 = arith.constant 0 : index
      %30 = vector.load %arg4[%c0_19, %c0_20, %c0_21, %c0_22] : memref<1x4x16x64xf32, #tpu.memory_space<vmem>>, vector<1x4x16x64xf32>
      %31 = vector.shape_cast %30 : vector<1x4x16x64xf32> to vector<4x16x64xf32>
      %c0_23 = arith.constant 0 : index
      %c0_24 = arith.constant 0 : index
      %c0_25 = arith.constant 0 : index
      %c0_26 = arith.constant 0 : index
      %32 = vector.load %arg5[%c0_23, %c0_24, %c0_25, %c0_26] : memref<1x4x3x64xf32, #tpu.memory_space<vmem>>, vector<1x4x3x64xf32>
      %33 = vector.shape_cast %32 : vector<1x4x3x64xf32> to vector<4x3x64xf32>
      %34 = vector.extract_strided_slice %33 {offsets = [0, 0, 0], sizes = [4, 1, 64], strides = [1, 1, 1]} : vector<4x3x64xf32> to vector<4x1x64xf32>
      %35 = vector.extract_strided_slice %33 {offsets = [0, 1, 0], sizes = [4, 1, 64], strides = [1, 1, 1]} : vector<4x3x64xf32> to vector<4x1x64xf32>
      %cst_27 = arith.constant dense<0.000000e+00> : vector<4x16xf32>
      %36 = vector.multi_reduction <add>, %31, %cst_27 [2] : vector<4x16x64xf32> to vector<4x16xf32>
      %37 = vector.shape_cast %36 : vector<4x16xf32> to vector<4x16x1xf32>
      %cst_28 = arith.constant 6.400000e+01 : f32
      %38 = vector.broadcast %cst_28 : f32 to vector<4x16x1xf32>
      %39 = arith.divf %37, %38 : vector<4x16x1xf32>
      %40 = vector.broadcast %39 : vector<4x16x1xf32> to vector<4x16x64xf32>
      %41 = arith.subf %31, %40 : vector<4x16x64xf32>
      %42 = arith.mulf %41, %41 : vector<4x16x64xf32>
      %cst_29 = arith.constant dense<0.000000e+00> : vector<4x16xf32>
      %43 = vector.multi_reduction <add>, %42, %cst_29 [2] : vector<4x16x64xf32> to vector<4x16xf32>
      %44 = vector.shape_cast %43 : vector<4x16xf32> to vector<4x16x1xf32>
      %cst_30 = arith.constant 6.400000e+01 : f32
      %45 = vector.broadcast %cst_30 : f32 to vector<4x16x1xf32>
      %46 = arith.divf %44, %45 : vector<4x16x1xf32>
      %47 = vector.broadcast %39 : vector<4x16x1xf32> to vector<4x16x64xf32>
      %48 = arith.subf %31, %47 : vector<4x16x64xf32>
      %cst_31 = arith.constant 9.99999997E-7 : f32
      %49 = vector.broadcast %cst_31 : f32 to vector<4x16x1xf32>
      %50 = arith.addf %46, %49 : vector<4x16x1xf32>
      %51 = math.rsqrt %50 : vector<4x16x1xf32>
      %52 = vector.broadcast %51 : vector<4x16x1xf32> to vector<4x16x64xf32>
      %53 = arith.mulf %48, %52 : vector<4x16x64xf32>
      %cst_32 = arith.constant 1.000000e+00 : f32
      %54 = vector.broadcast %cst_32 : f32 to vector<4x1x64xf32>
      %55 = arith.addf %54, %35 : vector<4x1x64xf32>
      %56 = vector.broadcast %55 : vector<4x1x64xf32> to vector<4x16x64xf32>
      %57 = arith.mulf %53, %56 : vector<4x16x64xf32>
      %58 = vector.broadcast %34 : vector<4x1x64xf32> to vector<4x16x64xf32>
      %59 = arith.addf %57, %58 : vector<4x16x64xf32>
      %60 = vector.shape_cast %59 : vector<4x16x64xf32> to vector<64x64xf32>
      %c0_33 = arith.constant 0 : index
      %c0_34 = arith.constant 0 : index
      %61 = vector.load %arg11[%c0_33, %c0_34] : memref<64x64xf32, #tpu.memory_space<vmem>>, vector<64x64xf32>
      tpu.vector_store %arg11[%c0_33, %c0_34], %60 {strides = array<i32>} : memref<64x64xf32, #tpu.memory_space<vmem>>, vector<64x64xf32>,
      %cst_35 = arith.constant 0.000000e+00 : f32
      %62 = vector.broadcast %cst_35 : f32 to vector<64x64xf32>
      %c0_36 = arith.constant 0 : index
      %c0_37 = arith.constant 0 : index
      %63 = vector.load %arg12[%c0_36, %c0_37] : memref<64x64xf32, #tpu.memory_space<vmem>>, vector<64x64xf32>
      tpu.vector_store %arg12[%c0_36, %c0_37], %62 {strides = array<i32>} : memref<64x64xf32, #tpu.memory_space<vmem>>, vector<64x64xf32>,
    } else {
    }
    %c0 = arith.constant 0 : index
    %c0_1 = arith.constant 0 : index
    %3 = vector.load %arg11[%c0, %c0_1] : memref<64x64xf32, #tpu.memory_space<vmem>>, vector<64x64xf32>
    %c0_2 = arith.constant 0 : index
    %c0_3 = arith.constant 0 : index
    %4 = vector.load %arg6[%c0_2, %c0_3] : memref<64x256xf32, #tpu.memory_space<vmem>>, vector<64x256xf32>
    %cst = arith.constant dense<0.000000e+00> : vector<64x256xf32>
    %5 = tpu.matmul %3, %4, %cst {dimension_numbers = #tpu.dot_dimension_numbers<[1], [0], [0], [1], [0, 0, 1, 1], [], []>} : vector<64x64xf32>, vector<64x256xf32>, vector<64x256xf32> -> vector<64x256xf32>
    %c0_4 = arith.constant 0 : index
    %c0_5 = arith.constant 0 : index
    %6 = vector.load %arg7[%c0_4, %c0_5] : memref<1x256xf32, #tpu.memory_space<vmem>>, vector<1x256xf32>
    %7 = vector.broadcast %6 : vector<1x256xf32> to vector<64x256xf32>
    %8 = arith.addf %5, %7 : vector<64x256xf32>
    %cst_6 = arith.constant 5.000000e-01 : f32
    %9 = vector.broadcast %cst_6 : f32 to vector<64x256xf32>
    %10 = arith.mulf %9, %8 : vector<64x256xf32>
    %cst_7 = arith.constant 4.471500e-02 : f32
    %11 = vector.broadcast %cst_7 : f32 to vector<64x256xf32>
    %12 = arith.mulf %11, %8 : vector<64x256xf32>
    %13 = arith.mulf %12, %8 : vector<64x256xf32>
    %14 = arith.mulf %13, %8 : vector<64x256xf32>
    %15 = arith.addf %8, %14 : vector<64x256xf32>
    %cst_8 = arith.constant 0.797884583 : f32
    %16 = vector.broadcast %cst_8 : f32 to vector<64x256xf32>
    %17 = arith.mulf %16, %15 : vector<64x256xf32>
    %18 = math.tanh %17 : vector<64x256xf32>
    %cst_9 = arith.constant 1.000000e+00 : f32
    %19 = vector.broadcast %cst_9 : f32 to vector<64x256xf32>
    %20 = arith.addf %19, %18 : vector<64x256xf32>
    %21 = arith.mulf %10, %20 : vector<64x256xf32>
    %c0_10 = arith.constant 0 : index
    %c0_11 = arith.constant 0 : index
    %22 = vector.load %arg12[%c0_10, %c0_11] : memref<64x64xf32, #tpu.memory_space<vmem>>, vector<64x64xf32>
    %c0_12 = arith.constant 0 : index
    %c0_13 = arith.constant 0 : index
    %23 = vector.load %arg8[%c0_12, %c0_13] : memref<256x64xf32, #tpu.memory_space<vmem>>, vector<256x64xf32>
    %cst_14 = arith.constant dense<0.000000e+00> : vector<64x64xf32>
    %24 = tpu.matmul %21, %23, %cst_14 {dimension_numbers = #tpu.dot_dimension_numbers<[1], [0], [0], [1], [0, 0, 1, 1], [], []>} : vector<64x256xf32>, vector<256x64xf32>, vector<64x64xf32> -> vector<64x64xf32>
    %25 = arith.addf %22, %24 : vector<64x64xf32>
    %c0_15 = arith.constant 0 : index
    %c0_16 = arith.constant 0 : index
    %26 = vector.load %arg12[%c0_15, %c0_16] : memref<64x64xf32, #tpu.memory_space<vmem>>, vector<64x64xf32>
    tpu.vector_store %arg12[%c0_15, %c0_16], %25 {strides = array<i32>} : memref<64x64xf32, #tpu.memory_space<vmem>>, vector<64x64xf32>,
    %c0_i32_17 = arith.constant 0 : i32
    %27 = arith.cmpi eq, %arg3, %c0_i32_17 : i32
    %28 = arith.extui %27 : i1 to i32
    %c0_i32_18 = arith.constant 0 : i32
    %29 = arith.cmpi ne, %28, %c0_i32_18 : i32
    scf.if %29 {
      %c0_19 = arith.constant 0 : index
      %c0_20 = arith.constant 0 : index
      %c0_21 = arith.constant 0 : index
      %c0_22 = arith.constant 0 : index
      %30 = vector.load %arg4[%c0_19, %c0_20, %c0_21, %c0_22] : memref<1x4x16x64xf32, #tpu.memory_space<vmem>>, vector<1x4x16x64xf32>
      %31 = vector.shape_cast %30 : vector<1x4x16x64xf32> to vector<4x16x64xf32>
      %c0_23 = arith.constant 0 : index
      %c0_24 = arith.constant 0 : index
      %c0_25 = arith.constant 0 : index
      %c0_26 = arith.constant 0 : index
      %32 = vector.load %arg5[%c0_23, %c0_24, %c0_25, %c0_26] : memref<1x4x3x64xf32, #tpu.memory_space<vmem>>, vector<1x4x3x64xf32>
      %33 = vector.shape_cast %32 : vector<1x4x3x64xf32> to vector<4x3x64xf32>
      %34 = vector.extract_strided_slice %33 {offsets = [0, 2, 0], sizes = [4, 1, 64], strides = [1, 1, 1]} : vector<4x3x64xf32> to vector<4x1x64xf32>
      %c0_27 = arith.constant 0 : index
      %c0_28 = arith.constant 0 : index
      %35 = vector.load %arg12[%c0_27, %c0_28] : memref<64x64xf32, #tpu.memory_space<vmem>>, vector<64x64xf32>
      %c0_29 = arith.constant 0 : index
      %c0_30 = arith.constant 0 : index
      %36 = vector.load %arg9[%c0_29, %c0_30] : memref<1x64xf32, #tpu.memory_space<vmem>>, vector<1x64xf32>
      %37 = vector.broadcast %36 : vector<1x64xf32> to vector<64x64xf32>
      %38 = arith.addf %35, %37 : vector<64x64xf32>
      %39 = vector.shape_cast %38 : vector<64x64xf32> to vector<4x16x64xf32>
      %40 = vector.broadcast %34 : vector<4x1x64xf32> to vector<4x16x64xf32>
      %41 = arith.mulf %40, %39 : vector<4x16x64xf32>
      %42 = arith.addf %31, %41 : vector<4x16x64xf32>
      %c0_31 = arith.constant 0 : index
      %c0_32 = arith.constant 0 : index
      %c0_33 = arith.constant 0 : index
      %c0_34 = arith.constant 0 : index
      %43 = vector.load %arg10[%c0_31, %c0_32, %c0_33, %c0_34] : memref<1x4x16x64xf32, #tpu.memory_space<vmem>>, vector<1x4x16x64xf32>
      %44 = vector.shape_cast %43 : vector<1x4x16x64xf32> to vector<4x16x64xf32>
      %45 = vector.shape_cast %42 : vector<4x16x64xf32> to vector<1x4x16x64xf32>
      tpu.vector_store %arg10[%c0_31, %c0_32, %c0_33, %c0_34], %45 {strides = array<i32>} : memref<1x4x16x64xf32, #tpu.memory_space<vmem>>, vector<1x4x16x64xf32>,
    } else {
    }
    return
  }
  func.func @transform_0(%arg0: i32, %arg1: i32, %arg2: i32, %arg3: i32) -> (i32, i32, i32, i32) {
    %c0_i32 = arith.constant 0 : i32
    %c0_i32_0 = arith.constant 0 : i32
    return %arg0, %arg1, %arg2, %c0_i32 : i32, i32, i32, i32
  }
  func.func @transform_1(%arg0: i32, %arg1: i32, %arg2: i32, %arg3: i32) -> (i32, i32, i32, i32) {
    %c0_i32 = arith.constant 0 : i32
    %c0_i32_0 = arith.constant 0 : i32
    %c0_i32_1 = arith.constant 0 : i32
    return %arg0, %arg1, %c0_i32, %c0_i32_0 : i32, i32, i32, i32
  }
  func.func @transform_2(%arg0: i32, %arg1: i32, %arg2: i32, %arg3: i32) -> (i32, i32) {
    %c0_i32 = arith.constant 0 : i32
    %c0_i32_0 = arith.constant 0 : i32
    return %c0_i32, %arg3 : i32, i32
  }
  func.func @transform_3(%arg0: i32, %arg1: i32, %arg2: i32, %arg3: i32) -> (i32, i32) {
    %c0_i32 = arith.constant 0 : i32
    %c0_i32_0 = arith.constant 0 : i32
    return %c0_i32, %arg3 : i32, i32
  }
  func.func @transform_4(%arg0: i32, %arg1: i32, %arg2: i32, %arg3: i32) -> (i32, i32) {
    %c0_i32 = arith.constant 0 : i32
    %c0_i32_0 = arith.constant 0 : i32
    return %arg3, %c0_i32 : i32, i32
  }
  func.func @transform_5(%arg0: i32, %arg1: i32, %arg2: i32, %arg3: i32) -> (i32, i32) {
    %c0_i32 = arith.constant 0 : i32
    %c0_i32_0 = arith.constant 0 : i32
    %c0_i32_1 = arith.constant 0 : i32
    return %c0_i32, %c0_i32_0 : i32, i32
  }
  func.func @transform_6(%arg0: i32, %arg1: i32, %arg2: i32, %arg3: i32) -> (i32, i32, i32, i32) {
    %c0_i32 = arith.constant 0 : i32
    %c0_i32_0 = arith.constant 0 : i32
    return %arg0, %arg1, %arg2, %c0_i32 : i32, i32, i32, i32
  }
}

module attributes {stable_mosaic.version = 11 : i64} {
  func.func @_flash_attn_kernel(%arg0: i32, %arg1: i32, %arg2: i32, %arg3: i32, %arg4: memref<1x4x16x64xf32, #tpu.memory_space<vmem>>, %arg5: memref<1x4x16x64xf32, #tpu.memory_space<vmem>>, %arg6: memref<1x4x16x64xf32, #tpu.memory_space<vmem>>, %arg7: memref<1x4x16x64xf32, #tpu.memory_space<vmem>>, %arg8: memref<1x4x3x64xf32, #tpu.memory_space<vmem>>, %arg9: memref<64x64xf32, #tpu.memory_space<vmem>>, %arg10: memref<1x64xf32, #tpu.memory_space<vmem>>, %arg11: memref<1x4x16x64xf32, #tpu.memory_space<vmem>>, %arg12: memref<16x16x1xf32, #tpu.memory_space<vmem>>, %arg13: memref<16x16x1xf32, #tpu.memory_space<vmem>>, %arg14: memref<16x16x16xf32, #tpu.memory_space<vmem>>) attributes {dimension_semantics = [#tpu.dimension_semantics<parallel>, #tpu.dimension_semantics<parallel>, #tpu.dimension_semantics<parallel>, #tpu.dimension_semantics<arbitrary>], iteration_bounds = array<i64: 2, 1, 1, 1>, scalar_prefetch = 0 : i64, scratch_operands = 3 : i64, tpu.core_type = #tpu.core_type<tc>, window_params = [{transform_indices = @transform_0, window_bounds = array<i64: 1, 4, 16, 64>}, {transform_indices = @transform_1, window_bounds = array<i64: 1, 4, 16, 64>}, {transform_indices = @transform_2, window_bounds = array<i64: 1, 4, 16, 64>}, {transform_indices = @transform_3, window_bounds = array<i64: 1, 4, 16, 64>}, {transform_indices = @transform_4, window_bounds = array<i64: 1, 4, 3, 64>}, {pipeline_mode = #tpu.pipeline_mode<synchronous>, transform_indices = @transform_5, window_bounds = array<i64: 64, 64>}, {pipeline_mode = #tpu.pipeline_mode<synchronous>, transform_indices = @transform_6, window_bounds = array<i64: 1, 64>}, {transform_indices = @transform_7, window_bounds = array<i64: 1, 4, 16, 64>}]} {
    %c0 = arith.constant 0 : index
    %c0_0 = arith.constant 0 : index
    %c0_1 = arith.constant 0 : index
    %c0_2 = arith.constant 0 : index
    %0 = vector.load %arg4[%c0, %c0_0, %c0_1, %c0_2] : memref<1x4x16x64xf32, #tpu.memory_space<vmem>>, vector<1x4x16x64xf32>
    %1 = vector.shape_cast %0 : vector<1x4x16x64xf32> to vector<4x16x64xf32>
    %c0_3 = arith.constant 0 : index
    %c0_4 = arith.constant 0 : index
    %c0_5 = arith.constant 0 : index
    %c0_6 = arith.constant 0 : index
    %2 = vector.load %arg5[%c0_3, %c0_4, %c0_5, %c0_6] : memref<1x4x16x64xf32, #tpu.memory_space<vmem>>, vector<1x4x16x64xf32>
    %3 = vector.shape_cast %2 : vector<1x4x16x64xf32> to vector<4x16x64xf32>
    %c0_7 = arith.constant 0 : index
    %c0_8 = arith.constant 0 : index
    %c0_9 = arith.constant 0 : index
    %c0_10 = arith.constant 0 : index
    %4 = vector.load %arg6[%c0_7, %c0_8, %c0_9, %c0_10] : memref<1x4x16x64xf32, #tpu.memory_space<vmem>>, vector<1x4x16x64xf32>
    %5 = vector.shape_cast %4 : vector<1x4x16x64xf32> to vector<4x16x64xf32>
    %c0_i32 = arith.constant 0 : i32
    %6 = arith.cmpi eq, %arg3, %c0_i32 : i32
    %7 = arith.extui %6 : i1 to i32
    %c0_i32_11 = arith.constant 0 : i32
    %8 = arith.cmpi ne, %7, %c0_i32_11 : i32
    scf.if %8 {
      %cst_35 = arith.constant 0xFF800000 : f32
      %65 = vector.broadcast %cst_35 : f32 to vector<16x16x1xf32>
      %c0_36 = arith.constant 0 : index
      %c0_37 = arith.constant 0 : index
      %c0_38 = arith.constant 0 : index
      %66 = vector.load %arg12[%c0_36, %c0_37, %c0_38] : memref<16x16x1xf32, #tpu.memory_space<vmem>>, vector<16x16x1xf32>
      tpu.vector_store %arg12[%c0_36, %c0_37, %c0_38], %65 {strides = array<i32>} : memref<16x16x1xf32, #tpu.memory_space<vmem>>, vector<16x16x1xf32>,
      %cst_39 = arith.constant 0.000000e+00 : f32
      %67 = vector.broadcast %cst_39 : f32 to vector<16x16x1xf32>
      %c0_40 = arith.constant 0 : index
      %c0_41 = arith.constant 0 : index
      %c0_42 = arith.constant 0 : index
      %68 = vector.load %arg13[%c0_40, %c0_41, %c0_42] : memref<16x16x1xf32, #tpu.memory_space<vmem>>, vector<16x16x1xf32>
      tpu.vector_store %arg13[%c0_40, %c0_41, %c0_42], %67 {strides = array<i32>} : memref<16x16x1xf32, #tpu.memory_space<vmem>>, vector<16x16x1xf32>,
      %cst_43 = arith.constant 0.000000e+00 : f32
      %69 = vector.broadcast %cst_43 : f32 to vector<16x16x16xf32>
      %c0_44 = arith.constant 0 : index
      %c0_45 = arith.constant 0 : index
      %c0_46 = arith.constant 0 : index
      %70 = vector.load %arg14[%c0_44, %c0_45, %c0_46] : memref<16x16x16xf32, #tpu.memory_space<vmem>>, vector<16x16x16xf32>
      tpu.vector_store %arg14[%c0_44, %c0_45, %c0_46], %69 {strides = array<i32>} : memref<16x16x16xf32, #tpu.memory_space<vmem>>, vector<16x16x16xf32>,
    } else {
    }
    %9 = vector.extract_strided_slice %1 {offsets = [0, 0, 0], sizes = [4, 16, 16], strides = [1, 1, 1]} : vector<4x16x64xf32> to vector<4x16x16xf32>
    %10 = vector.extract_strided_slice %1 {offsets = [0, 0, 16], sizes = [4, 16, 16], strides = [1, 1, 1]} : vector<4x16x64xf32> to vector<4x16x16xf32>
    %11 = vector.extract_strided_slice %1 {offsets = [0, 0, 32], sizes = [4, 16, 16], strides = [1, 1, 1]} : vector<4x16x64xf32> to vector<4x16x16xf32>
    %12 = vector.extract_strided_slice %1 {offsets = [0, 0, 48], sizes = [4, 16, 16], strides = [1, 1, 1]} : vector<4x16x64xf32> to vector<4x16x16xf32>
    %13 = vector.shape_cast %9 : vector<4x16x16xf32> to vector<1x4x16x16xf32>
    %14 = vector.shape_cast %10 : vector<4x16x16xf32> to vector<1x4x16x16xf32>
    %15 = vector.shape_cast %11 : vector<4x16x16xf32> to vector<1x4x16x16xf32>
    %16 = vector.shape_cast %12 : vector<4x16x16xf32> to vector<1x4x16x16xf32>
    %17 = tpu.concatenate %13, %14, %15, %16 in 0 : vector<1x4x16x16xf32>, vector<1x4x16x16xf32>, vector<1x4x16x16xf32>, vector<1x4x16x16xf32> -> vector<4x4x16x16xf32>
    %18 = vector.shape_cast %17 : vector<4x4x16x16xf32> to vector<16x16x16xf32>
    %19 = vector.extract_strided_slice %3 {offsets = [0, 0, 0], sizes = [4, 16, 16], strides = [1, 1, 1]} : vector<4x16x64xf32> to vector<4x16x16xf32>
    %20 = vector.extract_strided_slice %3 {offsets = [0, 0, 16], sizes = [4, 16, 16], strides = [1, 1, 1]} : vector<4x16x64xf32> to vector<4x16x16xf32>
    %21 = vector.extract_strided_slice %3 {offsets = [0, 0, 32], sizes = [4, 16, 16], strides = [1, 1, 1]} : vector<4x16x64xf32> to vector<4x16x16xf32>
    %22 = vector.extract_strided_slice %3 {offsets = [0, 0, 48], sizes = [4, 16, 16], strides = [1, 1, 1]} : vector<4x16x64xf32> to vector<4x16x16xf32>
    %23 = vector.shape_cast %19 : vector<4x16x16xf32> to vector<1x4x16x16xf32>
    %24 = vector.shape_cast %20 : vector<4x16x16xf32> to vector<1x4x16x16xf32>
    %25 = vector.shape_cast %21 : vector<4x16x16xf32> to vector<1x4x16x16xf32>
    %26 = vector.shape_cast %22 : vector<4x16x16xf32> to vector<1x4x16x16xf32>
    %27 = tpu.concatenate %23, %24, %25, %26 in 0 : vector<1x4x16x16xf32>, vector<1x4x16x16xf32>, vector<1x4x16x16xf32>, vector<1x4x16x16xf32> -> vector<4x4x16x16xf32>
    %28 = vector.shape_cast %27 : vector<4x4x16x16xf32> to vector<16x16x16xf32>
    %29 = vector.extract_strided_slice %5 {offsets = [0, 0, 0], sizes = [4, 16, 16], strides = [1, 1, 1]} : vector<4x16x64xf32> to vector<4x16x16xf32>
    %30 = vector.extract_strided_slice %5 {offsets = [0, 0, 16], sizes = [4, 16, 16], strides = [1, 1, 1]} : vector<4x16x64xf32> to vector<4x16x16xf32>
    %31 = vector.extract_strided_slice %5 {offsets = [0, 0, 32], sizes = [4, 16, 16], strides = [1, 1, 1]} : vector<4x16x64xf32> to vector<4x16x16xf32>
    %32 = vector.extract_strided_slice %5 {offsets = [0, 0, 48], sizes = [4, 16, 16], strides = [1, 1, 1]} : vector<4x16x64xf32> to vector<4x16x16xf32>
    %33 = vector.shape_cast %29 : vector<4x16x16xf32> to vector<1x4x16x16xf32>
    %34 = vector.shape_cast %30 : vector<4x16x16xf32> to vector<1x4x16x16xf32>
    %35 = vector.shape_cast %31 : vector<4x16x16xf32> to vector<1x4x16x16xf32>
    %36 = vector.shape_cast %32 : vector<4x16x16xf32> to vector<1x4x16x16xf32>
    %37 = tpu.concatenate %33, %34, %35, %36 in 0 : vector<1x4x16x16xf32>, vector<1x4x16x16xf32>, vector<1x4x16x16xf32>, vector<1x4x16x16xf32> -> vector<4x4x16x16xf32>
    %38 = vector.shape_cast %37 : vector<4x4x16x16xf32> to vector<16x16x16xf32>
    "tpu.trace_start"() <{level = 10 : i32, message = "bqd,bkd->bqk"}> : () -> ()
    %cst = arith.constant dense<0.000000e+00> : vector<16x16x16xf32>
    %39 = tpu.matmul %18, %28, %cst {dimension_numbers = #tpu.dot_dimension_numbers<[2], [2], [1], [1], [0, 0, 0, 1, 1, 1], [0], [0]>} : vector<16x16x16xf32>, vector<16x16x16xf32>, vector<16x16x16xf32> -> vector<16x16x16xf32>
    "tpu.trace_stop"() : () -> ()
    %c0_12 = arith.constant 0 : index
    %c0_13 = arith.constant 0 : index
    %c0_14 = arith.constant 0 : index
    %40 = vector.load %arg12[%c0_12, %c0_13, %c0_14] : memref<16x16x1xf32, #tpu.memory_space<vmem>>, vector<16x16x1xf32>
    %cst_15 = arith.constant dense<0xFF800000> : vector<16x16xf32>
    %41 = vector.multi_reduction <maximumf>, %39, %cst_15 [2] : vector<16x16x16xf32> to vector<16x16xf32>
    %42 = vector.shape_cast %41 : vector<16x16xf32> to vector<16x16x1xf32>
    %43 = arith.maximumf %40, %42 : vector<16x16x1xf32>
    %44 = arith.subf %40, %43 : vector<16x16x1xf32>
    %45 = math.exp %44 : vector<16x16x1xf32>
    %46 = vector.broadcast %43 : vector<16x16x1xf32> to vector<16x16x16xf32>
    %47 = arith.subf %39, %46 : vector<16x16x16xf32>
    %48 = math.exp %47 : vector<16x16x16xf32>
    %c0_16 = arith.constant 0 : index
    %c0_17 = arith.constant 0 : index
    %c0_18 = arith.constant 0 : index
    %49 = vector.load %arg13[%c0_16, %c0_17, %c0_18] : memref<16x16x1xf32, #tpu.memory_space<vmem>>, vector<16x16x1xf32>
    %50 = arith.mulf %45, %49 : vector<16x16x1xf32>
    %cst_19 = arith.constant dense<0.000000e+00> : vector<16x16xf32>
    %51 = vector.multi_reduction <add>, %48, %cst_19 [2] : vector<16x16x16xf32> to vector<16x16xf32>
    %52 = vector.shape_cast %51 : vector<16x16xf32> to vector<16x16x1xf32>
    %53 = arith.addf %50, %52 : vector<16x16x1xf32>
    %c0_20 = arith.constant 0 : index
    %c0_21 = arith.constant 0 : index
    %c0_22 = arith.constant 0 : index
    %54 = vector.load %arg13[%c0_20, %c0_21, %c0_22] : memref<16x16x1xf32, #tpu.memory_space<vmem>>, vector<16x16x1xf32>
    tpu.vector_store %arg13[%c0_20, %c0_21, %c0_22], %53 {strides = array<i32>} : memref<16x16x1xf32, #tpu.memory_space<vmem>>, vector<16x16x1xf32>,
    %c0_23 = arith.constant 0 : index
    %c0_24 = arith.constant 0 : index
    %c0_25 = arith.constant 0 : index
    %55 = vector.load %arg14[%c0_23, %c0_24, %c0_25] : memref<16x16x16xf32, #tpu.memory_space<vmem>>, vector<16x16x16xf32>
    %56 = vector.broadcast %45 : vector<16x16x1xf32> to vector<16x16x16xf32>
    %57 = arith.mulf %56, %55 : vector<16x16x16xf32>
    "tpu.trace_start"() <{level = 10 : i32, message = "bqk,bkd->bqd"}> : () -> ()
    %cst_26 = arith.constant dense<0.000000e+00> : vector<16x16x16xf32>
    %58 = tpu.matmul %48, %38, %cst_26 {dimension_numbers = #tpu.dot_dimension_numbers<[2], [1], [1], [2], [0, 0, 0, 1, 1, 2], [0], [0]>} : vector<16x16x16xf32>, vector<16x16x16xf32>, vector<16x16x16xf32> -> vector<16x16x16xf32>
    "tpu.trace_stop"() : () -> ()
    %59 = arith.addf %57, %58 : vector<16x16x16xf32>
    %c0_27 = arith.constant 0 : index
    %c0_28 = arith.constant 0 : index
    %c0_29 = arith.constant 0 : index
    %60 = vector.load %arg14[%c0_27, %c0_28, %c0_29] : memref<16x16x16xf32, #tpu.memory_space<vmem>>, vector<16x16x16xf32>
    tpu.vector_store %arg14[%c0_27, %c0_28, %c0_29], %59 {strides = array<i32>} : memref<16x16x16xf32, #tpu.memory_space<vmem>>, vector<16x16x16xf32>,
    %c0_30 = arith.constant 0 : index
    %c0_31 = arith.constant 0 : index
    %c0_32 = arith.constant 0 : index
    %61 = vector.load %arg12[%c0_30, %c0_31, %c0_32] : memref<16x16x1xf32, #tpu.memory_space<vmem>>, vector<16x16x1xf32>
    tpu.vector_store %arg12[%c0_30, %c0_31, %c0_32], %43 {strides = array<i32>} : memref<16x16x1xf32, #tpu.memory_space<vmem>>, vector<16x16x1xf32>,
    %c0_i32_33 = arith.constant 0 : i32
    %62 = arith.cmpi eq, %arg3, %c0_i32_33 : i32
    %63 = arith.extui %62 : i1 to i32
    %c0_i32_34 = arith.constant 0 : i32
    %64 = arith.cmpi ne, %63, %c0_i32_34 : i32
    scf.if %64 {
      %c0_35 = arith.constant 0 : index
      %c0_36 = arith.constant 0 : index
      %c0_37 = arith.constant 0 : index
      %65 = vector.load %arg13[%c0_35, %c0_36, %c0_37] : memref<16x16x1xf32, #tpu.memory_space<vmem>>, vector<16x16x1xf32>
      %66 = tpu.reciprocal %65 {approx = true} : vector<16x16x1xf32> -> vector<16x16x1xf32>
      %c0_38 = arith.constant 0 : index
      %c0_39 = arith.constant 0 : index
      %c0_40 = arith.constant 0 : index
      %67 = vector.load %arg14[%c0_38, %c0_39, %c0_40] : memref<16x16x16xf32, #tpu.memory_space<vmem>>, vector<16x16x16xf32>
      %68 = vector.broadcast %66 : vector<16x16x1xf32> to vector<16x16x16xf32>
      %69 = arith.mulf %67, %68 : vector<16x16x16xf32>
      %70 = vector.shape_cast %69 : vector<16x16x16xf32> to vector<4x4x16x16xf32>
      %71 = vector.extract_strided_slice %70 {offsets = [0, 0, 0, 0], sizes = [1, 4, 16, 16], strides = [1, 1, 1, 1]} : vector<4x4x16x16xf32> to vector<1x4x16x16xf32>
      %72 = vector.shape_cast %71 : vector<1x4x16x16xf32> to vector<4x16x16xf32>
      %73 = vector.extract_strided_slice %70 {offsets = [1, 0, 0, 0], sizes = [1, 4, 16, 16], strides = [1, 1, 1, 1]} : vector<4x4x16x16xf32> to vector<1x4x16x16xf32>
      %74 = vector.shape_cast %73 : vector<1x4x16x16xf32> to vector<4x16x16xf32>
      %75 = vector.extract_strided_slice %70 {offsets = [2, 0, 0, 0], sizes = [1, 4, 16, 16], strides = [1, 1, 1, 1]} : vector<4x4x16x16xf32> to vector<1x4x16x16xf32>
      %76 = vector.shape_cast %75 : vector<1x4x16x16xf32> to vector<4x16x16xf32>
      %77 = vector.extract_strided_slice %70 {offsets = [3, 0, 0, 0], sizes = [1, 4, 16, 16], strides = [1, 1, 1, 1]} : vector<4x4x16x16xf32> to vector<1x4x16x16xf32>
      %78 = vector.shape_cast %77 : vector<1x4x16x16xf32> to vector<4x16x16xf32>
      %79 = tpu.concatenate %72, %74, %76, %78 in 2 : vector<4x16x16xf32>, vector<4x16x16xf32>, vector<4x16x16xf32>, vector<4x16x16xf32> -> vector<4x16x64xf32>
      %80 = vector.shape_cast %79 : vector<4x16x64xf32> to vector<64x64xf32>
      %c0_41 = arith.constant 0 : index
      %c0_42 = arith.constant 0 : index
      %81 = vector.load %arg9[%c0_41, %c0_42] : memref<64x64xf32, #tpu.memory_space<vmem>>, vector<64x64xf32>
      %cst_43 = arith.constant dense<0.000000e+00> : vector<64x64xf32>
      %82 = tpu.matmul %80, %81, %cst_43 {dimension_numbers = #tpu.dot_dimension_numbers<[1], [0], [0], [1], [0, 0, 1, 1], [], []>} : vector<64x64xf32>, vector<64x64xf32>, vector<64x64xf32> -> vector<64x64xf32>
      %c0_44 = arith.constant 0 : index
      %c0_45 = arith.constant 0 : index
      %83 = vector.load %arg10[%c0_44, %c0_45] : memref<1x64xf32, #tpu.memory_space<vmem>>, vector<1x64xf32>
      %84 = vector.broadcast %83 : vector<1x64xf32> to vector<64x64xf32>
      %85 = arith.addf %82, %84 : vector<64x64xf32>
      %86 = vector.shape_cast %85 : vector<64x64xf32> to vector<4x16x64xf32>
      %c0_46 = arith.constant 0 : index
      %c0_47 = arith.constant 0 : index
      %c0_48 = arith.constant 0 : index
      %c0_49 = arith.constant 0 : index
      %87 = vector.load %arg8[%c0_46, %c0_47, %c0_48, %c0_49] : memref<1x4x3x64xf32, #tpu.memory_space<vmem>>, vector<1x4x3x64xf32>
      %88 = vector.shape_cast %87 : vector<1x4x3x64xf32> to vector<4x3x64xf32>
      %89 = vector.extract_strided_slice %88 {offsets = [0, 2, 0], sizes = [4, 1, 64], strides = [1, 1, 1]} : vector<4x3x64xf32> to vector<4x1x64xf32>
      %c0_50 = arith.constant 0 : index
      %c0_51 = arith.constant 0 : index
      %c0_52 = arith.constant 0 : index
      %c0_53 = arith.constant 0 : index
      %90 = vector.load %arg7[%c0_50, %c0_51, %c0_52, %c0_53] : memref<1x4x16x64xf32, #tpu.memory_space<vmem>>, vector<1x4x16x64xf32>
      %91 = vector.shape_cast %90 : vector<1x4x16x64xf32> to vector<4x16x64xf32>
      %92 = vector.broadcast %89 : vector<4x1x64xf32> to vector<4x16x64xf32>
      %93 = arith.mulf %92, %86 : vector<4x16x64xf32>
      %94 = arith.addf %91, %93 : vector<4x16x64xf32>
      %c0_54 = arith.constant 0 : index
      %c0_55 = arith.constant 0 : index
      %c0_56 = arith.constant 0 : index
      %c0_57 = arith.constant 0 : index
      %95 = vector.load %arg11[%c0_54, %c0_55, %c0_56, %c0_57] : memref<1x4x16x64xf32, #tpu.memory_space<vmem>>, vector<1x4x16x64xf32>
      %96 = vector.shape_cast %95 : vector<1x4x16x64xf32> to vector<4x16x64xf32>
      %97 = vector.shape_cast %94 : vector<4x16x64xf32> to vector<1x4x16x64xf32>
      tpu.vector_store %arg11[%c0_54, %c0_55, %c0_56, %c0_57], %97 {strides = array<i32>} : memref<1x4x16x64xf32, #tpu.memory_space<vmem>>, vector<1x4x16x64xf32>,
    } else {
    }
    return
  }
  func.func @transform_0(%arg0: i32, %arg1: i32, %arg2: i32, %arg3: i32) -> (i32, i32, i32, i32) {
    %c0_i32 = arith.constant 0 : i32
    %c0_i32_0 = arith.constant 0 : i32
    return %arg0, %arg1, %arg2, %c0_i32 : i32, i32, i32, i32
  }
  func.func @transform_1(%arg0: i32, %arg1: i32, %arg2: i32, %arg3: i32) -> (i32, i32, i32, i32) {
    %c0_i32 = arith.constant 0 : i32
    %c0_i32_0 = arith.constant 0 : i32
    return %arg0, %arg1, %arg3, %c0_i32 : i32, i32, i32, i32
  }
  func.func @transform_2(%arg0: i32, %arg1: i32, %arg2: i32, %arg3: i32) -> (i32, i32, i32, i32) {
    %c0_i32 = arith.constant 0 : i32
    %c0_i32_0 = arith.constant 0 : i32
    return %arg0, %arg1, %arg3, %c0_i32 : i32, i32, i32, i32
  }
  func.func @transform_3(%arg0: i32, %arg1: i32, %arg2: i32, %arg3: i32) -> (i32, i32, i32, i32) {
    %c0_i32 = arith.constant 0 : i32
    %c0_i32_0 = arith.constant 0 : i32
    return %arg0, %arg1, %arg2, %c0_i32 : i32, i32, i32, i32
  }
  func.func @transform_4(%arg0: i32, %arg1: i32, %arg2: i32, %arg3: i32) -> (i32, i32, i32, i32) {
    %c0_i32 = arith.constant 0 : i32
    %c0_i32_0 = arith.constant 0 : i32
    %c0_i32_1 = arith.constant 0 : i32
    return %arg0, %arg1, %c0_i32, %c0_i32_0 : i32, i32, i32, i32
  }
  func.func @transform_5(%arg0: i32, %arg1: i32, %arg2: i32, %arg3: i32) -> (i32, i32) {
    %c0_i32 = arith.constant 0 : i32
    %c0_i32_0 = arith.constant 0 : i32
    %c0_i32_1 = arith.constant 0 : i32
    return %c0_i32, %c0_i32_0 : i32, i32
  }
  func.func @transform_6(%arg0: i32, %arg1: i32, %arg2: i32, %arg3: i32) -> (i32, i32) {
    %c0_i32 = arith.constant 0 : i32
    %c0_i32_0 = arith.constant 0 : i32
    %c0_i32_1 = arith.constant 0 : i32
    return %c0_i32, %c0_i32_0 : i32, i32
  }
  func.func @transform_7(%arg0: i32, %arg1: i32, %arg2: i32, %arg3: i32) -> (i32, i32, i32, i32) {
    %c0_i32 = arith.constant 0 : i32
    %c0_i32_0 = arith.constant 0 : i32
    return %arg0, %arg1, %arg2, %c0_i32 : i32, i32, i32, i32
  }
}

</mosaic_0001>

<bundles_post_ra>
// kernel: stdit3_block_forward.3
= control target key start
LH: loop header
LB: loop body
LE: loop exit
PB: predicated region body
PF: predicated region fallthrough
CT: control target
= control target key end

     0   :  { %s1266_s21 = smov 0   ;;  %s1268_s22 = smov 0   ;;  %s1513_s0 = inlined_call_operand.vmem [shape: f32[2,4,16,64], index: 0, kind: input, shape index: {}]   ;;  %s1514_s1 = inlined_call_operand.vmem [shape: f32[2,4,3,64], index: 1, kind: input, shape index: {}]   ;;  %s1515_s2 = inlined_call_operand.vmem [shape: f32[64,192], index: 2, kind: input, shape index: {}]   ;;  %s1516_s3 = inlined_call_operand.vmem [shape: f32[1,192], index: 3, kind: input, shape index: {}]   ;;  %s1517_s4 = inlined_call_operand.vmem [shape: f32[2,4,16,64], index: 4, kind: output, shape index: {0}]   ;;  %s1518_s5 = inlined_call_operand.vmem [shape: f32[2,4,16,64], index: 5, kind: output, shape index: {1}]   ;;  %s1519_s6 = inlined_call_operand.vmem [shape: f32[2,4,16,64], index: 6, kind: output, shape index: {2}]  }
   0x1   :  { %s1270_s23 = smov 0  }
   0x2 LB: > { %s36_s24 = sadd.s32 1, %s1223_s22  ;;  %p1113_p0 = scmp.ge.s32.totalorder %s1227_s23, 1  ;;  %s1227_s23 = sphi %s1270_s23, %s17_s23   ;;  %s1223_s22 = sphi %s1268_s22, %s1521_s22   ;;  %s1219_s21 = sphi %s1266_s21, %s1520_s21  }
   0x3   : > { %p38_p1 = scmp.ge.s32.totalorder %s36_s24, 2  ;;  %p280_p2 = scmp.lt.s32.totalorder %s1227_s23, 3 }
   0x5   : > { %s1523_s24 = smov (%p38_p1, %s36_s24), 0  ;;  %p281_p3 = pnand %p1113_p0, %p280_p2 }
   0x6   : > { %p367_p4 = scmp.lt.s32.totalorder (!%p281_p3), %s1219_s21, 1  ;;  %vm451_vm0 = vcmask (!%p281_p3), 523264   ;;  %v610_v56 = vld [vmem:[%s1515_s2 + $0x8] sm:$0xff] (!%p281_p3)  ;;  %v612_v57 = vld [vmem:[%s1515_s2 + $0x18] sm:$0xff] (!%p281_p3)  ;;  %v609_v59 = vld [vmem:[%s1515_s2] sm:$0xff] (!%p281_p3)  ;;  %s1230_s10 = smov (!%p281_p3), 64  }
   0x7   : > { %284 = sbr.rel (%p281_p3) target bundleno = 682 (0x2aa), region = 36  ;;  %v1139_v58 = vpack.c.bf16 (!%p281_p3), %v612_v57, %v610_v56  ;;  %v611_v60 = vld [vmem:[%s1515_s2 + $0x10] sm:$0xff] (!%p281_p3)  ;;  %v614_v62 = vld [vmem:[%s1515_s2 + $0x28] sm:$0xff] (!%p281_p3)  ;;  %v616_v63 = vld [vmem:[%s1515_s2 + $0x38] sm:$0xff] (!%p281_p3) }
   0x8   : > { %v1141_v61 = vpack.c.bf16 (!%p281_p3), %v611_v60, %v609_v59 }
   0x9   : > { %1140 = vmatprep.subr.bf16.mxu0 (!%p281_p3), %v1139_v58  ;;  %1155 = vmatprep.subr.bf16.mxu1 (!%p281_p3), %v1139_v58 }
   0xa   : > { %1142 = vmatpush1.bf16.msra.mxu0 (!%p281_p3), %v1141_v61  ;;  %1159 = vmatpush1.bf16.msra.mxu1 (!%p281_p3), %v1141_v61 }
   0xe   : > { %s1525_s21 = smov (!%p367_p4, %s1219_s21), 1 }
   0xf   : > { %s1287_s25 = sshll.u32 %s1525_s21, 6  ;;  %s1135_s18 = sshll.u32 %s1525_s21, 4 }
  0x10   : > { %s378_s28 = scalar_lea.vmem %s1513_s0, %s1287_s25  ;;  %s1395_s26 = scalar_lea.vmem %s1514_s1, %s1135_s18 }
  0x11   : > { %v439_v0 = vld [vmem:[%s378_s28] sm:$0xff]  ;;  %v440_v1 = vld [vmem:[%s378_s28 + $0x8] sm:$0xff]  ;;  %v441_v8 = vld [vmem:[%s378_s28 + $0x10] sm:$0xff]  ;;  %s1444_s30 = scalar_lea.vmem %s1519_s6, %s1287_s25  ;;  %s1450_s9 = scalar_lea.vmem %s1517_s4, %s1287_s25 }
  0x12   : > { %v443_v2 = vld [vmem:[%s378_s28 + $0x20] sm:$0xff]  ;;  %v452_v3 = vsel %vm451_vm0, %v439_v0, 0.0  ;;  %v455_v4 = vsel %vm451_vm0, %v440_v1, 0.0  ;;  %v444_v5 = vld [vmem:[%s378_s28 + $0x28] sm:$0xff]  ;;  %v445_v9 = vld [vmem:[%s378_s28 + $0x30] sm:$0xff]  ;;  %v458_v10 = vsel %vm451_vm0, %v441_v8, 0.0  ;;  %s420_s13 = scalar_lea.vmem %s1518_s5, %s1287_s25 }
  0x13   : > { %453 = vadd.xlane.f32.xlu0 %v452_v3  ;;  %456 = vadd.xlane.f32.xlu1 %v455_v4  ;;  %v464_v6 = vsel %vm451_vm0, %v443_v2, 0.0  ;;  %v467_v7 = vsel %vm451_vm0, %v444_v5, 0.0  ;;  %v470_v11 = vsel %vm451_vm0, %v445_v9, 0.0  ;;  %v442_v12 = vld [vmem:[%s378_s28 + $0x18] sm:$0xff]  ;;  %v618_v4 = vld [vmem:[%s1515_s2 + $0x48] sm:$0xff] }
  0x14   : > { %v446_v13 = vld [vmem:[%s378_s28 + $0x38] sm:$0xff]  ;;  %v461_v14 = vsel %vm451_vm0, %v442_v12, 0.0  ;;  %v448_v59 = vld [vmem:[%s1395_s26 + $0x4] sm:$0x7] }
  0x15   : > { %v473_v15 = vsel %vm451_vm0, %v446_v13, 0.0 }
  0x17   : > { %465 = vadd.xlane.f32.xlu0 %v464_v6  ;;  %468 = vadd.xlane.f32.xlu1 %v467_v7  ;;  %v617_v7 = vld [vmem:[%s1515_s2 + $0x40] sm:$0xff] }
  0x1b   : > { %459 = vadd.xlane.f32.xlu0 %v458_v10  ;;  %471 = vadd.xlane.f32.xlu1 %v470_v11  ;;  %v622_v10 = vld [vmem:[%s1515_s2 + $0x68] sm:$0xff]  ;;  %v624_v11 = vld [vmem:[%s1515_s2 + $0x78] sm:$0xff] }
  0x1f   : > { %462 = vadd.xlane.f32.xlu0 %v461_v14  ;;  %474 = vadd.xlane.f32.xlu1 %v473_v15  ;;  %v623_v14 = vld [vmem:[%s1515_s2 + $0x70] sm:$0xff] }
  0xa0   : > { %v454_v16 = vpop.xlane.xlu0 %453  ;;  %v457_v17 = vpop.xlane.xlu1 %456 }
  0xa1   : > { %v477_v18 = vmul.f32 0.015625, %v454_v16  ;;  %v478_v19 = vmul.f32 0.015625, %v457_v17  ;;  %v1229_v16 = vmov 0.0  }
  0xa2   : > { %725 = vmatprep.mubr.f32.mxu0 %v1229_v16  ;;  %749 = vmatprep.mubr.f32.mxu1 %v1229_v16 }
  0xa3   : > { %v1301_v20 = vsub.f32 %v439_v0, %v477_v18  ;;  %v1303_v21 = vsub.f32 %v440_v1, %v478_v19  ;;  %v1143_v0 = vpack.c.bf16 %v616_v63, %v614_v62  ;;  %v613_v1 = vld [vmem:[%s1515_s2 + $0x20] sm:$0xff]  ;;  %v561_v19 = vlaneseq }
  0xa4   : > { %v466_v22 = vpop.xlane.xlu0 %465  ;;  %v469_v23 = vpop.xlane.xlu1 %468 }
  0xa5   : > { %v481_v24 = vmul.f32 0.015625, %v466_v22  ;;  %v482_v25 = vmul.f32 0.015625, %v469_v23  ;;  %v493_v26 = vmul.f32 %v1301_v20, %v1301_v20  ;;  %v494_v27 = vmul.f32 %v1303_v21, %v1303_v21  ;;  %1144 = vmatprep.subr.bf16.mxu0 %v1143_v0  ;;  %1156 = vmatprep.subr.bf16.mxu1 %v1143_v0 }
  0xa7   : > { %v1309_v28 = vsub.f32 %v443_v2, %v481_v24  ;;  %v1311_v29 = vsub.f32 %v444_v5, %v482_v25  ;;  %v501_v30 = vsel %vm451_vm0, %v493_v26, 0.0  ;;  %v504_v33 = vsel %vm451_vm0, %v494_v27, 0.0  ;;  %v615_v2 = vld [vmem:[%s1515_s2 + $0x30] sm:$0xff]  ;;  %v620_v5 = vld [vmem:[%s1515_s2 + $0x58] sm:$0xff] }
  0xa8   : > { %502 = vadd.xlane.f32.xlu0 %v501_v30  ;;  %v460_v31 = vpop.xlane.xlu0 %459  ;;  %v472_v32 = vpop.xlane.xlu1 %471  ;;  %v1145_v3 = vpack.c.bf16 %v615_v2, %v613_v1  ;;  %v1147_v6 = vpack.c.bf16 %v620_v5, %v618_v4  ;;  %v562_v27 = vshrl.u32 %v561_v19, 7  ;;  %v558_v1 = vadd.f32 1.0, %v448_v59  ;;  %v450_v2 = vld [vmem:[%s1395_s26 + $0xc] sm:$0x7] }
  0xa9   : > { %v479_v34 = vmul.f32 0.015625, %v460_v31  ;;  %v483_v35 = vmul.f32 0.015625, %v472_v32  ;;  %v497_v36 = vmul.f32 %v1309_v28, %v1309_v28  ;;  %v498_v37 = vmul.f32 %v1311_v29, %v1311_v29  ;;  %v447_v32 = vld [vmem:[%s1395_s26] sm:$0x7] }
  0xaa   : > { %1146 = vmatpush1.bf16.msra.mxu0 %v1145_v3  ;;  %1160 = vmatpush1.bf16.msra.mxu1 %v1145_v3 }
  0xab   : > { %v1319_v38 = vsub.f32 %v441_v8, %v479_v34  ;;  %v1321_v39 = vsub.f32 %v445_v9, %v483_v35  ;;  %v513_v40 = vsel %vm451_vm0, %v497_v36, 0.0  ;;  %v516_v43 = vsel %vm451_vm0, %v498_v37, 0.0  ;;  %v619_v8 = vld [vmem:[%s1515_s2 + $0x50] sm:$0xff]  ;;  %1148 = vmatprep.subr.bf16.mxu0 %v1147_v6  ;;  %1157 = vmatprep.subr.bf16.mxu1 %v1147_v6 }
  0xac   : > { %505 = vadd.xlane.f32.xlu0 %v504_v33  ;;  %514 = vadd.xlane.f32.xlu1 %v513_v40  ;;  %v463_v41 = vpop.xlane.xlu0 %462  ;;  %v475_v42 = vpop.xlane.xlu1 %474  ;;  %v1149_v9 = vpack.c.bf16 %v619_v8, %v617_v7  ;;  %v557_v37 = vadd.f32 1.0, %v447_v32  ;;  %v1398_v40 = vsub.s32 1, %v562_v27  ;;  %v560_v8 = vadd.f32 1.0, %v450_v2 }
  0xad   : > { %v480_v44 = vmul.f32 0.015625, %v463_v41  ;;  %v484_v45 = vmul.f32 0.015625, %v475_v42  ;;  %v495_v46 = vmul.f32 %v1319_v38, %v1319_v38  ;;  %v499_v47 = vmul.f32 %v1321_v39, %v1321_v39 }
  0xae   : > { %1150 = vmatpush1.bf16.msra.mxu0 %v1149_v9  ;;  %1161 = vmatpush1.bf16.msra.mxu1 %v1149_v9 }
  0xaf   : > { %v1329_v48 = vsub.f32 %v442_v12, %v480_v44  ;;  %v1331_v49 = vsub.f32 %v446_v13, %v484_v45  ;;  %v507_v50 = vsel %vm451_vm0, %v495_v46, 0.0  ;;  %v519_v51 = vsel %vm451_vm0, %v499_v47, 0.0  ;;  %v621_v13 = vld [vmem:[%s1515_s2 + $0x60] sm:$0xff] }
  0xb0   : > { %517 = vadd.xlane.f32.xlu1 %v516_v43  ;;  %508 = vadd.xlane.f32.xlu0 %v507_v50  ;;  %v1151_v12 = vpack.c.bf16 %v624_v11, %v622_v10  ;;  %v1153_v15 = vpack.c.bf16 %v623_v14, %v621_v13  ;;  %v449_v43 = vld [vmem:[%s1395_s26 + $0x8] sm:$0x7]  ;;  %v1401_v46 = vsub.s32 0, %v562_v27  ;;  %v568_v11 = vrot.slane %v558_v1, %v1398_v40 }
  0xb1   : > { %v496_v52 = vmul.f32 %v1329_v48, %v1329_v48  ;;  %v500_v53 = vmul.f32 %v1331_v49, %v1331_v49 }
  0xb2   : > { %1152 = vmatprep.subr.bf16.mxu0 %v1151_v12  ;;  %1158 = vmatprep.subr.bf16.mxu1 %v1151_v12  ;;  %v588_v58 = vrot.slane %v447_v32, %v1401_v46  ;;  %v596_v6 = vrot.slane %v449_v43, %v1401_v46 }
  0xb3   : > { %v510_v54 = vsel %vm451_vm0, %v496_v52, 0.0  ;;  %v522_v55 = vsel %vm451_vm0, %v500_v53, 0.0  ;;  %1154 = vmatpush1.bf16.msra.mxu0 %v1153_v15  ;;  %1162 = vmatpush1.bf16.msra.mxu1 %v1153_v15  ;;  %v559_v52 = vadd.f32 1.0, %v449_v43 }
  0xb4   : > { %520 = vadd.xlane.f32.xlu1 %v519_v51  ;;  %511 = vadd.xlane.f32.xlu0 %v510_v54  ;;  %v564_v51 = vrot.slane %v557_v37, %v1398_v40 }
  0xb5   : > { %v572_v62 = vrot.slane %v559_v52, %v1398_v40 }
  0xb8   : > { %523 = vadd.xlane.f32.xlu1 %v522_v55 }
 0x135   : > { %v503_v17 = vpop.xlane.xlu0 %502 }
 0x136   : > { %v525_v18 = vmul.f32 0.015625, %v503_v17  ;;  %v592_v17 = vrot.slane %v448_v59, %v1401_v46 }
 0x138   : > { %v533_v22 = vadd.f32 1e-06, %v525_v18  ;;  %v576_v18 = vrot.slane %v560_v8, %v1398_v40 }
 0x139   : > { %v515_v23 = vpop.xlane.xlu1 %514  ;;  %v506_v24 = vpop.xlane.xlu0 %505 }
 0x13a   : > { %1189 = vrsqrt.f32 %v533_v22  ;;  %v529_v25 = vmul.f32 0.015625, %v515_v23  ;;  %v526_v26 = vmul.f32 0.015625, %v506_v24 }
 0x13c   : > { %v537_v30 = vadd.f32 1e-06, %v529_v25  ;;  %v534_v31 = vadd.f32 1e-06, %v526_v26 }
 0x13d   : > { %v518_v33 = vpop.xlane.xlu1 %517  ;;  %v509_v34 = vpop.xlane.xlu0 %508 }
 0x13e   : > { %1191 = vrsqrt.f32 %v537_v30  ;;  %v530_v35 = vmul.f32 0.015625, %v518_v33  ;;  %v527_v36 = vmul.f32 0.015625, %v509_v34 }
 0x13f   : > { %1193 = vrsqrt.f32 %v534_v31 }
 0x140   : > { %v538_v41 = vadd.f32 1e-06, %v530_v35  ;;  %v535_v42 = vadd.f32 1e-06, %v527_v36  ;;  %v625_v35 = vld [vmem:[%s1516_s3] sm:$0x3] }
 0x141   : > { %v521_v44 = vpop.xlane.xlu1 %520  ;;  %v512_v45 = vpop.xlane.xlu0 %511  ;;  %v630_v36 = vrot.slane %v625_v35, %v1401_v46  ;;  %v634_v37 = vrot.slane %v625_v35, %v1398_v40 }
 0x142   : > { %1195 = vrsqrt.f32 %v538_v41  ;;  %v531_v47 = vmul.f32 0.015625, %v521_v44  ;;  %v528_v50 = vmul.f32 0.015625, %v512_v45 }
 0x143   : > { %1197 = vrsqrt.f32 %v535_v42 }
 0x144   : > { %v1190_v53 = vpop.eup %1189  ;;  %v539_v54 = vadd.f32 1e-06, %v531_v47  ;;  %v536_v55 = vadd.f32 1e-06, %v528_v50 }
 0x145   : > { %v524_v56 = vpop.xlane.xlu1 %523  ;;  %v549_v57 = vmul.f32 %v1190_v53, %v1301_v20 }
 0x146   : > { %1199 = vrsqrt.f32 %v539_v54  ;;  %v532_v60 = vmul.f32 0.015625, %v524_v56 }
 0x147   : > { %1201 = vrsqrt.f32 %v536_v55  ;;  %v577_v61 = vmul.f32 %v564_v51, %v549_v57 }
 0x148   : > { %v1192_v63 = vpop.eup %1191  ;;  %v540_v0 = vadd.f32 1e-06, %v532_v60 }
 0x149   : > { %v1194_v3 = vpop.eup %1193  ;;  %v601_v4 = vadd.f32 %v588_v58, %v577_v61  ;;  %v553_v5 = vmul.f32 %v1192_v63, %v1309_v28 }
 0x14a   : > { %1203 = vrsqrt.f32 %v540_v0  ;;  %v550_v20 = vmul.f32 %v1194_v3, %v1303_v21 }
 0x14b   : > { %1124 = vmatmul.mubr.msk.f32.vlgmr.msra.gmra.mrb[0].mxu0 %vm451_vm0, %v601_v4  ;;  %v581_v7 = vmul.f32 %v572_v62, %v553_v5 }
 0x14c   : > { %v1196_v9 = vpop.eup %1195  ;;  %731 = vmatprep.mubr.f32.mxu0 %v1229_v16  ;;  %v578_v10 = vmul.f32 %v564_v51, %v550_v20 }
 0x14d   : > { %v1198_v12 = vpop.eup %1197  ;;  %v605_v13 = vadd.f32 %v596_v6, %v581_v7  ;;  %v554_v14 = vmul.f32 %v1196_v9, %v1311_v29 }
 0x14e   : > { %v602_v28 = vadd.f32 %v588_v58, %v578_v10  ;;  %v551_v15 = vmul.f32 %v1198_v12, %v1319_v38  ;;  %v600_v38 = vrot.slane %v450_v2, %v1401_v46 }
 0x14f   : > { %1128 = vmatmul.mubr.msk.f32.vlgmr.msra.gmra.mrb[0].mxu1 %vm451_vm0, %v605_v13  ;;  %v582_v21 = vmul.f32 %v572_v62, %v554_v14 }
 0x150   : > { %v1200_v19 = vpop.eup %1199  ;;  %1125 = vmatmul.mubr.msk.f32.gmra.mrb[2].mxu0 %vm451_vm0, %v602_v28  ;;  %755 = vmatprep.mubr.f32.mxu1 %v1229_v16  ;;  %v579_v22 = vmul.f32 %v568_v11, %v551_v15 }
 0x151   : > { %v1202_v23 = vpop.eup %1201  ;;  %737 = vmatprep.mubr.f32.mxu0 %v1229_v16  ;;  %v606_v29 = vadd.f32 %v596_v6, %v582_v21  ;;  %v555_v24 = vmul.f32 %v1200_v19, %v1321_v39 }
 0x152   : > { %v603_v25 = vadd.f32 %v592_v17, %v579_v22  ;;  %v552_v26 = vmul.f32 %v1202_v23, %v1329_v48 }
 0x153   : > { %1129 = vmatmul.mubr.msk.f32.gmra.mrb[2].mxu1 %vm451_vm0, %v606_v29  ;;  %v583_v27 = vmul.f32 %v576_v18, %v555_v24 }
 0x154   : > { %v1204_v30 = vpop.eup %1203  ;;  %1126 = vmatmul.mubr.msk.f32.gmra.mrb[4].mxu0 %vm451_vm0, %v603_v25  ;;  %761 = vmatprep.mubr.f32.mxu1 %v1229_v16  ;;  %v580_v31 = vmul.f32 %v568_v11, %v552_v26 }
 0x155   : > { %743 = vmatprep.mubr.f32.mxu0 %v1229_v16  ;;  %v607_v32 = vadd.f32 %v600_v38, %v583_v27  ;;  %v556_v39 = vmul.f32 %v1204_v30, %v1331_v49 }
 0x156   : > { %v604_v33 = vadd.f32 %v592_v17, %v580_v31 }
 0x157   : > { %1130 = vmatmul.mubr.msk.f32.gmra.mrb[4].mxu1 %vm451_vm0, %v607_v32  ;;  %v584_v48 = vmul.f32 %v576_v18, %v556_v39 }
 0x158   : > { %1127 = vmatmul.mubr.msk.f32.gmra.mrb[6].mxu0 %vm451_vm0, %v604_v33  ;;  %767 = vmatprep.mubr.f32.mxu1 %v1229_v16 }
 0x159   : > { %v608_v34 = vadd.f32 %v600_v38, %v584_v48 }
 0x15b   : > { %1131 = vmatmul.mubr.msk.f32.gmra.mrb[6].mxu1 %vm451_vm0, %v608_v34 }
 0x21e   : > { %v727_v49 = vpop.f32.mrb[0].mxu0 }
 0x21f   : > { %v728_v41 = vadd.f32 %v727_v49, %v630_v36  ;;  %v729_v16 = vpop.f32.mrb[1].mxu0 }
 0x220   : > { %v730_v42 = vadd.f32 %v729_v16, %v634_v37 }
 0x221   : > { %v774_v43 = vmul.f32 0.25, %v728_v41  ;;  %798 = vrot.lane.b32.xlu0 %v728_v41, %s1230_s10 }
 0x222   : > { %830 = vst.msk [vmem:[%s1444_s30] sm:$0xff] %vm451_vm0, %v730_v42  ;;  %v751_v40 = vpop.f32.mrb[0].mxu1 }
 0x223   : > { %782 = vst.msk [vmem:[%s1450_s9] sm:$0xff] %vm451_vm0, %v774_v43  ;;  %v733_v44 = vpop.f32.mrb[2].mxu0  ;;  %v752_v45 = vadd.f32 %v751_v40, %v630_v36  ;;  %v753_v46 = vpop.f32.mrb[1].mxu1 }
 0x224   : > { %v734_v47 = vadd.f32 %v733_v44, %v630_v36  ;;  %v735_v50 = vpop.f32.mrb[3].mxu0  ;;  %v754_v51 = vadd.f32 %v753_v46, %v634_v37 }
 0x225   : > { %v778_v52 = vmul.f32 0.25, %v752_v45  ;;  %v736_v53 = vadd.f32 %v735_v50, %v634_v37  ;;  %806 = vrot.lane.b32.xlu0 %v752_v45, %s1230_s10 }
 0x226   : > { %v775_v54 = vmul.f32 0.25, %v734_v47  ;;  %834 = vst.msk [vmem:[%s1444_s30 + $0x20] sm:$0xff] %vm451_vm0, %v754_v51  ;;  %800 = vrot.lane.b32.xlu1 %v734_v47, %s1230_s10  ;;  %v757_v55 = vpop.f32.mrb[2].mxu1 }
 0x227   : > { %786 = vst.msk [vmem:[%s1450_s9 + $0x20] sm:$0xff] %vm451_vm0, %v778_v52  ;;  %831 = vst.msk [vmem:[%s1444_s30 + $0x8] sm:$0xff] %vm451_vm0, %v736_v53  ;;  %v739_v56 = vpop.f32.mrb[4].mxu0  ;;  %v758_v57 = vadd.f32 %v757_v55, %v630_v36  ;;  %v759_v58 = vpop.f32.mrb[3].mxu1 }
 0x228   : > { %783 = vst.msk [vmem:[%s1450_s9 + $0x8] sm:$0xff] %vm451_vm0, %v775_v54  ;;  %v740_v59 = vadd.f32 %v739_v56, %v630_v36  ;;  %v741_v60 = vpop.f32.mrb[5].mxu0  ;;  %v760_v61 = vadd.f32 %v759_v58, %v634_v37 }
 0x229   : > { %v779_v62 = vmul.f32 0.25, %v758_v57  ;;  %v742_v63 = vadd.f32 %v741_v60, %v634_v37 }
 0x22a   : > { %v776_v0 = vmul.f32 0.25, %v740_v59  ;;  %835 = vst.msk [vmem:[%s1444_s30 + $0x28] sm:$0xff] %vm451_vm0, %v760_v61  ;;  %808 = vrot.lane.b32.xlu1 %v758_v57, %s1230_s10  ;;  %v763_v1 = vpop.f32.mrb[4].mxu1 }
 0x22b   : > { %787 = vst.msk [vmem:[%s1450_s9 + $0x28] sm:$0xff] %vm451_vm0, %v779_v62  ;;  %832 = vst.msk [vmem:[%s1444_s30 + $0x10] sm:$0xff] %vm451_vm0, %v742_v63  ;;  %v745_v2 = vpop.f32.mrb[6].mxu0  ;;  %v764_v3 = vadd.f32 %v763_v1, %v630_v36  ;;  %v765_v4 = vpop.f32.mrb[5].mxu1 }
 0x22c   : > { %784 = vst.msk [vmem:[%s1450_s9 + $0x10] sm:$0xff] %vm451_vm0, %v776_v0  ;;  %v746_v5 = vadd.f32 %v745_v2, %v630_v36  ;;  %v747_v6 = vpop.f32.mrb[7].mxu0  ;;  %v766_v20 = vadd.f32 %v765_v4, %v634_v37 }
 0x22d   : > { %v780_v7 = vmul.f32 0.25, %v764_v3  ;;  %v748_v8 = vadd.f32 %v747_v6, %v634_v37  ;;  %810 = vrot.lane.b32.xlu0 %v764_v3, %s1230_s10 }
 0x22e   : > { %v777_v9 = vmul.f32 0.25, %v746_v5  ;;  %836 = vst.msk [vmem:[%s1444_s30 + $0x30] sm:$0xff] %vm451_vm0, %v766_v20  ;;  %802 = vrot.lane.b32.xlu1 %v740_v59, %s1230_s10  ;;  %v769_v10 = vpop.f32.mrb[6].mxu1 }
 0x22f   : > { %788 = vst.msk [vmem:[%s1450_s9 + $0x30] sm:$0xff] %vm451_vm0, %v780_v7  ;;  %833 = vst.msk [vmem:[%s1444_s30 + $0x18] sm:$0xff] %vm451_vm0, %v748_v8  ;;  %v770_v11 = vadd.f32 %v769_v10, %v630_v36  ;;  %v771_v12 = vpop.f32.mrb[7].mxu1 }
 0x230   : > { %785 = vst.msk [vmem:[%s1450_s9 + $0x18] sm:$0xff] %vm451_vm0, %v777_v9  ;;  %v772_v13 = vadd.f32 %v771_v12, %v634_v37 }
 0x231   : > { %v781_v14 = vmul.f32 0.25, %v770_v11 }
 0x232   : > { %837 = vst.msk [vmem:[%s1444_s30 + $0x38] sm:$0xff] %vm451_vm0, %v772_v13  ;;  %804 = vrot.lane.b32.xlu1 %v746_v5, %s1230_s10 }
 0x233   : > { %789 = vst.msk [vmem:[%s1450_s9 + $0x38] sm:$0xff] %vm451_vm0, %v781_v14 }
 0x236   : > { %812 = vrot.lane.b32.xlu1 %v770_v11, %s1230_s10 }
 0x293   : > { %v799_v28 = vpop.permute.xlu0 %798 }
 0x294   : > { %822 = vst.msk [vmem:[%s420_s13] sm:$0xff] %vm451_vm0, %v799_v28 }
 0x297   : > { %v807_v15 = vpop.permute.xlu0 %806 }
 0x298   : > { %v801_v17 = vpop.permute.xlu1 %800  ;;  %826 = vst.msk [vmem:[%s420_s13 + $0x20] sm:$0xff] %vm451_vm0, %v807_v15 }
 0x299   : > { %823 = vst.msk [vmem:[%s420_s13 + $0x8] sm:$0xff] %vm451_vm0, %v801_v17 }
 0x29c   : > { %v809_v21 = vpop.permute.xlu1 %808 }
 0x29d   : > { %827 = vst.msk [vmem:[%s420_s13 + $0x28] sm:$0xff] %vm451_vm0, %v809_v21 }
 0x29f   : > { %v811_v18 = vpop.permute.xlu0 %810 }
 0x2a0   : > { %v803_v19 = vpop.permute.xlu1 %802  ;;  %828 = vst.msk [vmem:[%s420_s13 + $0x30] sm:$0xff] %vm451_vm0, %v811_v18 }
 0x2a1   : > { %824 = vst.msk [vmem:[%s420_s13 + $0x10] sm:$0xff] %vm451_vm0, %v803_v19 }
 0x2a4   : > { %v805_v22 = vpop.permute.xlu1 %804 }
 0x2a5   : > { %825 = vst.msk [vmem:[%s420_s13 + $0x18] sm:$0xff] %vm451_vm0, %v805_v22 }
 0x2a8   : > { %v813_v23 = vpop.permute.xlu1 %812 }
 0x2a9   : > { %829 = vst.msk [vmem:[%s420_s13 + $0x38] sm:$0xff] %vm451_vm0, %v813_v23 }
 0x2aa PF: > { %s17_s23 = sadd.s32 1, %s1227_s23   ;;  %s1520_s21 = smov %s1223_s22 }
 0x2ab   : > { %p14_p5 = scmp.ge.s32.totalorder %s17_s23, 4   ;;  %s1521_s22 = smov %s1523_s24 }
 0x2ad   :  { %16 = sbr.rel (!%p14_p5) target bundleno = 2 (0x2), region = 93 }

// kernel: stdit3_block_forward.5
= control target key start
LH: loop header
LB: loop body
LE: loop exit
PB: predicated region body
PF: predicated region fallthrough
CT: control target
= control target key end

     0   :  { %s1643_s21 = smov 0   ;;  %s1645_s22 = smov 0   ;;  %s2147_s0 = inlined_call_operand.vmem [shape: f32[2,4,16,64], index: 0, kind: input, shape index: {}, may-alias: {0,6}]   ;;  %s2148_s1 = inlined_call_operand.vmem [shape: f32[2,4,3,64], index: 1, kind: input, shape index: {}]   ;;  %s2149_s2 = inlined_call_operand.vmem [shape: f32[64,256], index: 2, kind: input, shape index: {}]   ;;  %s2150_s3 = inlined_call_operand.vmem [shape: f32[1,256], index: 3, kind: input, shape index: {}]   ;;  %s2151_s4 = inlined_call_operand.vmem [shape: f32[256,64], index: 4, kind: input, shape index: {}]   ;;  %s2152_s5 = inlined_call_operand.vmem [shape: f32[1,64], index: 5, kind: input, shape index: {}]   ;;  %s2153_s6 = inlined_call_operand.vmem [shape: f32[2,4,16,64], index: 6, kind: output, shape index: {}, may-alias: {0,6}]  }
   0x1   :  { %s1647_s23 = smov 0  }
   0x2 LB: > { %s42_s24 = sadd.s32 1, %s1601_s22  ;;  %p1368_p0 = scmp.ge.s32.totalorder %s1605_s23, 1  ;;  %s1605_s23 = sphi %s1647_s23, %s16_s23   ;;  %s1601_s22 = sphi %s1645_s22, %s2155_s22   ;;  %s1597_s21 = sphi %s1643_s21, %s2154_s21  }
   0x3   : > { %p44_p1 = scmp.ge.s32.totalorder %s42_s24, 2  ;;  %p306_p2 = scmp.lt.s32.totalorder %s1605_s23, 3 }
   0x5   : > { %s2157_s24 = smov (%p44_p1, %s42_s24), 0  ;;  %p307_p3 = pnand %p1368_p0, %p306_p2 }
   0x6   : > { %p379_p4 = scmp.lt.s32.totalorder (!%p307_p3), %s1597_s21, 1  ;;  %vm452_vm0 = vcmask (!%p307_p3), 523264   ;;  %v635_v56 = vld [vmem:[%s2149_s2 + $0x8] sm:$0xff] (!%p307_p3)  ;;  %v637_v57 = vld [vmem:[%s2149_s2 + $0x18] sm:$0xff] (!%p307_p3)  ;;  %v634_v59 = vld [vmem:[%s2149_s2] sm:$0xff] (!%p307_p3) }
   0x7   : > { %310 = sbr.rel (%p307_p3) target bundleno = 843 (0x34b), region = 44  ;;  %v1445_v58 = vpack.c.bf16 (!%p307_p3), %v637_v57, %v635_v56  ;;  %v636_v60 = vld [vmem:[%s2149_s2 + $0x10] sm:$0xff] (!%p307_p3)  ;;  %v639_v62 = vld [vmem:[%s2149_s2 + $0x28] sm:$0xff] (!%p307_p3)  ;;  %v641_v63 = vld [vmem:[%s2149_s2 + $0x38] sm:$0xff] (!%p307_p3) }
   0x8   : > { %v1447_v61 = vpack.c.bf16 (!%p307_p3), %v636_v60, %v634_v59 }
   0x9   : > { %1446 = vmatprep.subr.bf16.mxu0 (!%p307_p3), %v1445_v58 }
   0xa   : > { %1448 = vmatpush1.bf16.msra.mxu0 (!%p307_p3), %v1447_v61 }
   0xe   : > { %s2159_s21 = smov (!%p379_p4, %s1597_s21), 1 }
   0xf   : > { %s1386_s25 = sshll.u32 %s2159_s21, 6  ;;  %s1387_s9 = sshll.u32 %s2159_s21, 4 }
  0x10   : > { %s1669_s28 = scalar_lea.vmem %s2147_s0, %s1386_s25  ;;  %s1811_s12 = scalar_lea.vmem %s2148_s1, %s1387_s9 }
  0x11   : > { %v440_v0 = vld [vmem:[%s1669_s28] sm:$0xff]  ;;  %v442_v1 = vld [vmem:[%s1669_s28 + $0x10] sm:$0xff]  ;;  %v441_v2 = vld [vmem:[%s1669_s28 + $0x8] sm:$0xff]  ;;  %s2097_s30 = scalar_lea.vmem %s2153_s6, %s1386_s25 }
  0x12   : > { %v453_v3 = vsel %vm452_vm0, %v440_v0, 0.0  ;;  %v459_v4 = vsel %vm452_vm0, %v442_v1, 0.0  ;;  %v443_v5 = vld [vmem:[%s1669_s28 + $0x18] sm:$0xff]  ;;  %v456_v6 = vsel %vm452_vm0, %v441_v2, 0.0  ;;  %v444_v8 = vld [vmem:[%s1669_s28 + $0x20] sm:$0xff]  ;;  %v445_v9 = vld [vmem:[%s1669_s28 + $0x28] sm:$0xff] }
  0x13   : > { %454 = vadd.xlane.f32.xlu0 %v453_v3  ;;  %460 = vadd.xlane.f32.xlu1 %v459_v4  ;;  %v462_v7 = vsel %vm452_vm0, %v443_v5, 0.0  ;;  %v465_v10 = vsel %vm452_vm0, %v444_v8, 0.0  ;;  %v468_v11 = vsel %vm452_vm0, %v445_v9, 0.0  ;;  %v446_v12 = vld [vmem:[%s1669_s28 + $0x30] sm:$0xff]  ;;  %v447_v13 = vld [vmem:[%s1669_s28 + $0x38] sm:$0xff]  ;;  %v643_v4 = vld [vmem:[%s2149_s2 + $0x48] sm:$0xff] }
  0x14   : > { %v471_v14 = vsel %vm452_vm0, %v446_v12, 0.0  ;;  %v474_v15 = vsel %vm452_vm0, %v447_v13, 0.0 }
  0x17   : > { %457 = vadd.xlane.f32.xlu0 %v456_v6  ;;  %463 = vadd.xlane.f32.xlu1 %v462_v7  ;;  %v642_v7 = vld [vmem:[%s2149_s2 + $0x40] sm:$0xff] }
  0x1b   : > { %466 = vadd.xlane.f32.xlu0 %v465_v10  ;;  %469 = vadd.xlane.f32.xlu1 %v468_v11  ;;  %v647_v10 = vld [vmem:[%s2149_s2 + $0x68] sm:$0xff]  ;;  %v649_v11 = vld [vmem:[%s2149_s2 + $0x78] sm:$0xff] }
  0x1f   : > { %472 = vadd.xlane.f32.xlu0 %v471_v14  ;;  %475 = vadd.xlane.f32.xlu1 %v474_v15  ;;  %v648_v14 = vld [vmem:[%s2149_s2 + $0x70] sm:$0xff] }
  0xa0   : > { %v455_v16 = vpop.xlane.xlu0 %454  ;;  %v461_v17 = vpop.xlane.xlu1 %460 }
  0xa1   : > { %v478_v18 = vmul.f32 0.015625, %v455_v16  ;;  %v480_v19 = vmul.f32 0.015625, %v461_v17  ;;  %v1607_v16 = vmov 0.0   ;;  %v968_v17 = vld [vmem:[%s2151_s4 + $0x80] sm:$0xff] }
  0xa2   : > { %751 = vmatprep.mubr.f32.mxu0 %v1607_v16  ;;  %618 = vst.msk [vmem:[#allocation3] sm:$0xff] %vm452_vm0, %v1607_v16  ;;  %619 = vst.msk [vmem:[#allocation3 + $0x8] sm:$0xff] %vm452_vm0, %v1607_v16 }
  0xa3   : > { %v1687_v20 = vsub.f32 %v440_v0, %v478_v18  ;;  %v1689_v21 = vsub.f32 %v442_v1, %v480_v19  ;;  %v1449_v0 = vpack.c.bf16 %v641_v63, %v639_v62  ;;  %v638_v1 = vld [vmem:[%s2149_s2 + $0x20] sm:$0xff]  ;;  %620 = vst.msk [vmem:[#allocation3 + $0x10] sm:$0xff] %vm452_vm0, %v1607_v16  ;;  %621 = vst.msk [vmem:[#allocation3 + $0x18] sm:$0xff] %vm452_vm0, %v1607_v16  ;;  %v969_v18 = vld [vmem:[%s2151_s4 + $0x88] sm:$0xff] }
  0xa4   : > { %v458_v22 = vpop.xlane.xlu0 %457  ;;  %v464_v23 = vpop.xlane.xlu1 %463  ;;  %622 = vst.msk [vmem:[#allocation3 + $0x20] sm:$0xff] %vm452_vm0, %v1607_v16  ;;  %623 = vst.msk [vmem:[#allocation3 + $0x28] sm:$0xff] %vm452_vm0, %v1607_v16  ;;  %v952_v19 = vld [vmem:[%s2151_s4] sm:$0xff] }
  0xa5   : > { %v479_v24 = vmul.f32 0.015625, %v458_v22  ;;  %v481_v25 = vmul.f32 0.015625, %v464_v23  ;;  %v494_v26 = vmul.f32 %v1687_v20, %v1687_v20  ;;  %v496_v27 = vmul.f32 %v1689_v21, %v1689_v21  ;;  %1450 = vmatprep.subr.bf16.mxu0 %v1449_v0  ;;  %624 = vst.msk [vmem:[#allocation3 + $0x30] sm:$0xff] %vm452_vm0, %v1607_v16  ;;  %625 = vst.msk [vmem:[#allocation3 + $0x38] sm:$0xff] %vm452_vm0, %v1607_v16  ;;  %v953_v23 = vld [vmem:[%s2151_s4 + $0x8] sm:$0xff] }
  0xa6   : > { %v1461_v22 = vpack.c.bf16 %v969_v18, %v968_v17  ;;  %v450_v0 = vld [vmem:[%s1811_s12 + $0x8] sm:$0x7] }
  0xa7   : > { %v1695_v28 = vsub.f32 %v441_v2, %v479_v24  ;;  %v1697_v29 = vsub.f32 %v443_v5, %v481_v25  ;;  %v502_v30 = vsel %vm452_vm0, %v494_v26, 0.0  ;;  %v508_v33 = vsel %vm452_vm0, %v496_v27, 0.0  ;;  %v640_v2 = vld [vmem:[%s2149_s2 + $0x30] sm:$0xff]  ;;  %v645_v5 = vld [vmem:[%s2149_s2 + $0x58] sm:$0xff] }
  0xa8   : > { %503 = vadd.xlane.f32.xlu0 %v502_v30  ;;  %v467_v31 = vpop.xlane.xlu0 %466  ;;  %v470_v32 = vpop.xlane.xlu1 %469  ;;  %v1451_v3 = vpack.c.bf16 %v640_v2, %v638_v1  ;;  %v1453_v6 = vpack.c.bf16 %v645_v5, %v643_v4  ;;  %v1804_v24 = vpack.c.bf16 %v953_v23, %v952_v19  ;;  %1493 = vmatprep.subr.bf16.mxu1 %v1461_v22  ;;  %v562_v27 = vlaneseq }
  0xa9   : > { %v482_v34 = vmul.f32 0.015625, %v467_v31  ;;  %v483_v35 = vmul.f32 0.015625, %v470_v32  ;;  %v495_v36 = vmul.f32 %v1695_v28, %v1695_v28  ;;  %v497_v37 = vmul.f32 %v1697_v29, %v1697_v29 }
  0xaa   : > { %1452 = vmatpush1.bf16.msra.mxu0 %v1451_v3  ;;  %1501 = vmatpush3.bf16.msra.mxu1 %v1804_v24 }
  0xab   : > { %v1705_v38 = vsub.f32 %v444_v8, %v482_v34  ;;  %v1707_v39 = vsub.f32 %v445_v9, %v483_v35  ;;  %v505_v40 = vsel %vm452_vm0, %v495_v36, 0.0  ;;  %v511_v43 = vsel %vm452_vm0, %v497_v37, 0.0  ;;  %v644_v8 = vld [vmem:[%s2149_s2 + $0x50] sm:$0xff]  ;;  %1454 = vmatprep.subr.bf16.mxu0 %v1453_v6  ;;  %v448_v36 = vld [vmem:[%s1811_s12] sm:$0x7] }
  0xac   : > { %509 = vadd.xlane.f32.xlu0 %v508_v33  ;;  %506 = vadd.xlane.f32.xlu1 %v505_v40  ;;  %v473_v41 = vpop.xlane.xlu0 %472  ;;  %v476_v42 = vpop.xlane.xlu1 %475  ;;  %v1455_v9 = vpack.c.bf16 %v644_v8, %v642_v7  ;;  %v1813_v35 = vshrl.u32 %v562_v27, 7  ;;  %v560_v6 = vadd.f32 1.0, %v450_v0 }
  0xad   : > { %v484_v44 = vmul.f32 0.015625, %v473_v41  ;;  %v485_v45 = vmul.f32 0.015625, %v476_v42  ;;  %v498_v46 = vmul.f32 %v1705_v38, %v1705_v38  ;;  %v499_v47 = vmul.f32 %v1707_v39, %v1707_v39 }
  0xae   : > { %1456 = vmatpush1.bf16.msra.mxu0 %v1455_v9 }
  0xaf   : > { %v1715_v48 = vsub.f32 %v446_v12, %v484_v44  ;;  %v1717_v49 = vsub.f32 %v447_v13, %v485_v45  ;;  %v514_v50 = vsel %vm452_vm0, %v498_v46, 0.0  ;;  %v517_v51 = vsel %vm452_vm0, %v499_v47, 0.0  ;;  %v646_v13 = vld [vmem:[%s2149_s2 + $0x60] sm:$0xff] }
  0xb0   : > { %512 = vadd.xlane.f32.xlu1 %v511_v43  ;;  %515 = vadd.xlane.f32.xlu0 %v514_v50  ;;  %v1457_v12 = vpack.c.bf16 %v649_v11, %v647_v10  ;;  %v1459_v15 = vpack.c.bf16 %v648_v14, %v646_v13  ;;  %v558_v45 = vadd.f32 1.0, %v448_v36  ;;  %v1817_v46 = vsub.s32 1, %v1813_v35  ;;  %v451_v11 = vld [vmem:[%s1811_s12 + $0xc] sm:$0x7] }
  0xb1   : > { %v500_v52 = vmul.f32 %v1715_v48, %v1715_v48  ;;  %v501_v53 = vmul.f32 %v1717_v49, %v1717_v49  ;;  %v561_v18 = vadd.f32 1.0, %v451_v11 }
  0xb2   : > { %1458 = vmatprep.subr.bf16.mxu0 %v1457_v12  ;;  %v565_v57 = vrot.slane %v558_v45, %v1817_v46  ;;  %v573_v17 = vrot.slane %v560_v6, %v1817_v46  ;;  %v959_v6 = vld [vmem:[%s2151_s4 + $0x38] sm:$0xff] }
  0xb3   : > { %v520_v54 = vsel %vm452_vm0, %v500_v52, 0.0  ;;  %v523_v55 = vsel %vm452_vm0, %v501_v53, 0.0  ;;  %1460 = vmatpush1.bf16.msra.mxu0 %v1459_v15  ;;  %v449_v52 = vld [vmem:[%s1811_s12 + $0x4] sm:$0x7] }
  0xb4   : > { %518 = vadd.xlane.f32.xlu1 %v517_v51  ;;  %521 = vadd.xlane.f32.xlu0 %v520_v54  ;;  %v1820_v51 = vsub.s32 0, %v1813_v35  ;;  %v559_v59 = vadd.f32 1.0, %v449_v52 }
  0xb5   : > { %1462 = vmatprep.subr.bf16.mxu0 %v1461_v22 }
  0xb6   : > { %v589_v62 = vrot.slane %v448_v36, %v1820_v51  ;;  %v569_v5 = vrot.slane %v559_v59, %v1817_v46  ;;  %v593_v12 = vrot.slane %v449_v52, %v1820_v51 }
  0xb8   : > { %524 = vadd.xlane.f32.xlu1 %v523_v55 }
 0x135   : > { %v504_v25 = vpop.xlane.xlu0 %503 }
 0x136   : > { %v526_v26 = vmul.f32 0.015625, %v504_v25 }
 0x138   : > { %v534_v30 = vadd.f32 1e-06, %v526_v26 }
 0x139   : > { %v507_v31 = vpop.xlane.xlu1 %506  ;;  %v510_v32 = vpop.xlane.xlu0 %509 }
 0x13a   : > { %1534 = vrsqrt.f32 %v534_v30  ;;  %v527_v33 = vmul.f32 0.015625, %v507_v31  ;;  %v528_v34 = vmul.f32 0.015625, %v510_v32  ;;  %v577_v31 = vrot.slane %v561_v18, %v1817_v46  ;;  %v963_v18 = vld [vmem:[%s2151_s4 + $0x58] sm:$0xff] }
 0x13c   : > { %v535_v37 = vadd.f32 1e-06, %v527_v33  ;;  %v536_v40 = vadd.f32 1e-06, %v528_v34 }
 0x13d   : > { %v513_v41 = vpop.xlane.xlu1 %512  ;;  %v516_v42 = vpop.xlane.xlu0 %515 }
 0x13e   : > { %1536 = vrsqrt.f32 %v535_v37  ;;  %v529_v43 = vmul.f32 0.015625, %v513_v41  ;;  %v530_v44 = vmul.f32 0.015625, %v516_v42 }
 0x13f   : > { %1538 = vrsqrt.f32 %v536_v40 }
 0x140   : > { %v537_v47 = vadd.f32 1e-06, %v529_v43  ;;  %v538_v50 = vadd.f32 1e-06, %v530_v44 }
 0x141   : > { %v519_v53 = vpop.xlane.xlu1 %518  ;;  %v522_v54 = vpop.xlane.xlu0 %521 }
 0x142   : > { %1540 = vrsqrt.f32 %v537_v47  ;;  %v531_v55 = vmul.f32 0.015625, %v519_v53  ;;  %v532_v56 = vmul.f32 0.015625, %v522_v54 }
 0x143   : > { %1542 = vrsqrt.f32 %v538_v50 }
 0x144   : > { %v1535_v58 = vpop.eup %1534  ;;  %v539_v60 = vadd.f32 1e-06, %v531_v55  ;;  %v540_v61 = vadd.f32 1e-06, %v532_v56  ;;  %v970_v55 = vld [vmem:[%s2151_s4 + $0x90] sm:$0xff]  ;;  %v971_v56 = vld [vmem:[%s2151_s4 + $0x98] sm:$0xff] }
 0x145   : > { %v550_v63 = vmul.f32 %v1535_v58, %v1687_v20  ;;  %v525_v1 = vpop.xlane.xlu1 %524  ;;  %v954_v58 = vld [vmem:[%s2151_s4 + $0x10] sm:$0xff] }
 0x146   : > { %1544 = vrsqrt.f32 %v539_v60  ;;  %v533_v2 = vmul.f32 0.015625, %v525_v1  ;;  %v972_v60 = vld [vmem:[%s2151_s4 + $0xa0] sm:$0xff] }
 0x147   : > { %v578_v3 = vmul.f32 %v565_v57, %v550_v63  ;;  %1546 = vrsqrt.f32 %v540_v61  ;;  %v973_v61 = vld [vmem:[%s2151_s4 + $0xa8] sm:$0xff]  ;;  %v956_v63 = vld [vmem:[%s2151_s4 + $0x20] sm:$0xff] }
 0x148   : > { %v1537_v4 = vpop.eup %1536  ;;  %v541_v7 = vadd.f32 1e-06, %v533_v2  ;;  %v974_v2 = vld [vmem:[%s2151_s4 + $0xb0] sm:$0xff] }
 0x149   : > { %v1539_v8 = vpop.eup %1538  ;;  %v602_v9 = vadd.f32 %v589_v62, %v578_v3  ;;  %v551_v10 = vmul.f32 %v1537_v4, %v1695_v28  ;;  %v597_v28 = vrot.slane %v450_v0, %v1820_v51  ;;  %v957_v0 = vld [vmem:[%s2151_s4 + $0x28] sm:$0xff]  ;;  %v975_v3 = vld [vmem:[%s2151_s4 + $0xb8] sm:$0xff] }
 0x14a   : > { %v552_v20 = vmul.f32 %v1539_v8, %v1689_v21  ;;  %1548 = vrsqrt.f32 %v541_v7  ;;  %v1471_v1 = vpack.c.bf16 %v957_v0, %v956_v63  ;;  %v1473_v4 = vpack.c.bf16 %v975_v3, %v974_v2  ;;  %v976_v8 = vld [vmem:[%s2151_s4 + $0xc0] sm:$0xff] }
 0x14b   : > { %610 = vst.msk [vmem:[#allocation2] sm:$0xff] %vm452_vm0, %v602_v9  ;;  %v579_v13 = vmul.f32 %v565_v57, %v551_v10  ;;  %v1465_v57 = vpack.c.bf16 %v971_v56, %v970_v55  ;;  %v977_v9 = vld [vmem:[%s2151_s4 + $0xc8] sm:$0xff] }
 0x14c   : > { %v1541_v14 = vpop.eup %1540  ;;  %v580_v15 = vmul.f32 %v569_v5, %v552_v20  ;;  %v1477_v10 = vpack.c.bf16 %v977_v9, %v976_v8 }
 0x14d   : > { %v1543_v19 = vpop.eup %1542  ;;  %v603_v22 = vadd.f32 %v589_v62, %v579_v13  ;;  %v553_v23 = vmul.f32 %v1541_v14, %v1697_v29  ;;  %v601_v29 = vrot.slane %v451_v11, %v1820_v51  ;;  %1494 = vmatprep.subr.bf16.mxu1 %v1465_v57  ;;  %v1469_v62 = vpack.c.bf16 %v973_v61, %v972_v60  ;;  %v960_v11 = vld [vmem:[%s2151_s4 + $0x40] sm:$0xff]  ;;  %v978_v13 = vld [vmem:[%s2151_s4 + $0xd0] sm:$0xff]  ;;  %v979_v14 = vld [vmem:[%s2151_s4 + $0xd8] sm:$0xff] }
 0x14e   : > { %v604_v25 = vadd.f32 %v593_v12, %v580_v15  ;;  %v554_v26 = vmul.f32 %v1543_v19, %v1705_v38  ;;  %v1481_v15 = vpack.c.bf16 %v979_v14, %v978_v13 }
 0x14f   : > { %611 = vst.msk [vmem:[#allocation2 + $0x8] sm:$0xff] %vm452_vm0, %v603_v22  ;;  %v581_v21 = vmul.f32 %v569_v5, %v553_v23  ;;  %v958_v5 = vld [vmem:[%s2151_s4 + $0x30] sm:$0xff]  ;;  %v980_v22 = vld [vmem:[%s2151_s4 + $0xe0] sm:$0xff]  ;;  %v981_v23 = vld [vmem:[%s2151_s4 + $0xe8] sm:$0xff] }
 0x150   : > { %v1545_v27 = vpop.eup %1544  ;;  %612 = vst.msk [vmem:[#allocation2 + $0x10] sm:$0xff] %vm452_vm0, %v604_v25  ;;  %v582_v30 = vmul.f32 %v573_v17, %v554_v26  ;;  %v1475_v7 = vpack.c.bf16 %v959_v6, %v958_v5  ;;  %v1485_v25 = vpack.c.bf16 %v981_v23, %v980_v22  ;;  %v965_v26 = vld [vmem:[%s2151_s4 + $0x68] sm:$0xff] }
 0x151   : > { %v1547_v32 = vpop.eup %1546  ;;  %v605_v33 = vadd.f32 %v593_v12, %v581_v21  ;;  %v555_v34 = vmul.f32 %v1545_v27, %v1707_v39  ;;  %v961_v12 = vld [vmem:[%s2151_s4 + $0x48] sm:$0xff]  ;;  %v982_v27 = vld [vmem:[%s2151_s4 + $0xf0] sm:$0xff] }
 0x152   : > { %v606_v36 = vadd.f32 %v597_v28, %v582_v30  ;;  %v556_v37 = vmul.f32 %v1547_v32, %v1715_v48  ;;  %v626_v40 = vld [vmem:[#allocation2] sm:$0xff]  ;;  %v1479_v20 = vpack.c.bf16 %v961_v12, %v960_v11  ;;  %v983_v30 = vld [vmem:[%s2151_s4 + $0xf8] sm:$0xff]  ;;  %v966_v32 = vld [vmem:[%s2151_s4 + $0x70] sm:$0xff] }
 0x153   : > { %613 = vst.msk [vmem:[#allocation2 + $0x18] sm:$0xff] %vm452_vm0, %v605_v33  ;;  %v583_v38 = vmul.f32 %v573_v17, %v555_v34  ;;  %1375 = vmatmul.mubr.msk.f32.vlgmr.msra.gmra.mrb[0].mxu0 %vm452_vm0, %v626_v40  ;;  %v962_v17 = vld [vmem:[%s2151_s4 + $0x50] sm:$0xff]  ;;  %v967_v33 = vld [vmem:[%s2151_s4 + $0x78] sm:$0xff] }
 0x154   : > { %v1549_v41 = vpop.eup %1548  ;;  %614 = vst.msk [vmem:[#allocation2 + $0x20] sm:$0xff] %vm452_vm0, %v606_v36  ;;  %v584_v42 = vmul.f32 %v577_v31, %v556_v37  ;;  %757 = vmatprep.mubr.f32.mxu0 %v1607_v16  ;;  %1464 = vmatpush3.bf16.msra.mxu0 %v1804_v24  ;;  %v1483_v19 = vpack.c.bf16 %v963_v18, %v962_v17  ;;  %v650_v36 = vld [vmem:[%s2150_s3] sm:$0x3] }
 0x155   : > { %v607_v39 = vadd.f32 %v597_v28, %v583_v38  ;;  %v557_v43 = vmul.f32 %v1549_v41, %v1717_v49  ;;  %1466 = vmatprep.subr.bf16.mxu0 %v1465_v57  ;;  %v964_v28 = vld [vmem:[%s2151_s4 + $0x60] sm:$0xff]  ;;  %v1491_v34 = vpack.c.bf16 %v967_v33, %v966_v32  ;;  %v1956_v37 = vrot.slane %v650_v36, %v1817_v46 }
 0x156   : > { %v608_v44 = vadd.f32 %v601_v29, %v584_v42  ;;  %v627_v45 = vld [vmem:[#allocation2 + $0x8] sm:$0xff]  ;;  %v1487_v21 = vpack.c.bf16 %v965_v26, %v964_v28 }
 0x157   : > { %615 = vst.msk [vmem:[#allocation2 + $0x28] sm:$0xff] %vm452_vm0, %v607_v39  ;;  %v585_v48 = vmul.f32 %v577_v31, %v557_v43  ;;  %1376 = vmatmul.mubr.msk.f32.gmra.mrb[2].mxu0 %vm452_vm0, %v627_v45  ;;  %v628_v50 = vld [vmem:[#allocation2 + $0x10] sm:$0xff]  ;;  %v1489_v31 = vpack.c.bf16 %v983_v30, %v982_v27 }
 0x158   : > { %616 = vst.msk [vmem:[#allocation2 + $0x30] sm:$0xff] %vm452_vm0, %v608_v44  ;;  %763 = vmatprep.mubr.f32.mxu0 %v1607_v16 }
 0x159   : > { %v609_v47 = vadd.f32 %v601_v29, %v585_v48  ;;  %v1953_v29 = vrot.slane %v650_v36, %v1820_v51 }
 0x15a   : > { %v629_v49 = vld [vmem:[#allocation2 + $0x18] sm:$0xff] }
 0x15b   : > { %617 = vst.msk [vmem:[#allocation2 + $0x38] sm:$0xff] %vm452_vm0, %v609_v47  ;;  %1377 = vmatmul.mubr.msk.f32.gmra.mrb[4].mxu0 %vm452_vm0, %v628_v50  ;;  %v630_v24 = vld [vmem:[#allocation2 + $0x20] sm:$0xff] }
 0x15c   : > { %769 = vmatprep.mubr.f32.mxu0 %v1607_v16 }
 0x15e   : > { %v631_v52 = vld [vmem:[#allocation2 + $0x28] sm:$0xff] }
 0x15f   : > { %1378 = vmatmul.mubr.msk.f32.gmra.mrb[6].mxu0 %vm452_vm0, %v629_v49  ;;  %v632_v53 = vld [vmem:[#allocation2 + $0x30] sm:$0xff] }
 0x160   : > { %775 = vmatprep.mubr.f32.mxu0 %v1607_v16 }
 0x162   : > { %v633_v54 = vld [vmem:[#allocation2 + $0x38] sm:$0xff] }
 0x163   : > { %1379 = vmatmul.mubr.msk.f32.gmra.mrb[8].mxu0 %vm452_vm0, %v630_v24 }
 0x164   : > { %781 = vmatprep.mubr.f32.mxu0 %v1607_v16 }
 0x167   : > { %1380 = vmatmul.mubr.msk.f32.gmra.mrb[10].mxu0 %vm452_vm0, %v631_v52 }
 0x168   : > { %787 = vmatprep.mubr.f32.mxu0 %v1607_v16 }
 0x16b   : > { %1381 = vmatmul.mubr.msk.f32.gmra.mrb[12].mxu0 %vm452_vm0, %v632_v53 }
 0x16c   : > { %793 = vmatprep.mubr.f32.mxu0 %v1607_v16  ;;  %v955_v16 = vld [vmem:[%s2151_s4 + $0x18] sm:$0xff] }
 0x16d   : > { %v1467_v59 = vpack.c.bf16 %v955_v16, %v954_v58 }
 0x16f   : > { %1382 = vmatmul.mubr.msk.f32.gmra.mrb[14].mxu0 %vm452_vm0, %v633_v54  ;;  %1502 = vmatpush3.bf16.msra.mxu1 %v1467_v59 }
 0x170   : > { %1468 = vmatpush3.bf16.msra.mxu0 %v1467_v59  ;;  %1495 = vmatprep.subr.bf16.mxu1 %v1469_v62 }
 0x171   : > { %1470 = vmatprep.subr.bf16.mxu0 %v1469_v62 }
 0x173   : > { %1503 = vmatpush3.bf16.msra.mxu1 %v1471_v1 }
 0x174   : > { %1472 = vmatpush3.bf16.msra.mxu0 %v1471_v1  ;;  %1496 = vmatprep.subr.bf16.mxu1 %v1473_v4 }
 0x175   : > { %1474 = vmatprep.subr.bf16.mxu0 %v1473_v4 }
 0x177   : > { %1504 = vmatpush3.bf16.msra.mxu1 %v1475_v7 }
 0x178   : > { %1476 = vmatpush3.bf16.msra.mxu0 %v1475_v7  ;;  %1497 = vmatprep.subr.bf16.mxu1 %v1477_v10 }
 0x179   : > { %1478 = vmatprep.subr.bf16.mxu0 %v1477_v10 }
 0x17b   : > { %1505 = vmatpush3.bf16.msra.mxu1 %v1479_v20 }
 0x17c   : > { %1480 = vmatpush3.bf16.msra.mxu0 %v1479_v20  ;;  %1498 = vmatprep.subr.bf16.mxu1 %v1481_v15 }
 0x17d   : > { %1482 = vmatprep.subr.bf16.mxu0 %v1481_v15 }
 0x17f   : > { %1506 = vmatpush3.bf16.msra.mxu1 %v1483_v19 }
 0x180   : > { %1484 = vmatpush3.bf16.msra.mxu0 %v1483_v19  ;;  %1499 = vmatprep.subr.bf16.mxu1 %v1485_v25 }
 0x181   : > { %1486 = vmatprep.subr.bf16.mxu0 %v1485_v25 }
 0x183   : > { %1507 = vmatpush3.bf16.msra.mxu1 %v1487_v21 }
 0x184   : > { %1488 = vmatpush3.bf16.msra.mxu0 %v1487_v21  ;;  %1500 = vmatprep.subr.bf16.mxu1 %v1489_v31 }
 0x185   : > { %1490 = vmatprep.subr.bf16.mxu0 %v1489_v31 }
 0x187   : > { %1508 = vmatpush3.bf16.msra.mxu1 %v1491_v34 }
 0x188   : > { %1492 = vmatpush3.bf16.msra.mxu0 %v1491_v34 }
 0x226   : > { %v753_v40 = vpop.f32.mrb[0].mxu0 }
 0x227   : > { %v754_v38 = vadd.f32 %v753_v40, %v1953_v29  ;;  %v755_v41 = vpop.f32.mrb[1].mxu0 }
 0x228   : > { %v756_v42 = vadd.f32 %v755_v41, %v1956_v37 }
 0x229   : > { %v816_v39 = vmul.f32 0.044715, %v754_v38  ;;  %v800_v26 = vmul.f32 0.5, %v754_v38 }
 0x22a   : > { %v817_v43 = vmul.f32 0.044715, %v756_v42  ;;  %v759_v44 = vpop.f32.mrb[2].mxu0  ;;  %v801_v33 = vmul.f32 0.5, %v756_v42 }
 0x22b   : > { %v832_v45 = vmul.f32 %v816_v39, %v754_v38  ;;  %v1961_v48 = vadd.f32 %v759_v44, %v1953_v29  ;;  %v761_v47 = vpop.f32.mrb[3].mxu0 }
 0x22c   : > { %v833_v50 = vmul.f32 %v817_v43, %v756_v42  ;;  %v1964_v51 = vadd.f32 %v761_v47, %v1956_v37 }
 0x22d   : > { %v848_v46 = vmul.f32 %v832_v45, %v754_v38  ;;  %v818_v49 = vmul.f32 0.044715, %v1961_v48 }
 0x22e   : > { %v819_v24 = vmul.f32 0.044715, %v1964_v51  ;;  %v765_v52 = vpop.f32.mrb[4].mxu0  ;;  %v849_v53 = vmul.f32 %v833_v50, %v756_v42  ;;  %v802_v50 = vmul.f32 0.5, %v1961_v48 }
 0x22f   : > { %v864_v54 = vadd.f32 %v848_v46, %v754_v38  ;;  %v834_v55 = vmul.f32 %v818_v49, %v1961_v48  ;;  %v1970_v56 = vadd.f32 %v765_v52, %v1953_v29  ;;  %v767_v57 = vpop.f32.mrb[5].mxu0 }
 0x230   : > { %v835_v58 = vmul.f32 %v819_v24, %v1964_v51  ;;  %v1974_v16 = vadd.f32 %v767_v57, %v1956_v37  ;;  %v865_v59 = vadd.f32 %v849_v53, %v756_v42 }
 0x231   : > { %v880_v60 = vmul.f32 0.7978846, %v864_v54  ;;  %v820_v61 = vmul.f32 0.044715, %v1970_v56  ;;  %v850_v62 = vmul.f32 %v834_v55, %v1961_v48 }
 0x232   : > { %v771_v63 = vpop.f32.mrb[6].mxu0  ;;  %v881_v0 = vmul.f32 0.7978846, %v865_v59  ;;  %v851_v1 = vmul.f32 %v835_v58, %v1964_v51  ;;  %v821_v2 = vmul.f32 0.044715, %v1974_v16 }
 0x233   : > { %1550 = vtanh.f32 %v880_v60  ;;  %v836_v3 = vmul.f32 %v820_v61, %v1970_v56  ;;  %v1982_v4 = vadd.f32 %v771_v63, %v1953_v29  ;;  %v773_v5 = vpop.f32.mrb[7].mxu0  ;;  %v866_v6 = vadd.f32 %v850_v62, %v1961_v48 }
 0x234   : > { %v1986_v7 = vadd.f32 %v773_v5, %v1956_v37  ;;  %1552 = vtanh.f32 %v881_v0  ;;  %v867_v8 = vadd.f32 %v851_v1, %v1964_v51  ;;  %v837_v9 = vmul.f32 %v821_v2, %v1974_v16 }
 0x235   : > { %v822_v10 = vmul.f32 0.044715, %v1982_v4  ;;  %v882_v11 = vmul.f32 0.7978846, %v866_v6  ;;  %v852_v12 = vmul.f32 %v836_v3, %v1970_v56  ;;  %v803_v61 = vmul.f32 0.5, %v1964_v51 }
 0x236   : > { %v823_v20 = vmul.f32 0.044715, %v1986_v7  ;;  %v777_v13 = vpop.f32.mrb[8].mxu0  ;;  %v883_v14 = vmul.f32 0.7978846, %v867_v8  ;;  %v853_v15 = vmul.f32 %v837_v9, %v1974_v16 }
 0x237   : > { %v838_v17 = vmul.f32 %v822_v10, %v1982_v4  ;;  %v1996_v18 = vadd.f32 %v777_v13, %v1953_v29  ;;  %v779_v19 = vpop.f32.mrb[9].mxu0  ;;  %1554 = vtanh.f32 %v882_v11  ;;  %v868_v22 = vadd.f32 %v852_v12, %v1970_v56 }
 0x238   : > { %v839_v23 = vmul.f32 %v823_v20, %v1986_v7  ;;  %v2001_v25 = vadd.f32 %v779_v19, %v1956_v37  ;;  %1556 = vtanh.f32 %v883_v14  ;;  %v869_v28 = vadd.f32 %v853_v15, %v1974_v16 }
 0x239   : > { %v824_v21 = vmul.f32 0.044715, %v1996_v18  ;;  %v884_v27 = vmul.f32 0.7978846, %v868_v22  ;;  %v854_v30 = vmul.f32 %v838_v17, %v1982_v4 }
 0x23a   : > { %v825_v31 = vmul.f32 0.044715, %v2001_v25  ;;  %v783_v32 = vpop.f32.mrb[10].mxu0  ;;  %v885_v34 = vmul.f32 0.7978846, %v869_v28  ;;  %v855_v36 = vmul.f32 %v839_v23, %v1986_v7 }
 0x23b   : > { %v840_v40 = vmul.f32 %v824_v21, %v1996_v18  ;;  %v2010_v41 = vadd.f32 %v783_v32, %v1953_v29  ;;  %v785_v39 = vpop.f32.mrb[11].mxu0  ;;  %1558 = vtanh.f32 %v884_v27  ;;  %v870_v38 = vadd.f32 %v854_v30, %v1982_v4 }
 0x23c   : > { %v841_v43 = vmul.f32 %v825_v31, %v2001_v25  ;;  %v2015_v44 = vadd.f32 %v785_v39, %v1956_v37  ;;  %1560 = vtanh.f32 %v885_v34  ;;  %v871_v42 = vadd.f32 %v855_v36, %v1986_v7 }
 0x23d   : > { %v1551_v45 = vpop.eup %1550  ;;  %v826_v47 = vmul.f32 0.044715, %v2010_v41  ;;  %v886_v46 = vmul.f32 0.7978846, %v870_v38  ;;  %v856_v49 = vmul.f32 %v840_v40, %v1996_v18  ;;  %v804_v34 = vmul.f32 0.5, %v1970_v56 }
 0x23e   : > { %v1553_v24 = vpop.eup %1552  ;;  %v827_v52 = vmul.f32 0.044715, %v2015_v44  ;;  %v789_v53 = vpop.f32.mrb[12].mxu0  ;;  %v912_v54 = vadd.f32 1.0, %v1551_v45  ;;  %v887_v55 = vmul.f32 0.7978846, %v871_v42  ;;  %v857_v57 = vmul.f32 %v841_v43, %v2001_v25 }
 0x23f   : > { %v2024_v58 = vadd.f32 %v789_v53, %v1953_v29  ;;  %v791_v59 = vpop.f32.mrb[13].mxu0  ;;  %v913_v60 = vadd.f32 1.0, %v1553_v24  ;;  %1562 = vtanh.f32 %v886_v46  ;;  %v842_v48 = vmul.f32 %v826_v47, %v2010_v41 }
 0x240   : > { %v843_v62 = vmul.f32 %v827_v52, %v2015_v44  ;;  %v2030_v63 = vadd.f32 %v791_v59, %v1956_v37  ;;  %1564 = vtanh.f32 %v887_v55  ;;  %v873_v3 = vadd.f32 %v857_v57, %v2001_v25 }
 0x241   : > { %v1555_v0 = vpop.eup %1554  ;;  %v828_v1 = vmul.f32 0.044715, %v2024_v58  ;;  %v929_v2 = vmul.f32 %v913_v60, %v801_v33  ;;  %v872_v5 = vadd.f32 %v856_v49, %v1996_v18  ;;  %v928_v9 = vmul.f32 %v912_v54, %v800_v26 }
 0x242   : > { %v1557_v6 = vpop.eup %1556  ;;  %v829_v51 = vmul.f32 0.044715, %v2030_v63  ;;  %v795_v8 = vpop.f32.mrb[14].mxu0  ;;  %v914_v10 = vadd.f32 1.0, %v1555_v0  ;;  %v859_v11 = vmul.f32 %v843_v62, %v2015_v44  ;;  %v889_v15 = vmul.f32 0.7978846, %v873_v3 }
 0x243   : > { %v844_v12 = vmul.f32 %v828_v1, %v2024_v58  ;;  %v2039_v20 = vadd.f32 %v795_v8, %v1953_v29  ;;  %v797_v13 = vpop.f32.mrb[15].mxu0  ;;  %1048 = vmatprep.mubr.f32.mxu0 %v929_v2  ;;  %v915_v14 = vadd.f32 1.0, %v1557_v6  ;;  %v888_v23 = vmul.f32 0.7978846, %v872_v5 }
 0x244   : > { %v845_v17 = vmul.f32 %v829_v51, %v2030_v63  ;;  %v2043_v19 = vadd.f32 %v797_v13, %v1956_v37  ;;  %1049 = vmatmul.mubr.f32.vlgmr.msra.gmra.mrb[16].mxu0 %v928_v9  ;;  %v930_v22 = vmul.f32 %v914_v10, %v802_v50  ;;  %1566 = vtanh.f32 %v889_v15 }
 0x245   : > { %v1559_v28 = vpop.eup %1558  ;;  %v830_v26 = vmul.f32 0.044715, %v2039_v20  ;;  %v931_v21 = vmul.f32 %v915_v14, %v803_v61  ;;  %v875_v29 = vadd.f32 %v859_v11, %v2015_v44  ;;  %1568 = vtanh.f32 %v888_v23 }
 0x246   : > { %v1561_v27 = vpop.eup %1560  ;;  %v831_v30 = vmul.f32 0.044715, %v2043_v19  ;;  %v916_v31 = vadd.f32 1.0, %v1559_v28  ;;  %v858_v32 = vmul.f32 %v842_v48, %v2010_v41  ;;  %v805_v37 = vmul.f32 0.5, %v1974_v16 }
 0x247   : > { %1053 = vmatprep.mubr.f32.mxu0 %v931_v21  ;;  %v917_v33 = vadd.f32 1.0, %v1561_v27  ;;  %v891_v36 = vmul.f32 0.7978846, %v875_v29  ;;  %v846_v40 = vmul.f32 %v830_v26, %v2039_v20  ;;  %v861_v43 = vmul.f32 %v845_v17, %v2030_v63 }
 0x248   : > { %v847_v39 = vmul.f32 %v831_v30, %v2043_v19  ;;  %1054 = vmatmul.mubr.f32.gmra.mrb[18].mxu0 %v930_v22  ;;  %v874_v38 = vadd.f32 %v858_v32, %v2010_v41  ;;  %v860_v47 = vmul.f32 %v844_v12, %v2024_v58  ;;  %v932_v16 = vmul.f32 %v916_v31, %v804_v34 }
 0x249   : > { %v1563_v42 = vpop.eup %1562  ;;  %v933_v45 = vmul.f32 %v917_v33, %v805_v37  ;;  %1570 = vtanh.f32 %v891_v36  ;;  %v877_v56 = vadd.f32 %v861_v43, %v2030_v63  ;;  %v807_v24 = vmul.f32 0.5, %v1986_v7  ;;  %v944_v36 = vld [vmem:[#allocation3] sm:$0xff]  ;;  %v945_v43 = vld [vmem:[#allocation3 + $0x8] sm:$0xff] }
 0x24a   : > { %v1565_v50 = vpop.eup %1564  ;;  %v918_v46 = vadd.f32 1.0, %v1563_v42  ;;  %v890_v49 = vmul.f32 0.7978846, %v874_v38  ;;  %v876_v53 = vadd.f32 %v860_v47, %v2024_v58  ;;  %v863_v54 = vmul.f32 %v847_v39, %v2043_v19 }
 0x24b   : > { %1058 = vmatprep.mubr.f32.mxu1 %v933_v45  ;;  %v919_v52 = vadd.f32 1.0, %v1565_v50  ;;  %v806_v55 = vmul.f32 0.5, %v1982_v4  ;;  %v893_v57 = vmul.f32 0.7978846, %v877_v56  ;;  %v862_v59 = vmul.f32 %v846_v40, %v2039_v20  ;;  %v1116_v50 = vld [vmem:[%s1811_s12] sm:$0x7] }
 0x24c   : > { %1059 = vmatmul.mubr.f32.vlgmr.msra.gmra.mrb[0].mxu1 %v932_v16  ;;  %1572 = vtanh.f32 %v890_v49  ;;  %v892_v61 = vmul.f32 0.7978846, %v876_v53  ;;  %v879_v48 = vadd.f32 %v863_v54, %v2043_v19  ;;  %v809_v4 = vmul.f32 0.5, %v2001_v25  ;;  %v946_v16 = vld [vmem:[#allocation3 + $0x10] sm:$0xff]  ;;  %v2081_v56 = vld [vmem:[%s2152_s5] ss:$0 sm:$0xff] }
 0x24d   : > { %v935_v60 = vmul.f32 %v919_v52, %v807_v24  ;;  %v934_v62 = vmul.f32 %v918_v46, %v806_v55  ;;  %1574 = vtanh.f32 %v893_v57  ;;  %v878_v7 = vadd.f32 %v862_v59, %v2039_v20  ;;  %v947_v54 = vld [vmem:[#allocation3 + $0x18] sm:$0xff] }
 0x24e   : > { %v1567_v0 = vpop.eup %1566  ;;  %1576 = vtanh.f32 %v892_v61  ;;  %v895_v1 = vmul.f32 0.7978846, %v879_v48  ;;  %v808_v6 = vmul.f32 0.5, %v1996_v18  ;;  %v811_v11 = vmul.f32 0.5, %v2015_v44  ;;  %v1110_v61 = vld [vmem:[%s1669_s28 + $0x10] sm:$0xff] }
 0x24f   : > { %1063 = vmatprep.mubr.f32.mxu1 %v935_v60  ;;  %v1569_v2 = vpop.eup %1568  ;;  %v921_v3 = vadd.f32 1.0, %v1567_v0  ;;  %v894_v5 = vmul.f32 0.7978846, %v878_v7  ;;  %v810_v15 = vmul.f32 0.5, %v2010_v41  ;;  %v813_v23 = vmul.f32 0.5, %v2030_v63  ;;  %v1109_v60 = vld [vmem:[%s1669_s28 + $0x8] sm:$0xff] }
 0x250   : > { %1064 = vmatmul.mubr.f32.gmra.mrb[2].mxu1 %v934_v62  ;;  %v920_v51 = vadd.f32 1.0, %v1569_v2  ;;  %1578 = vtanh.f32 %v895_v1  ;;  %v812_v44 = vmul.f32 0.5, %v2024_v58  ;;  %v815_v30 = vmul.f32 0.5, %v2043_v19  ;;  %v1117_v48 = vld [vmem:[%s1811_s12 + $0x4] sm:$0x7]  ;;  %v1111_v0 = vld [vmem:[%s1669_s28 + $0x18] sm:$0xff] }
 0x251   : > { %v937_v8 = vmul.f32 %v921_v3, %v809_v4  ;;  %1580 = vtanh.f32 %v894_v5  ;;  %v814_v33 = vmul.f32 0.5, %v2039_v20  ;;  %v2074_v45 = vsub.s32 2, %v1813_v35  ;;  %v1112_v1 = vld [vmem:[%s1669_s28 + $0x20] sm:$0xff]  ;;  %v1113_v2 = vld [vmem:[%s1669_s28 + $0x28] sm:$0xff]  ;;  %v1114_v5 = vld [vmem:[%s1669_s28 + $0x30] sm:$0xff] }
 0x252   : > { %v936_v10 = vmul.f32 %v920_v51, %v808_v6  ;;  %v2101_v6 = vld [vmem:[%s1669_s28 + $0x38] sm:$0xff]  ;;  %v1582_v51 = vld [vmem:[%s1669_s28] sm:$0xff] }
 0x253   : > { %v1571_v9 = vpop.eup %1570  ;;  %1068 = vmatprep.mubr.f32.mxu1 %v937_v8  ;;  %v1146_v35 = vrot.slane %v1116_v50, %v2074_v45 }
 0x254   : > { %v923_v12 = vadd.f32 1.0, %v1571_v9  ;;  %1069 = vmatmul.mubr.f32.gmra.mrb[4].mxu1 %v936_v10  ;;  %v948_v10 = vld [vmem:[#allocation3 + $0x20] sm:$0xff] }
 0x256   : > { %v1573_v13 = vpop.eup %1572  ;;  %v939_v14 = vmul.f32 %v923_v12, %v811_v11 }
 0x257   : > { %v922_v25 = vadd.f32 1.0, %v1573_v13  ;;  %v1575_v17 = vpop.eup %1574 }
 0x258   : > { %1073 = vmatprep.mubr.f32.mxu1 %v939_v14  ;;  %v1577_v22 = vpop.eup %1576  ;;  %v925_v28 = vadd.f32 1.0, %v1575_v17  ;;  %v1150_v14 = vrot.slane %v1117_v48, %v2074_v45 }
 0x259   : > { %v938_v18 = vmul.f32 %v922_v25, %v810_v15  ;;  %v924_v26 = vadd.f32 1.0, %v1577_v22 }
 0x25a   : > { %v1579_v21 = vpop.eup %1578  ;;  %v941_v29 = vmul.f32 %v925_v28, %v813_v23  ;;  %v949_v28 = vld [vmem:[#allocation3 + $0x28] sm:$0xff] }
 0x25b   : > { %1074 = vmatmul.mubr.f32.gmra.mrb[6].mxu1 %v938_v18  ;;  %v1581_v27 = vpop.eup %1580  ;;  %v927_v31 = vadd.f32 1.0, %v1579_v21  ;;  %v940_v41 = vmul.f32 %v924_v26, %v812_v44 }
 0x25c   : > { %1078 = vmatprep.mubr.f32.mxu1 %v941_v29  ;;  %v926_v32 = vadd.f32 1.0, %v1581_v27 }
 0x25d   : > { %v943_v37 = vmul.f32 %v927_v31, %v815_v30  ;;  %v1118_v30 = vld [vmem:[%s1811_s12 + $0x8] sm:$0x7] }
 0x25e   : > { %v942_v63 = vmul.f32 %v926_v32, %v814_v33 }
 0x25f   : > { %1079 = vmatmul.mubr.f32.gmra.mrb[8].mxu1 %v940_v41 }
 0x260   : > { %1083 = vmatprep.mubr.f32.mxu1 %v943_v37  ;;  %v950_v37 = vld [vmem:[#allocation3 + $0x30] sm:$0xff] }
 0x263   : > { %1084 = vmatmul.mubr.f32.gmra.mrb[10].mxu1 %v942_v63  ;;  %v1154_v63 = vrot.slane %v1118_v30, %v2074_v45 }
 0x317   : > { %v1421_v34 = vpop.f32.mrb[16].mxu0 }
 0x318   : > { %v1422_v40 = vpop.f32.mrb[17].mxu0 }
 0x319   : > { %v1423_v39 = vadd.f32 %v1422_v40, %v1421_v34 }
 0x31b   : > { %v1089_v58 = vadd.f32 %v1423_v39, %v944_v36  ;;  %v1424_v38 = vpop.f32.mrb[18].mxu0 }
 0x31c   : > { %v1425_v19 = vpop.f32.mrb[19].mxu0 }
 0x31d   : > { %1097 = vst.msk [vmem:[#allocation3] sm:$0xff] %vm452_vm0, %v1089_v58  ;;  %v1426_v42 = vadd.f32 %v1425_v19, %v1424_v38 }
 0x31f   : > { %v1090_v47 = vadd.f32 %v1426_v42, %v945_v43  ;;  %v1427_v20 = vpop.f32.mrb[0].mxu1  ;;  %v951_v43 = vld [vmem:[#allocation3 + $0x38] sm:$0xff] }
 0x320   : > { %v1428_v46 = vpop.f32.mrb[1].mxu1 }
 0x321   : > { %1098 = vst.msk [vmem:[#allocation3 + $0x8] sm:$0xff] %vm452_vm0, %v1090_v47  ;;  %v1429_v49 = vadd.f32 %v1428_v46, %v1427_v20  ;;  %v1119_v46 = vld [vmem:[%s1811_s12 + $0xc] sm:$0x7] }
 0x323   : > { %v1091_v24 = vadd.f32 %v1429_v49, %v946_v16  ;;  %v1430_v52 = vpop.f32.mrb[2].mxu1 }
 0x324   : > { %v1120_v53 = vld [vmem:[#allocation3] sm:$0xff]  ;;  %v1431_v55 = vpop.f32.mrb[3].mxu1 }
 0x325   : > { %v1135_v57 = vadd.f32 %v2081_v56, %v1120_v53  ;;  %1099 = vst.msk [vmem:[#allocation3 + $0x10] sm:$0xff] %vm452_vm0, %v1091_v24  ;;  %v1432_v59 = vadd.f32 %v1431_v55, %v1430_v52  ;;  %v1158_v24 = vrot.slane %v1119_v46, %v2074_v45 }
 0x327   : > { %v1159_v62 = vmul.f32 %v1146_v35, %v1135_v57  ;;  %v1092_v7 = vadd.f32 %v1432_v59, %v947_v54  ;;  %v1433_v3 = vpop.f32.mrb[4].mxu1 }
 0x328   : > { %v1121_v4 = vld [vmem:[#allocation3 + $0x8] sm:$0xff]  ;;  %v1434_v11 = vpop.f32.mrb[5].mxu1 }
 0x329   : > { %v1167_v8 = vadd.f32 %v1582_v51, %v1159_v62  ;;  %v1136_v9 = vadd.f32 %v2081_v56, %v1121_v4  ;;  %1100 = vst.msk [vmem:[#allocation3 + $0x18] sm:$0xff] %vm452_vm0, %v1092_v7  ;;  %v1435_v12 = vadd.f32 %v1434_v11, %v1433_v3 }
 0x32b   : > { %v1160_v13 = vmul.f32 %v1146_v35, %v1136_v9  ;;  %1175 = vst.msk [vmem:[%s2097_s30] sm:$0xff] %vm452_vm0, %v1167_v8  ;;  %v1093_v25 = vadd.f32 %v1435_v12, %v948_v10 }
 0x32c   : > { %v1122_v15 = vld [vmem:[#allocation3 + $0x10] sm:$0xff] }
 0x32d   : > { %v1168_v17 = vadd.f32 %v1160_v13, %v1109_v60  ;;  %v1137_v22 = vadd.f32 %v2081_v56, %v1122_v15  ;;  %1101 = vst.msk [vmem:[#allocation3 + $0x20] sm:$0xff] %vm452_vm0, %v1093_v25 }
 0x32e   : > { %v1436_v18 = vpop.f32.mrb[6].mxu1 }
 0x32f   : > { %v1161_v23 = vmul.f32 %v1150_v14, %v1137_v22  ;;  %v1437_v26 = vpop.f32.mrb[7].mxu1  ;;  %1176 = vst.msk [vmem:[%s2097_s30 + $0x8] sm:$0xff] %vm452_vm0, %v1168_v17 }
 0x330   : > { %v1123_v21 = vld [vmem:[#allocation3 + $0x18] sm:$0xff]  ;;  %v1438_v29 = vadd.f32 %v1437_v26, %v1436_v18 }
 0x331   : > { %v1169_v44 = vadd.f32 %v1161_v23, %v1110_v61  ;;  %v1138_v27 = vadd.f32 %v2081_v56, %v1123_v21 }
 0x332   : > { %v1094_v31 = vadd.f32 %v1438_v29, %v949_v28  ;;  %v1439_v41 = vpop.f32.mrb[8].mxu1 }
 0x333   : > { %v1162_v32 = vmul.f32 %v1150_v14, %v1138_v27  ;;  %v1440_v33 = vpop.f32.mrb[9].mxu1  ;;  %1177 = vst.msk [vmem:[%s2097_s30 + $0x10] sm:$0xff] %vm452_vm0, %v1169_v44 }
 0x334   : > { %1102 = vst.msk [vmem:[#allocation3 + $0x28] sm:$0xff] %vm452_vm0, %v1094_v31  ;;  %v1441_v34 = vadd.f32 %v1440_v33, %v1439_v41  ;;  %v1124_v40 = vld [vmem:[#allocation3 + $0x20] sm:$0xff] }
 0x335   : > { %v1170_v36 = vadd.f32 %v1162_v32, %v1111_v0  ;;  %v1139_v39 = vadd.f32 %v2081_v56, %v1124_v40 }
 0x336   : > { %v1095_v58 = vadd.f32 %v1441_v34, %v950_v37  ;;  %v1442_v38 = vpop.f32.mrb[10].mxu1 }
 0x337   : > { %v1443_v19 = vpop.f32.mrb[11].mxu1  ;;  %1178 = vst.msk [vmem:[%s2097_s30 + $0x18] sm:$0xff] %vm452_vm0, %v1170_v36  ;;  %v1163_v42 = vmul.f32 %v1154_v63, %v1139_v39 }
 0x338   : > { %1103 = vst.msk [vmem:[#allocation3 + $0x30] sm:$0xff] %vm452_vm0, %v1095_v58  ;;  %v1444_v47 = vadd.f32 %v1443_v19, %v1442_v38 }
 0x339   : > { %v1171_v20 = vadd.f32 %v1163_v42, %v1112_v1 }
 0x33a   : > { %v1096_v50 = vadd.f32 %v1444_v47, %v951_v43 }
 0x33b   : > { %v1125_v16 = vld [vmem:[#allocation3 + $0x28] sm:$0xff]  ;;  %1179 = vst.msk [vmem:[%s2097_s30 + $0x20] sm:$0xff] %vm452_vm0, %v1171_v20 }
 0x33c   : > { %v1140_v49 = vadd.f32 %v2081_v56, %v1125_v16  ;;  %1104 = vst.msk [vmem:[#allocation3 + $0x38] sm:$0xff] %vm452_vm0, %v1096_v50 }
 0x33e   : > { %v1164_v35 = vmul.f32 %v1154_v63, %v1140_v49 }
 0x33f   : > { %v1126_v52 = vld [vmem:[#allocation3 + $0x30] sm:$0xff] }
 0x340   : > { %v1172_v53 = vadd.f32 %v1164_v35, %v1113_v2  ;;  %v1141_v54 = vadd.f32 %v2081_v56, %v1126_v52 }
 0x342   : > { %v1165_v55 = vmul.f32 %v1158_v24, %v1141_v54  ;;  %1180 = vst.msk [vmem:[%s2097_s30 + $0x28] sm:$0xff] %vm452_vm0, %v1172_v53 }
 0x343   : > { %v1127_v57 = vld [vmem:[#allocation3 + $0x38] sm:$0xff] }
 0x344   : > { %v1173_v59 = vadd.f32 %v1165_v55, %v1114_v5  ;;  %v1142_v60 = vadd.f32 %v2081_v56, %v1127_v57 }
 0x346   : > { %v1166_v61 = vmul.f32 %v1158_v24, %v1142_v60  ;;  %1181 = vst.msk [vmem:[%s2097_s30 + $0x30] sm:$0xff] %vm452_vm0, %v1173_v59 }
 0x348   : > { %v1174_v48 = vadd.f32 %v1166_v61, %v2101_v6 }
 0x34a   : > { %1182 = vst.msk [vmem:[%s2097_s30 + $0x38] sm:$0xff] %vm452_vm0, %v1174_v48 }
 0x34b PF: > { %s16_s23 = sadd.s32 1, %s1605_s23   ;;  %s2154_s21 = smov %s1601_s22 }
 0x34c   : > { %p13_p5 = scmp.ge.s32.totalorder %s16_s23, 4   ;;  %s2155_s22 = smov %s2157_s24 }
 0x34e   :  { %15 = sbr.rel (!%p13_p5) target bundleno = 2 (0x2), region = 94 }

// kernel: stdit3_block_forward.4
= control target key start
LH: loop header
LB: loop body
LE: loop exit
PB: predicated region body
PF: predicated region fallthrough
CT: control target
= control target key end

     0   :  { %s6505_s24 = smov 0   ;;  %s6507_s25 = smov 0   ;;  %s8064_s0 = inlined_call_operand.vmem [shape: f32[2,4,16,64], index: 0, kind: input, shape index: {}]   ;;  %s8065_s1 = inlined_call_operand.vmem [shape: f32[2,4,16,64], index: 1, kind: input, shape index: {}]   ;;  %s8066_s2 = inlined_call_operand.vmem [shape: f32[2,4,16,64], index: 2, kind: input, shape index: {}]   ;;  %s8067_s3 = inlined_call_operand.vmem [shape: f32[2,4,16,64], index: 3, kind: input, shape index: {}, may-alias: {3,7}]   ;;  %s8068_s4 = inlined_call_operand.vmem [shape: f32[2,4,3,64], index: 4, kind: input, shape index: {}]   ;;  %s8069_s5 = inlined_call_operand.vmem [shape: f32[64,64], index: 5, kind: input, shape index: {}]   ;;  %s8070_s6 = inlined_call_operand.vmem [shape: f32[1,64], index: 6, kind: input, shape index: {}]   ;;  %s8071_s7 = inlined_call_operand.vmem [shape: f32[2,4,16,64], index: 7, kind: output, shape index: {}, may-alias: {3,7}]  }
   0x1   :  { %s6509_s26 = smov 0  }
   0x2 LB: > { %s43_s27 = sadd.s32 1, %s6450_s25  ;;  %p5387_p0 = scmp.ge.s32.totalorder %s6454_s26, 1  ;;  %s6454_s26 = sphi %s6509_s26, %s17_s26   ;;  %s6450_s25 = sphi %s6507_s25, %s8227_s25   ;;  %s6446_s24 = sphi %s6505_s24, %s8226_s24  }
   0x3   : > { %p45_p1 = scmp.ge.s32.totalorder %s43_s27, 2  ;;  %p374_p2 = scmp.lt.s32.totalorder %s6454_s26, 3 }
   0x5   : > { %s8229_s27 = smov (%p45_p1, %s43_s27), 0  ;;  %p375_p3 = pnand %p5387_p0, %p374_p2 }
   0x7   : > { %378 = sbr.rel (%p375_p3) target bundleno = 1558 (0x616), region = 48 }
   0xe   : > { %p477_p4 = scmp.lt.s32.totalorder %s6446_s24, 1  ;;  %vm658_vm0 = vcmask 130048   ;;  %s6456_s12 = smov 112   ;;  %vm593_vm2 = vcmask 7168   ;;  %vm4960_vm3 = vcmask 261120   ;;  %vm4969_vm4 = vcmask 392192  }
   0xf   : > { %vm6543_vm1 = vmpackc.low %vm658_vm0, %vm658_vm0  ;;  %s6457_s13 = smov 96   ;;  %s6458_s14 = smov 80   ;;  %vm4993_vm5 = vcmask 523264  }
  0x10   : > { %s8231_s24 = smov (!%p477_p4, %s6446_s24), 1  ;;  %s6462_s18 = smov 16  }
  0x11   : > { %s6526_s28 = sshll.u32 %s8231_s24, 6  ;;  %s5511_s19 = sshll.u32 %s8231_s24, 4 }
  0x12   : > { %s504_s8 = scalar_lea.vmem %s8065_s1, %s6526_s28  ;;  %s6536_s11 = scalar_lea.vmem %s8064_s0, %s6526_s28 }
  0x13   : > { %v577_v0 = vld [vmem:[%s504_s8 + $0x20] sm:$0xff]  ;;  %v578_v1 = vld [vmem:[%s504_s8 + $0x28] sm:$0xff]  ;;  %v575_v5 = vld [vmem:[%s504_s8 + $0x10] sm:$0xff]  ;;  %s520_s17 = scalar_lea.vmem %s8066_s2, %s6526_s28  ;;  %s8020_s22 = scalar_lea.vmem %s8068_s4, %s5511_s19 }
  0x14   : > { %v573_v2 = vld [vmem:[%s504_s8] sm:$0xff]  ;;  %v6538_v3 = vpack.i.bf16 %v578_v1, %v577_v0  ;;  %v574_v4 = vld [vmem:[%s504_s8 + $0x8] sm:$0xff]  ;;  %v576_v6 = vld [vmem:[%s504_s8 + $0x18] sm:$0xff]  ;;  %v5921_v17 = vpack.c.bf16 %v578_v1, %v577_v0  ;;  %s536_s9 = scalar_lea.vmem %s8067_s3, %s6526_s28 }
  0x15   : > { %v6118_v7 = vpack.i.bf16 %v574_v4, %v573_v2  ;;  %v565_v8 = vld [vmem:[%s6536_s11] sm:$0xff]  ;;  %v5909_v10 = vpack.c.bf16 %v574_v4, %v573_v2  ;;  %v6123_v11 = vpack.i.bf16 %v576_v6, %v575_v5  ;;  %v579_v12 = vld [vmem:[%s504_s8 + $0x30] sm:$0xff]  ;;  %v580_v13 = vld [vmem:[%s504_s8 + $0x38] sm:$0xff]  ;;  %v5915_v14 = vpack.c.bf16 %v576_v6, %v575_v5 }
  0x16   : > { %6129 = vrot.lane.b32.xlu1 %v6538_v3, %s6456_s12  ;;  %5661 = vmatprep.mubr.msk.f32.mxu1 %vm658_vm0, %v565_v8  ;;  %v6133_v15 = vpack.i.bf16 %v580_v13, %v579_v12  ;;  %v566_v16 = vld [vmem:[%s6536_s11 + $0x8] sm:$0xff]  ;;  %v568_v18 = vld [vmem:[%s6536_s11 + $0x18] sm:$0xff]  ;;  %v567_v19 = vld [vmem:[%s6536_s11 + $0x10] sm:$0xff]  ;;  %v5927_v21 = vpack.c.bf16 %v580_v13, %v579_v12 }
  0x17   : > { %6119 = vrot.lane.b32.xlu0 %v6118_v7, %s6456_s12  ;;  %5911 = vmatprep.subr.msk.bf16.mxu1 %vm6543_vm1, %v5909_v10  ;;  %v569_v20 = vld [vmem:[%s6536_s11 + $0x20] sm:$0xff]  ;;  %v570_v22 = vld [vmem:[%s6536_s11 + $0x28] sm:$0xff]  ;;  %v572_v23 = vld [vmem:[%s6536_s11 + $0x38] sm:$0xff] }
  0x18   : > { %5914 = vmatpush3.bf16.xpose.msk.msra.mxu1 %vm6543_vm1, %v5909_v10  ;;  %v571_v24 = vld [vmem:[%s6536_s11 + $0x30] sm:$0xff]  ;;  %v6619_v25 = vld [vmem:[%s520_s17 + $0x20] sm:$0xff]  ;;  %v6621_v26 = vld [vmem:[%s520_s17 + $0x28] sm:$0xff]  ;;  %s8035_s11 = scalar_lea.vmem %s8071_s7, %s6526_s28 }
  0x19   : > { %5917 = vmatprep.subr.msk.bf16.mxu1 %vm6543_vm1, %v5915_v14  ;;  %v6623_v27 = vld [vmem:[%s520_s17] sm:$0xff]  ;;  %v6625_v28 = vld [vmem:[%s520_s17 + $0x8] sm:$0xff]  ;;  %v6188_v29 = vpack.i.bf16 %v6621_v26, %v6619_v25  ;;  %v6633_v31 = vld [vmem:[%s520_s17 + $0x10] sm:$0xff] }
  0x1a   : > { %699 = vrot.lane.b32.xlu1 %v565_v8, %s6456_s12  ;;  %v6178_v30 = vpack.i.bf16 %v6625_v28, %v6623_v27  ;;  %v6635_v32 = vld [vmem:[%s520_s17 + $0x18] sm:$0xff]  ;;  %v6641_v34 = vld [vmem:[%s520_s17 + $0x30] sm:$0xff] }
  0x1b   : > { %6124 = vrot.lane.b32.xlu0 %v6123_v11, %s6456_s12  ;;  %v6183_v33 = vpack.i.bf16 %v6635_v32, %v6633_v31  ;;  %v6643_v35 = vld [vmem:[%s520_s17 + $0x38] sm:$0xff] }
  0x1c   : > { %v6193_v36 = vpack.i.bf16 %v6643_v35, %v6641_v34 }
  0x1e   : > { %6134 = vrot.lane.b32.xlu1 %v6133_v15, %s6456_s12 }
  0x1f   : > { %701 = vrot.lane.b32.xlu0 %v566_v16, %s6456_s12  ;;  %5662 = vmatmul.mubr.msk.f32.vlgmr.msra.gmra.mrb[0].mxu1 %vm658_vm0, %v566_v16 }
  0x20   : > { %5920 = vmatpush3.bf16.xpose.msk.msra.mxu1 %vm6543_vm1, %v5915_v14  ;;  %5668 = vmatprep.mubr.msk.f32.mxu1 %vm658_vm0, %v567_v19 }
  0x21   : > { %5923 = vmatprep.subr.msk.bf16.mxu1 %vm6543_vm1, %v5921_v17 }
  0x22   : > { %705 = vrot.lane.b32.xlu1 %v568_v18, %s6456_s12 }
  0x23   : > { %703 = vrot.lane.b32.xlu0 %v567_v19, %s6456_s12 }
  0x26   : > { %707 = vrot.lane.b32.xlu1 %v569_v20, %s6456_s12 }
  0x27   : > { %6139 = vrot.lane.b32.xlu0 %v6118_v7, %s6457_s13  ;;  %5669 = vmatmul.mubr.msk.f32.vlgmr.msra.gmra.mrb[2].mxu1 %vm658_vm0, %v568_v18 }
  0x28   : > { %5926 = vmatpush3.bf16.xpose.msk.msra.mxu1 %vm6543_vm1, %v5921_v17  ;;  %5675 = vmatprep.mubr.msk.f32.mxu1 %vm658_vm0, %v569_v20 }
  0x29   : > { %5929 = vmatprep.subr.msk.bf16.mxu1 %vm6543_vm1, %v5927_v21 }
  0x2a   : > { %6144 = vrot.lane.b32.xlu1 %v6123_v11, %s6457_s13 }
  0x2b   : > { %709 = vrot.lane.b32.xlu0 %v570_v22, %s6456_s12 }
  0x2e   : > { %713 = vrot.lane.b32.xlu1 %v572_v23, %s6456_s12 }
  0x2f   : > { %711 = vrot.lane.b32.xlu0 %v571_v24, %s6456_s12  ;;  %5676 = vmatmul.mubr.msk.f32.vlgmr.msra.gmra.mrb[4].mxu1 %vm658_vm0, %v570_v22 }
  0x30   : > { %5932 = vmatpush3.bf16.xpose.msk.msra.mxu1 %vm6543_vm1, %v5927_v21  ;;  %5682 = vmatprep.mubr.msk.f32.mxu1 %vm658_vm0, %v571_v24 }
  0x32   : > { %715 = vrot.lane.b32.xlu1 %v565_v8, %s6457_s13 }
  0x33   : > { %6149 = vrot.lane.b32.xlu0 %v6538_v3, %s6457_s13 }
  0x36   : > { %6154 = vrot.lane.b32.xlu1 %v6133_v15, %s6457_s13 }
  0x37   : > { %717 = vrot.lane.b32.xlu0 %v566_v16, %s6457_s13  ;;  %5683 = vmatmul.mubr.msk.f32.vlgmr.msra.gmra.mrb[6].mxu1 %vm658_vm0, %v572_v23 }
  0x3a   : > { %721 = vrot.lane.b32.xlu1 %v568_v18, %s6457_s13 }
  0x3b   : > { %719 = vrot.lane.b32.xlu0 %v567_v19, %s6457_s13 }
  0x3e   : > { %723 = vrot.lane.b32.xlu1 %v569_v20, %s6457_s13 }
  0x3f   : > { %6159 = vrot.lane.b32.xlu0 %v6118_v7, %s6458_s14 }
  0x42   : > { %6164 = vrot.lane.b32.xlu1 %v6123_v11, %s6458_s14 }
  0x43   : > { %725 = vrot.lane.b32.xlu0 %v570_v22, %s6457_s13 }
  0x46   : > { %729 = vrot.lane.b32.xlu1 %v572_v23, %s6457_s13 }
  0x47   : > { %727 = vrot.lane.b32.xlu0 %v571_v24, %s6457_s13 }
  0x4a   : > { %731 = vrot.lane.b32.xlu1 %v565_v8, %s6458_s14 }
  0x4b   : > { %6169 = vrot.lane.b32.xlu0 %v6538_v3, %s6458_s14 }
  0x4e   : > { %6174 = vrot.lane.b32.xlu1 %v6133_v15, %s6458_s14 }
  0x4f   : > { %733 = vrot.lane.b32.xlu0 %v566_v16, %s6458_s14 }
  0x52   : > { %737 = vrot.lane.b32.xlu1 %v568_v18, %s6458_s14 }
  0x53   : > { %735 = vrot.lane.b32.xlu0 %v567_v19, %s6458_s14 }
  0x56   : > { %741 = vrot.lane.b32.xlu1 %v570_v22, %s6458_s14 }
  0x57   : > { %739 = vrot.lane.b32.xlu0 %v569_v20, %s6458_s14 }
  0x5a   : > { %745 = vrot.lane.b32.xlu1 %v572_v23, %s6458_s14 }
  0x5b   : > { %743 = vrot.lane.b32.xlu0 %v571_v24, %s6458_s14 }
  0x5e   : > { %6189 = vrot.lane.b32.xlu1 %v6188_v29, %s6456_s12 }
  0x5f   : > { %6179 = vrot.lane.b32.xlu0 %v6178_v30, %s6456_s12 }
  0x62   : > { %6199 = vrot.lane.b32.xlu1 %v6178_v30, %s6457_s13 }
  0x63   : > { %6184 = vrot.lane.b32.xlu0 %v6183_v33, %s6456_s12 }
  0x66   : > { %6209 = vrot.lane.b32.xlu1 %v6188_v29, %s6457_s13 }
  0x67   : > { %6194 = vrot.lane.b32.xlu0 %v6193_v36, %s6456_s12 }
  0x6a   : > { %6214 = vrot.lane.b32.xlu1 %v6193_v36, %s6457_s13 }
  0x6b   : > { %6204 = vrot.lane.b32.xlu0 %v6183_v33, %s6457_s13  ;;  %s6463_s13 = smov 32  }
  0x6e   : > { %6224 = vrot.lane.b32.xlu1 %v6183_v33, %s6458_s14 }
  0x6f   : > { %6219 = vrot.lane.b32.xlu0 %v6178_v30, %s6458_s14 }
  0x72   : > { %6234 = vrot.lane.b32.xlu1 %v6193_v36, %s6458_s14 }
  0x73   : > { %6229 = vrot.lane.b32.xlu0 %v6188_v29, %s6458_s14 }
  0x88   : > { %v6130_v37 = vpop.permute.xlu1 %6129 }
  0x89   : > { %v6132_v38 = vunpack.i.h.bf16 %v6130_v37  ;;  %v6131_v39 = vunpack.i.l.bf16 %v6130_v37  ;;  %v6120_v40 = vpop.permute.xlu0 %6119 }
  0x8a   : > { %v6122_v41 = vunpack.i.h.bf16 %v6120_v40  ;;  %v6121_v42 = vunpack.i.l.bf16 %v6120_v40 }
  0x8b   : > { %v5945_v43 = vpack.c.bf16 %v6132_v38, %v6131_v39 }
  0x8c   : > { %v700_v44 = vpop.permute.xlu1 %699  ;;  %v5933_v45 = vpack.c.bf16 %v6122_v41, %v6121_v42 }
  0x8d   : > { %v6125_v46 = vpop.permute.xlu0 %6124  ;;  %5689 = vmatprep.mubr.msk.f32.mxu0 %vm658_vm0, %v700_v44 }
  0x8e   : > { %v6127_v47 = vunpack.i.h.bf16 %v6125_v46  ;;  %v6126_v48 = vunpack.i.l.bf16 %v6125_v46  ;;  %5935 = vmatprep.subr.msk.bf16.mxu0 %vm6543_vm1, %v5933_v45 }
  0x8f   : > { %5938 = vmatpush3.bf16.xpose.msk.msra.mxu0 %vm6543_vm1, %v5933_v45 }
  0x90   : > { %v5939_v49 = vpack.c.bf16 %v6127_v47, %v6126_v48  ;;  %5947 = vmatprep.subr.msk.bf16.mxu0 %vm6543_vm1, %v5945_v43  ;;  %v6135_v50 = vpop.permute.xlu1 %6134 }
  0x91   : > { %v702_v51 = vpop.permute.xlu0 %701  ;;  %v6137_v52 = vunpack.i.h.bf16 %v6135_v50  ;;  %v6136_v53 = vunpack.i.l.bf16 %v6135_v50 }
  0x92   : > { %5941 = vmatprep.subr.msk.bf16.mxu1 %vm6543_vm1, %v5939_v49 }
  0x93   : > { %v5951_v54 = vpack.c.bf16 %v6137_v52, %v6136_v53  ;;  %5944 = vmatpush3.bf16.xpose.msk.msra.mxu1 %vm6543_vm1, %v5939_v49 }
  0x94   : > { %v706_v55 = vpop.permute.xlu1 %705 }
  0x95   : > { %v704_v56 = vpop.permute.xlu0 %703  ;;  %5953 = vmatprep.subr.msk.bf16.mxu1 %vm6543_vm1, %v5951_v54 }
  0x96   : > { %5690 = vmatmul.mubr.msk.f32.vlgmr.msra.gmra.mrb[0].mxu0 %vm658_vm0, %v702_v51  ;;  %5696 = vmatprep.mubr.msk.f32.mxu1 %vm658_vm0, %v704_v56 }
  0x97   : > { %5950 = vmatpush3.bf16.xpose.msk.msra.mxu0 %vm6543_vm1, %v5945_v43 }
  0x98   : > { %v708_v57 = vpop.permute.xlu1 %707 }
  0x99   : > { %v6140_v58 = vpop.permute.xlu0 %6139  ;;  %5703 = vmatprep.mubr.msk.f32.mxu0 %vm658_vm0, %v708_v57 }
  0x9a   : > { %v6142_v59 = vunpack.i.h.bf16 %v6140_v58  ;;  %v6141_v60 = vunpack.i.l.bf16 %v6140_v58  ;;  %5697 = vmatmul.mubr.msk.f32.vlgmr.msra.gmra.mrb[8].mxu1 %vm658_vm0, %v706_v55 }
  0x9b   : > { %5956 = vmatpush3.bf16.xpose.msk.msra.mxu1 %vm6543_vm1, %v5951_v54 }
  0x9c   : > { %v5957_v61 = vpack.c.bf16 %v6142_v59, %v6141_v60  ;;  %v6145_v62 = vpop.permute.xlu1 %6144 }
  0x9d   : > { %v710_v63 = vpop.permute.xlu0 %709  ;;  %v6147_v0 = vunpack.i.h.bf16 %v6145_v62  ;;  %v6146_v1 = vunpack.i.l.bf16 %v6145_v62 }
  0x9e   : > { %5704 = vmatmul.mubr.msk.f32.vlgmr.msra.gmra.mrb[2].mxu0 %vm658_vm0, %v710_v63  ;;  %5959 = vmatprep.subr.msk.bf16.mxu0 %vm6543_vm1, %v5957_v61 }
  0x9f   : > { %v5963_v2 = vpack.c.bf16 %v6147_v0, %v6146_v1  ;;  %5962 = vmatpush3.bf16.xpose.msk.msra.mxu0 %vm6543_vm1, %v5957_v61 }
  0xa0   : > { %v714_v3 = vpop.permute.xlu1 %713 }
  0xa1   : > { %v712_v4 = vpop.permute.xlu0 %711  ;;  %5965 = vmatprep.subr.msk.bf16.mxu1 %vm6543_vm1, %v5963_v2 }
  0xa2   : > { %5710 = vmatprep.mubr.msk.f32.mxu1 %vm658_vm0, %v712_v4 }
  0xa3   : > { %5711 = vmatmul.mubr.msk.f32.vlgmr.msra.gmra.mrb[10].mxu1 %vm658_vm0, %v714_v3 }
  0xa4   : > { %5968 = vmatpush3.bf16.xpose.msk.msra.mxu1 %vm6543_vm1, %v5963_v2  ;;  %v716_v5 = vpop.permute.xlu1 %715 }
  0xa5   : > { %v6150_v6 = vpop.permute.xlu0 %6149  ;;  %5717 = vmatprep.mubr.msk.f32.mxu0 %vm658_vm0, %v716_v5  ;;  %v6459_v5 = vmov -inf  }
  0xa6   : > { %v6152_v7 = vunpack.i.h.bf16 %v6150_v6  ;;  %v6151_v8 = vunpack.i.l.bf16 %v6150_v6  ;;  %595 = vst.msk [vmem:[#allocation2 + $0x8] sm:$0xff] %vm593_vm2, %v6459_v5  ;;  %594 = vst.msk [vmem:[#allocation2] sm:$0xff] %vm593_vm2, %v6459_v5  ;;  %v6460_v6 = vmov 0  }
  0xa7   : > { %596 = vst.msk [vmem:[#allocation2 + $0x10] sm:$0xff] %vm593_vm2, %v6459_v5  ;;  %597 = vst.msk [vmem:[#allocation2 + $0x18] sm:$0xff] %vm593_vm2, %v6459_v5  ;;  %6239 = vset.pattern.permute.xlu1 %v6460_v6  ;;  %6238 = vset.pattern.permute.xlu0 %v6460_v6 }
  0xa8   : > { %v5969_v10 = vpack.c.bf16 %v6152_v7, %v6151_v8  ;;  %v6155_v11 = vpop.permute.xlu1 %6154  ;;  %598 = vst.msk [vmem:[#allocation2 + $0x20] sm:$0xff] %vm593_vm2, %v6459_v5  ;;  %599 = vst.msk [vmem:[#allocation2 + $0x28] sm:$0xff] %vm593_vm2, %v6459_v5  ;;  %v6461_v7 = vmov 0.0  }
  0xa9   : > { %v718_v12 = vpop.permute.xlu0 %717  ;;  %v6157_v13 = vunpack.i.h.bf16 %v6155_v11  ;;  %v6156_v14 = vunpack.i.l.bf16 %v6155_v11  ;;  %600 = vst.msk [vmem:[#allocation2 + $0x30] sm:$0xff] %vm593_vm2, %v6459_v5  ;;  %601 = vst.msk [vmem:[#allocation2 + $0x38] sm:$0xff] %vm593_vm2, %v6459_v5 }
  0xaa   : > { %5718 = vmatmul.mubr.msk.f32.vlgmr.msra.gmra.mrb[4].mxu0 %vm658_vm0, %v718_v12  ;;  %5971 = vmatprep.subr.msk.bf16.mxu0 %vm6543_vm1, %v5969_v10  ;;  %602 = vst.msk [vmem:[#allocation2 + $0x40] sm:$0xff] %vm593_vm2, %v6459_v5  ;;  %603 = vst.msk [vmem:[#allocation2 + $0x48] sm:$0xff] %vm593_vm2, %v6459_v5 }
  0xab   : > { %v5975_v15 = vpack.c.bf16 %v6157_v13, %v6156_v14  ;;  %5974 = vmatpush3.bf16.xpose.msk.msra.mxu0 %vm6543_vm1, %v5969_v10  ;;  %604 = vst.msk [vmem:[#allocation2 + $0x50] sm:$0xff] %vm593_vm2, %v6459_v5  ;;  %605 = vst.msk [vmem:[#allocation2 + $0x58] sm:$0xff] %vm593_vm2, %v6459_v5 }
  0xac   : > { %v722_v16 = vpop.permute.xlu1 %721  ;;  %606 = vst.msk [vmem:[#allocation2 + $0x60] sm:$0xff] %vm593_vm2, %v6459_v5  ;;  %607 = vst.msk [vmem:[#allocation2 + $0x68] sm:$0xff] %vm593_vm2, %v6459_v5 }
  0xad   : > { %v720_v17 = vpop.permute.xlu0 %719  ;;  %5977 = vmatprep.subr.msk.bf16.mxu1 %vm6543_vm1, %v5975_v15  ;;  %608 = vst.msk [vmem:[#allocation2 + $0x70] sm:$0xff] %vm593_vm2, %v6459_v5  ;;  %609 = vst.msk [vmem:[#allocation2 + $0x78] sm:$0xff] %vm593_vm2, %v6459_v5 }
  0xae   : > { %5724 = vmatprep.mubr.msk.f32.mxu1 %vm658_vm0, %v720_v17  ;;  %610 = vst.msk [vmem:[#allocation2 + $0x80] sm:$0xff] %vm593_vm2, %v6459_v5  ;;  %611 = vst.msk [vmem:[#allocation2 + $0x88] sm:$0xff] %vm593_vm2, %v6459_v5  ;;  %v7015_v6 = vld [vmem:[#allocation2 + $0x10] sm:$0xff] }
  0xaf   : > { %5725 = vmatmul.mubr.msk.f32.vlgmr.msra.gmra.mrb[12].mxu1 %vm658_vm0, %v722_v16  ;;  %612 = vst.msk [vmem:[#allocation2 + $0x90] sm:$0xff] %vm593_vm2, %v6459_v5  ;;  %613 = vst.msk [vmem:[#allocation2 + $0x98] sm:$0xff] %vm593_vm2, %v6459_v5 }
  0xb0   : > { %5980 = vmatpush3.bf16.xpose.msk.msra.mxu1 %vm6543_vm1, %v5975_v15  ;;  %v724_v18 = vpop.permute.xlu1 %723  ;;  %614 = vst.msk [vmem:[#allocation2 + $0xa0] sm:$0xff] %vm593_vm2, %v6459_v5  ;;  %615 = vst.msk [vmem:[#allocation2 + $0xa8] sm:$0xff] %vm593_vm2, %v6459_v5 }
  0xb1   : > { %v6160_v19 = vpop.permute.xlu0 %6159  ;;  %5731 = vmatprep.mubr.msk.f32.mxu0 %vm658_vm0, %v724_v18  ;;  %616 = vst.msk [vmem:[#allocation2 + $0xb0] sm:$0xff] %vm593_vm2, %v6459_v5  ;;  %617 = vst.msk [vmem:[#allocation2 + $0xb8] sm:$0xff] %vm593_vm2, %v6459_v5 }
  0xb2   : > { %v6162_v20 = vunpack.i.h.bf16 %v6160_v19  ;;  %v6161_v21 = vunpack.i.l.bf16 %v6160_v19  ;;  %618 = vst.msk [vmem:[#allocation2 + $0xc0] sm:$0xff] %vm593_vm2, %v6459_v5  ;;  %619 = vst.msk [vmem:[#allocation2 + $0xc8] sm:$0xff] %vm593_vm2, %v6459_v5 }
  0xb3   : > { %620 = vst.msk [vmem:[#allocation2 + $0xd0] sm:$0xff] %vm593_vm2, %v6459_v5  ;;  %621 = vst.msk [vmem:[#allocation2 + $0xd8] sm:$0xff] %vm593_vm2, %v6459_v5 }
  0xb4   : > { %v5981_v22 = vpack.c.bf16 %v6162_v20, %v6161_v21  ;;  %v6165_v23 = vpop.permute.xlu1 %6164  ;;  %622 = vst.msk [vmem:[#allocation2 + $0xe0] sm:$0xff] %vm593_vm2, %v6459_v5  ;;  %623 = vst.msk [vmem:[#allocation2 + $0xe8] sm:$0xff] %vm593_vm2, %v6459_v5 }
  0xb5   : > { %v726_v24 = vpop.permute.xlu0 %725  ;;  %v6167_v29 = vunpack.i.h.bf16 %v6165_v23  ;;  %v6166_v30 = vunpack.i.l.bf16 %v6165_v23  ;;  %624 = vst.msk [vmem:[#allocation2 + $0xf0] sm:$0xff] %vm593_vm2, %v6459_v5  ;;  %625 = vst.msk [vmem:[#allocation2 + $0xf8] sm:$0xff] %vm593_vm2, %v6459_v5 }
  0xb6   : > { %5732 = vmatmul.mubr.msk.f32.vlgmr.msra.gmra.mrb[6].mxu0 %vm658_vm0, %v726_v24  ;;  %5983 = vmatprep.subr.msk.bf16.mxu0 %vm6543_vm1, %v5981_v22  ;;  %668 = vst.msk [vmem:[#allocation4 + $0x48] sm:$0xff] %vm658_vm0, %v6461_v7  ;;  %659 = vst.msk [vmem:[#allocation4] sm:$0xff] %vm658_vm0, %v6461_v7 }
  0xb7   : > { %v5987_v33 = vpack.c.bf16 %v6167_v29, %v6166_v30  ;;  %5986 = vmatpush3.bf16.xpose.msk.msra.mxu0 %vm6543_vm1, %v5981_v22  ;;  %626 = vst.msk [vmem:[#allocation3] sm:$0xff] %vm593_vm2, %v6461_v7  ;;  %627 = vst.msk [vmem:[#allocation3 + $0x8] sm:$0xff] %vm593_vm2, %v6461_v7 }
  0xb8   : > { %v730_v36 = vpop.permute.xlu1 %729  ;;  %628 = vst.msk [vmem:[#allocation3 + $0x10] sm:$0xff] %vm593_vm2, %v6461_v7  ;;  %629 = vst.msk [vmem:[#allocation3 + $0x18] sm:$0xff] %vm593_vm2, %v6461_v7 }
  0xb9   : > { %v728_v37 = vpop.permute.xlu0 %727  ;;  %5989 = vmatprep.subr.msk.bf16.mxu1 %vm6543_vm1, %v5987_v33  ;;  %630 = vst.msk [vmem:[#allocation3 + $0x20] sm:$0xff] %vm593_vm2, %v6461_v7  ;;  %631 = vst.msk [vmem:[#allocation3 + $0x28] sm:$0xff] %vm593_vm2, %v6461_v7 }
  0xba   : > { %5738 = vmatprep.mubr.msk.f32.mxu1 %vm658_vm0, %v728_v37  ;;  %632 = vst.msk [vmem:[#allocation3 + $0x30] sm:$0xff] %vm593_vm2, %v6461_v7  ;;  %633 = vst.msk [vmem:[#allocation3 + $0x38] sm:$0xff] %vm593_vm2, %v6461_v7 }
  0xbb   : > { %5739 = vmatmul.mubr.msk.f32.vlgmr.msra.gmra.mrb[14].mxu1 %vm658_vm0, %v730_v36  ;;  %634 = vst.msk [vmem:[#allocation3 + $0x40] sm:$0xff] %vm593_vm2, %v6461_v7  ;;  %635 = vst.msk [vmem:[#allocation3 + $0x48] sm:$0xff] %vm593_vm2, %v6461_v7 }
  0xbc   : > { %5992 = vmatpush3.bf16.xpose.msk.msra.mxu1 %vm6543_vm1, %v5987_v33  ;;  %v732_v38 = vpop.permute.xlu1 %731  ;;  %636 = vst.msk [vmem:[#allocation3 + $0x50] sm:$0xff] %vm593_vm2, %v6461_v7  ;;  %637 = vst.msk [vmem:[#allocation3 + $0x58] sm:$0xff] %vm593_vm2, %v6461_v7 }
  0xbd   : > { %v6170_v39 = vpop.permute.xlu0 %6169  ;;  %5745 = vmatprep.mubr.msk.f32.mxu0 %vm658_vm0, %v732_v38  ;;  %638 = vst.msk [vmem:[#allocation3 + $0x60] sm:$0xff] %vm593_vm2, %v6461_v7  ;;  %639 = vst.msk [vmem:[#allocation3 + $0x68] sm:$0xff] %vm593_vm2, %v6461_v7 }
  0xbe   : > { %v6172_v40 = vunpack.i.h.bf16 %v6170_v39  ;;  %v6171_v41 = vunpack.i.l.bf16 %v6170_v39  ;;  %640 = vst.msk [vmem:[#allocation3 + $0x70] sm:$0xff] %vm593_vm2, %v6461_v7  ;;  %641 = vst.msk [vmem:[#allocation3 + $0x78] sm:$0xff] %vm593_vm2, %v6461_v7 }
  0xbf   : > { %642 = vst.msk [vmem:[#allocation3 + $0x80] sm:$0xff] %vm593_vm2, %v6461_v7  ;;  %643 = vst.msk [vmem:[#allocation3 + $0x88] sm:$0xff] %vm593_vm2, %v6461_v7 }
  0xc0   : > { %v5993_v42 = vpack.c.bf16 %v6172_v40, %v6171_v41  ;;  %v6175_v43 = vpop.permute.xlu1 %6174  ;;  %644 = vst.msk [vmem:[#allocation3 + $0x90] sm:$0xff] %vm593_vm2, %v6461_v7  ;;  %645 = vst.msk [vmem:[#allocation3 + $0x98] sm:$0xff] %vm593_vm2, %v6461_v7 }
  0xc1   : > { %v734_v44 = vpop.permute.xlu0 %733  ;;  %v6177_v45 = vunpack.i.h.bf16 %v6175_v43  ;;  %v6176_v46 = vunpack.i.l.bf16 %v6175_v43  ;;  %646 = vst.msk [vmem:[#allocation3 + $0xa0] sm:$0xff] %vm593_vm2, %v6461_v7  ;;  %647 = vst.msk [vmem:[#allocation3 + $0xa8] sm:$0xff] %vm593_vm2, %v6461_v7 }
  0xc2   : > { %5746 = vmatmul.mubr.msk.f32.vlgmr.msra.gmra.mrb[8].mxu0 %vm658_vm0, %v734_v44  ;;  %5995 = vmatprep.subr.msk.bf16.mxu0 %vm6543_vm1, %v5993_v42  ;;  %648 = vst.msk [vmem:[#allocation3 + $0xb0] sm:$0xff] %vm593_vm2, %v6461_v7  ;;  %649 = vst.msk [vmem:[#allocation3 + $0xb8] sm:$0xff] %vm593_vm2, %v6461_v7 }
  0xc3   : > { %v5999_v47 = vpack.c.bf16 %v6177_v45, %v6176_v46  ;;  %5998 = vmatpush3.bf16.xpose.msk.msra.mxu0 %vm6543_vm1, %v5993_v42  ;;  %650 = vst.msk [vmem:[#allocation3 + $0xc0] sm:$0xff] %vm593_vm2, %v6461_v7  ;;  %651 = vst.msk [vmem:[#allocation3 + $0xc8] sm:$0xff] %vm593_vm2, %v6461_v7 }
  0xc4   : > { %v738_v48 = vpop.permute.xlu1 %737  ;;  %652 = vst.msk [vmem:[#allocation3 + $0xd0] sm:$0xff] %vm593_vm2, %v6461_v7  ;;  %653 = vst.msk [vmem:[#allocation3 + $0xd8] sm:$0xff] %vm593_vm2, %v6461_v7 }
  0xc5   : > { %v736_v49 = vpop.permute.xlu0 %735  ;;  %6001 = vmatprep.subr.msk.bf16.mxu1 %vm6543_vm1, %v5999_v47  ;;  %654 = vst.msk [vmem:[#allocation3 + $0xe0] sm:$0xff] %vm593_vm2, %v6461_v7  ;;  %655 = vst.msk [vmem:[#allocation3 + $0xe8] sm:$0xff] %vm593_vm2, %v6461_v7 }
  0xc6   : > { %5752 = vmatprep.mubr.msk.f32.mxu1 %vm658_vm0, %v736_v49  ;;  %656 = vst.msk [vmem:[#allocation3 + $0xf0] sm:$0xff] %vm593_vm2, %v6461_v7  ;;  %657 = vst.msk [vmem:[#allocation3 + $0xf8] sm:$0xff] %vm593_vm2, %v6461_v7  ;;  %v6985_v49 = vld [vmem:[#allocation2] sm:$0xff] }
  0xc7   : > { %5753 = vmatmul.mubr.msk.f32.vlgmr.msra.gmra.mrb[16].mxu1 %vm658_vm0, %v738_v48  ;;  %660 = vst.msk [vmem:[#allocation4 + $0x8] sm:$0xff] %vm658_vm0, %v6461_v7  ;;  %661 = vst.msk [vmem:[#allocation4 + $0x10] sm:$0xff] %vm658_vm0, %v6461_v7  ;;  %v6983_v48 = vld [vmem:[#allocation2 + $0x8] sm:$0xff] }
  0xc8   : > { %6004 = vmatpush3.bf16.xpose.msk.msra.mxu1 %vm6543_vm1, %v5999_v47  ;;  %v742_v50 = vpop.permute.xlu1 %741  ;;  %662 = vst.msk [vmem:[#allocation4 + $0x18] sm:$0xff] %vm658_vm0, %v6461_v7  ;;  %663 = vst.msk [vmem:[#allocation4 + $0x20] sm:$0xff] %vm658_vm0, %v6461_v7 }
  0xc9   : > { %v740_v51 = vpop.permute.xlu0 %739  ;;  %664 = vst.msk [vmem:[#allocation4 + $0x28] sm:$0xff] %vm658_vm0, %v6461_v7  ;;  %665 = vst.msk [vmem:[#allocation4 + $0x30] sm:$0xff] %vm658_vm0, %v6461_v7 }
  0xca   : > { %5759 = vmatprep.mubr.msk.f32.mxu0 %vm658_vm0, %v740_v51  ;;  %666 = vst.msk [vmem:[#allocation4 + $0x38] sm:$0xff] %vm658_vm0, %v6461_v7  ;;  %667 = vst.msk [vmem:[#allocation4 + $0x40] sm:$0xff] %vm658_vm0, %v6461_v7 }
  0xcb   : > { %5760 = vmatmul.mubr.msk.f32.vlgmr.msra.gmra.mrb[10].mxu0 %vm658_vm0, %v742_v50  ;;  %669 = vst.msk [vmem:[#allocation4 + $0x50] sm:$0xff] %vm658_vm0, %v6461_v7  ;;  %670 = vst.msk [vmem:[#allocation4 + $0x58] sm:$0xff] %vm658_vm0, %v6461_v7 }
  0xcc   : > { %v746_v52 = vpop.permute.xlu1 %745  ;;  %671 = vst.msk [vmem:[#allocation4 + $0x60] sm:$0xff] %vm658_vm0, %v6461_v7  ;;  %672 = vst.msk [vmem:[#allocation4 + $0x68] sm:$0xff] %vm658_vm0, %v6461_v7 }
  0xcd   : > { %v744_v53 = vpop.permute.xlu0 %743  ;;  %673 = vst.msk [vmem:[#allocation4 + $0x70] sm:$0xff] %vm658_vm0, %v6461_v7  ;;  %674 = vst.msk [vmem:[#allocation4 + $0x78] sm:$0xff] %vm658_vm0, %v6461_v7 }
  0xce   : > { %5766 = vmatprep.mubr.msk.f32.mxu1 %vm658_vm0, %v744_v53  ;;  %675 = vst.msk [vmem:[#allocation4 + $0x80] sm:$0xff] %vm658_vm0, %v6461_v7  ;;  %676 = vst.msk [vmem:[#allocation4 + $0x88] sm:$0xff] %vm658_vm0, %v6461_v7 }
  0xcf   : > { %5767 = vmatmul.mubr.msk.f32.vlgmr.msra.gmra.mrb[18].mxu1 %vm658_vm0, %v746_v52  ;;  %677 = vst.msk [vmem:[#allocation4 + $0x90] sm:$0xff] %vm658_vm0, %v6461_v7  ;;  %678 = vst.msk [vmem:[#allocation4 + $0x98] sm:$0xff] %vm658_vm0, %v6461_v7 }
  0xd0   : > { %679 = vst.msk [vmem:[#allocation4 + $0xa0] sm:$0xff] %vm658_vm0, %v6461_v7  ;;  %680 = vst.msk [vmem:[#allocation4 + $0xa8] sm:$0xff] %vm658_vm0, %v6461_v7  ;;  %v6921_v8 = vpop.permute.xlu1 %6189 }
  0xd1   : > { %681 = vst.msk [vmem:[#allocation4 + $0xb0] sm:$0xff] %vm658_vm0, %v6461_v7  ;;  %682 = vst.msk [vmem:[#allocation4 + $0xb8] sm:$0xff] %vm658_vm0, %v6461_v7  ;;  %v6923_v10 = vpop.permute.xlu0 %6179 }
  0xd2   : > { %683 = vst.msk [vmem:[#allocation4 + $0xc0] sm:$0xff] %vm658_vm0, %v6461_v7  ;;  %684 = vst.msk [vmem:[#allocation4 + $0xc8] sm:$0xff] %vm658_vm0, %v6461_v7 }
  0xd3   : > { %685 = vst.msk [vmem:[#allocation4 + $0xd0] sm:$0xff] %vm658_vm0, %v6461_v7  ;;  %686 = vst.msk [vmem:[#allocation4 + $0xd8] sm:$0xff] %vm658_vm0, %v6461_v7 }
  0xd4   : > { %687 = vst.msk [vmem:[#allocation4 + $0xe0] sm:$0xff] %vm658_vm0, %v6461_v7  ;;  %688 = vst.msk [vmem:[#allocation4 + $0xe8] sm:$0xff] %vm658_vm0, %v6461_v7  ;;  %v6925_v11 = vpop.permute.xlu1 %6199 }
  0xd5   : > { %689 = vst.msk [vmem:[#allocation4 + $0xf0] sm:$0xff] %vm658_vm0, %v6461_v7  ;;  %690 = vst.msk [vmem:[#allocation4 + $0xf8] sm:$0xff] %vm658_vm0, %v6461_v7  ;;  %v6927_v12 = vpop.permute.xlu0 %6184 }
  0xd6   : > { %8122 = vst [vmem:[#allocation9_spill] sm:$0xff] %v6983_v48  ;;  %8123 = vst [vmem:[#allocation10_spill] sm:$0xff] %v6985_v49 }
  0xd7   : > { %8128 = vst [vmem:[#allocation15_spill] sm:$0xff] %v7015_v6 }
  0xd8   : > { %v6935_v16 = vpop.permute.xlu1 %6209 }
  0xd9   : > { %v6937_v17 = vpop.permute.xlu0 %6194 }
  0xdc   : > { %v6955_v30 = vpop.permute.xlu1 %6214 }
  0xdd   : > { %v6957_v33 = vpop.permute.xlu0 %6204 }
  0xe0   : > { %v6967_v40 = vpop.permute.xlu1 %6224 }
  0xe1   : > { %v6969_v41 = vpop.permute.xlu0 %6219 }
  0xe2   : > { %8118 = vst [vmem:[#allocation5_spill] sm:$0xff] %v6969_v41 }
  0xe4   : > { %v6979_v46 = vpop.permute.xlu1 %6234 }
  0xe5   : > { %8120 = vst [vmem:[#allocation7_spill] sm:$0xff] %v6979_v46  ;;  %v6981_v47 = vpop.permute.xlu0 %6229 }
  0xe6   : > { %8121 = vst [vmem:[#allocation8_spill] sm:$0xff] %v6981_v47 }
  0xf2   : > { %v6729_v54 = vpop.f32.mrb[0].mxu1 }
  0xf3   : > { %v6731_v55 = vpop.f32.mrb[1].mxu1  ;;  %v2247_v9 = vsel %vm658_vm0, %v6729_v54, -inf }
  0xf4   : > { %2248 = vmax.xlane.f32.xlu1 %v2247_v9  ;;  %v2244_v56 = vsel %vm658_vm0, %v6731_v55, -inf }
  0xf5   : > { %2245 = vmax.xlane.f32.xlu0 %v2244_v56 }
  0xfa   : > { %v6737_v57 = vpop.f32.mrb[2].mxu1 }
  0xfb   : > { %v6739_v58 = vpop.f32.mrb[3].mxu1  ;;  %v2253_v59 = vsel %vm658_vm0, %v6737_v57, -inf }
  0xfc   : > { %2254 = vmax.xlane.f32.xlu1 %v2253_v59  ;;  %v2250_v60 = vsel %vm658_vm0, %v6739_v58, -inf }
  0xfd   : > { %2251 = vmax.xlane.f32.xlu0 %v2250_v60 }
 0x102   : > { %v6745_v61 = vpop.f32.mrb[4].mxu1 }
 0x103   : > { %v2259_v62 = vsel %vm658_vm0, %v6745_v61, -inf  ;;  %v6749_v63 = vpop.f32.mrb[5].mxu1 }
 0x104   : > { %2260 = vmax.xlane.f32.xlu0 %v2259_v62  ;;  %v2256_v0 = vsel %vm658_vm0, %v6749_v63, -inf }
 0x108   : > { %2257 = vmax.xlane.f32.xlu0 %v2256_v0 }
 0x10a   : > { %v6753_v1 = vpop.f32.mrb[6].mxu1 }
 0x10b   : > { %v2265_v2 = vsel %vm658_vm0, %v6753_v1, -inf  ;;  %v6757_v3 = vpop.f32.mrb[7].mxu1 }
 0x10c   : > { %2266 = vmax.xlane.f32.xlu1 %v2265_v2  ;;  %v2262_v4 = vsel %vm658_vm0, %v6757_v3, -inf }
 0x110   : > { %2263 = vmax.xlane.f32.xlu1 %v2262_v4  ;;  %v7011_v4 = vld [vmem:[#allocation2 + $0x18] sm:$0xff] }
 0x111   : > { %8126 = vst [vmem:[#allocation13_spill] sm:$0xff] %v7011_v4 }
 0x169   : > { %v6929_v13 = vpop.f32.mrb[0].mxu0 }
 0x16a   : > { %v6931_v14 = vpop.f32.mrb[1].mxu0  ;;  %v2271_v15 = vsel %vm658_vm0, %v6929_v13, -inf }
 0x16b   : > { %2272 = vmax.xlane.f32.xlu0 %v2271_v15  ;;  %v2268_v20 = vsel %vm658_vm0, %v6931_v14, -inf }
 0x16d   : > { %v6939_v18 = vpop.f32.mrb[8].mxu1 }
 0x16e   : > { %v6941_v19 = vpop.f32.mrb[9].mxu1  ;;  %v2277_v21 = vsel %vm658_vm0, %v6939_v18, -inf }
 0x16f   : > { %2269 = vmax.xlane.f32.xlu0 %v2268_v20  ;;  %2278 = vmax.xlane.f32.xlu1 %v2277_v21  ;;  %v2274_v29 = vsel %vm658_vm0, %v6941_v19, -inf }
 0x171   : > { %v6947_v22 = vpop.f32.mrb[2].mxu0 }
 0x172   : > { %v6949_v23 = vpop.f32.mrb[3].mxu0  ;;  %v2283_v24 = vsel %vm658_vm0, %v6947_v22, -inf }
 0x173   : > { %2284 = vmax.xlane.f32.xlu0 %v2283_v24  ;;  %2275 = vmax.xlane.f32.xlu1 %v2274_v29  ;;  %v2280_v37 = vsel %vm658_vm0, %v6949_v23, -inf }
 0x176   : > { %v6959_v36 = vpop.f32.mrb[10].mxu1 }
 0x177   : > { %2281 = vmax.xlane.f32.xlu0 %v2280_v37  ;;  %v6963_v38 = vpop.f32.mrb[11].mxu1  ;;  %v2289_v39 = vsel %vm658_vm0, %v6959_v36, -inf }
 0x178   : > { %2290 = vmax.xlane.f32.xlu1 %v2289_v39  ;;  %v2286_v42 = vsel %vm658_vm0, %v6963_v38, -inf }
 0x17c   : > { %2287 = vmax.xlane.f32.xlu1 %v2286_v42 }
 0x17d   : > { %v6973_v43 = vpop.f32.mrb[4].mxu0 }
 0x17e   : > { %v6975_v44 = vpop.f32.mrb[5].mxu0  ;;  %v2295_v45 = vsel %vm658_vm0, %v6973_v43, -inf }
 0x17f   : > { %8119 = vst [vmem:[#allocation6_spill] sm:$0xff] %v6975_v44  ;;  %2296 = vmax.xlane.f32.xlu0 %v2295_v45  ;;  %v2292_v51 = vsel %vm658_vm0, %v6975_v44, -inf }
 0x181   : > { %v2249_v52 = vpop.xlane.xlu1 %2248 }
 0x182   : > { %v6987_v50 = vpop.f32.mrb[12].mxu1  ;;  %v6996_v56 = vmax.f32 %v6983_v48, %v2249_v52  ;;  %v2246_v59 = vpop.xlane.xlu0 %2245 }
 0x183   : > { %2293 = vmax.xlane.f32.xlu0 %v2292_v51  ;;  %v6991_v53 = vpop.f32.mrb[13].mxu1  ;;  %v2301_v9 = vsel %vm658_vm0, %v6987_v50, -inf  ;;  %v6999_v60 = vmax.f32 %v6985_v49, %v2246_v59  ;;  %v7039_v51 = vld [vmem:[#allocation2 + $0x28] sm:$0xff] }
 0x184   : > { %8124 = vst [vmem:[#allocation11_spill] sm:$0xff] %v6996_v56  ;;  %2302 = vmax.xlane.f32.xlu1 %v2301_v9  ;;  %4534 = vst.msk [vmem:[#allocation2 + $0x8] sm:$0xff] %vm593_vm2, %v6996_v56  ;;  %v2298_v2 = vsel %vm658_vm0, %v6991_v53, -inf }
 0x185   : > { %8125 = vst [vmem:[#allocation12_spill] sm:$0xff] %v6999_v60  ;;  %4533 = vst.msk [vmem:[#allocation2] sm:$0xff] %vm593_vm2, %v6999_v60 }
 0x186   : > { %8133 = vst [vmem:[#allocation20_spill] sm:$0xff] %v7039_v51 }
 0x188   : > { %2299 = vmax.xlane.f32.xlu1 %v2298_v2  ;;  %v7046_v2 = vld [vmem:[#allocation2 + $0x20] sm:$0xff] }
 0x189   : > { %v7013_v5 = vpop.f32.mrb[6].mxu0  ;;  %v2255_v20 = vpop.xlane.xlu1 %2254  ;;  %8135 = vst [vmem:[#allocation22_spill] sm:$0xff] %v7046_v2 }
 0x18a   : > { %8127 = vst [vmem:[#allocation14_spill] sm:$0xff] %v7013_v5  ;;  %v7017_v7 = vpop.f32.mrb[7].mxu0  ;;  %v2307_v15 = vsel %vm658_vm0, %v7013_v5, -inf  ;;  %v7022_v21 = vmax.f32 %v7011_v4, %v2255_v20  ;;  %v2252_v24 = vpop.xlane.xlu0 %2251  ;;  %v7152_v5 = vld [vmem:[#allocation2 + $0x88] sm:$0xff] }
 0x18b   : > { %8129 = vst [vmem:[#allocation16_spill] sm:$0xff] %v7017_v7  ;;  %2308 = vmax.xlane.f32.xlu0 %v2307_v15  ;;  %v7025_v29 = vmax.f32 %v7015_v6, %v2252_v24  ;;  %v2304_v39 = vsel %vm658_vm0, %v7017_v7, -inf }
 0x18c   : > { %8130 = vst [vmem:[#allocation17_spill] sm:$0xff] %v7022_v21  ;;  %4536 = vst.msk [vmem:[#allocation2 + $0x18] sm:$0xff] %vm593_vm2, %v7022_v21 }
 0x18d   : > { %8131 = vst [vmem:[#allocation18_spill] sm:$0xff] %v7025_v29  ;;  %4535 = vst.msk [vmem:[#allocation2 + $0x10] sm:$0xff] %vm593_vm2, %v7025_v29 }
 0x18e   : > { %v7029_v37 = vpop.f32.mrb[14].mxu1 }
 0x18f   : > { %8132 = vst [vmem:[#allocation19_spill] sm:$0xff] %v7029_v37  ;;  %2305 = vmax.xlane.f32.xlu0 %v2304_v39  ;;  %v7035_v42 = vpop.f32.mrb[15].mxu1  ;;  %v2313_v45 = vsel %vm658_vm0, %v7029_v37, -inf  ;;  %v7180_v37 = vld [vmem:[#allocation2 + $0x90] sm:$0xff] }
 0x190   : > { %2314 = vmax.xlane.f32.xlu1 %v2313_v45  ;;  %v2310_v9 = vsel %vm658_vm0, %v7035_v42, -inf  ;;  %v7057_v45 = vld [vmem:[#allocation2 + $0x38] sm:$0xff] }
 0x191   : > { %v2261_v52 = vpop.xlane.xlu0 %2260  ;;  %8139 = vst [vmem:[#allocation26_spill] sm:$0xff] %v7057_v45 }
 0x192   : > { %v7044_v59 = vmax.f32 %v7039_v51, %v2261_v52  ;;  %v7068_v51 = vld [vmem:[#allocation2 + $0x30] sm:$0xff] }
 0x193   : > { %8143 = vst [vmem:[#allocation30_spill] sm:$0xff] %v7068_v51 }
 0x194   : > { %8134 = vst [vmem:[#allocation21_spill] sm:$0xff] %v7044_v59  ;;  %2311 = vmax.xlane.f32.xlu1 %v2310_v9  ;;  %4538 = vst.msk [vmem:[#allocation2 + $0x28] sm:$0xff] %vm593_vm2, %v7044_v59 }
 0x195   : > { %v7048_v15 = vpop.f32.mrb[8].mxu0  ;;  %v2258_v24 = vpop.xlane.xlu0 %2257 }
 0x196   : > { %8136 = vst [vmem:[#allocation23_spill] sm:$0xff] %v7048_v15  ;;  %v7052_v20 = vpop.f32.mrb[9].mxu0  ;;  %v7055_v39 = vmax.f32 %v7046_v2, %v2258_v24 }
 0x197   : > { %8137 = vst [vmem:[#allocation24_spill] sm:$0xff] %v7052_v20 }
 0x198   : > { %8138 = vst [vmem:[#allocation25_spill] sm:$0xff] %v7055_v39  ;;  %4537 = vst.msk [vmem:[#allocation2 + $0x20] sm:$0xff] %vm593_vm2, %v7055_v39 }
 0x199   : > { %v2267_v9 = vpop.xlane.xlu1 %2266 }
 0x19a   : > { %v7061_v52 = vpop.f32.mrb[16].mxu1  ;;  %v7066_v62 = vmax.f32 %v7057_v45, %v2267_v9  ;;  %v6005_v45 = vpack.c.bf16 %v6625_v28, %v6623_v27  ;;  %v2316_v27 = vsel %vm658_vm0, %v7052_v20, -inf  ;;  %v6009_v28 = vpack.c.bf16 %v6635_v32, %v6633_v31 }
 0x19b   : > { %8140 = vst [vmem:[#allocation27_spill] sm:$0xff] %v7061_v52  ;;  %v7063_v0 = vpop.f32.mrb[17].mxu1  ;;  %v2325_v47 = vsel %vm658_vm0, %v7061_v52, -inf  ;;  %v2227_v52 = vld [vmem:[#allocation2 + $0x78] sm:$0xff] }
 0x19c   : > { %8141 = vst [vmem:[#allocation28_spill] sm:$0xff] %v7063_v0  ;;  %8142 = vst [vmem:[#allocation29_spill] sm:$0xff] %v7066_v62  ;;  %6006 = vmatprep.subr.bf16.mxu0 %v6005_v45  ;;  %6010 = vmatprep.subr.bf16.mxu1 %v6009_v28 }
 0x19d   : > { %4540 = vst.msk [vmem:[#allocation2 + $0x38] sm:$0xff] %vm593_vm2, %v7066_v62  ;;  %v2264_v2 = vpop.xlane.xlu1 %2263  ;;  %6008 = vmatpush3.bf16.msra.mxu0 %v6005_v45  ;;  %6012 = vmatpush3.bf16.msra.mxu1 %v6009_v28  ;;  %v7130_v28 = vld [vmem:[#allocation2 + $0x68] sm:$0xff] }
 0x19e   : > { %v7072_v24 = vpop.f32.mrb[10].mxu0  ;;  %v7075_v6 = vmax.f32 %v7068_v51, %v2264_v2  ;;  %v7091_v2 = vpack.c.bf16 %v6621_v26, %v6619_v25  ;;  %v2319_v51 = vsel %vm658_vm0, %v7048_v15, -inf }
 0x19f   : > { %8144 = vst [vmem:[#allocation31_spill] sm:$0xff] %v7072_v24  ;;  %v7077_v4 = vpop.f32.mrb[11].mxu0  ;;  %v2331_v25 = vsel %vm658_vm0, %v7072_v24, -inf }
 0x1a0   : > { %8145 = vst [vmem:[#allocation32_spill] sm:$0xff] %v7075_v6  ;;  %8146 = vst [vmem:[#allocation33_spill] sm:$0xff] %v7077_v4  ;;  %6014 = vmatprep.subr.bf16.mxu0 %v7091_v2 }
 0x1a1   : > { %4539 = vst.msk [vmem:[#allocation2 + $0x30] sm:$0xff] %vm593_vm2, %v7075_v6 }
 0x1a2   : > { %v7081_v49 = vpop.f32.mrb[18].mxu1 }
 0x1a3   : > { %8147 = vst [vmem:[#allocation34_spill] sm:$0xff] %v7081_v49  ;;  %v7083_v9 = vpop.f32.mrb[19].mxu1  ;;  %v2337_v26 = vsel %vm658_vm0, %v7081_v49, -inf }
 0x1a4   : > { %8148 = vst [vmem:[#allocation35_spill] sm:$0xff] %v7083_v9  ;;  %v2334_v20 = vsel %vm658_vm0, %v7083_v9, -inf }
 0x1a5   : > { %2475 = vperm.xlu0 %6238, %v6996_v56   ;;  %2470 = vperm.xlu1 %6239, %v6999_v60   ;;  %v2322_v60 = vsel %vm658_vm0, %v7063_v0, -inf  ;;  %v2224_v0 = vld [vmem:[#allocation2 + $0x60] sm:$0xff] }
 0x1c4   : > { %2320 = vmax.xlane.f32.xlu0 %v2319_v51 }
 0x1c8   : > { %2326 = vmax.xlane.f32.xlu0 %v2325_v47  ;;  %v7112_v47 = vpack.c.bf16 %v6643_v35, %v6641_v34 }
 0x1c9   : > { %2323 = vmax.xlane.f32.xlu1 %v2322_v60  ;;  %v2221_v60 = vld [vmem:[#allocation2 + $0x48] sm:$0xff] }
 0x1ca   : > { %6018 = vmatprep.subr.bf16.mxu1 %v7112_v47 }
 0x1cc   : > { %2317 = vmax.xlane.f32.xlu0 %v2316_v27  ;;  %v7117_v27 = vld [vmem:[#allocation2 + $0x40] sm:$0xff] }
 0x1d0   : > { %2332 = vmax.xlane.f32.xlu0 %v2331_v25  ;;  %v7119_v25 = vld [vmem:[#allocation2 + $0x58] sm:$0xff] }
 0x1d4   : > { %2338 = vmax.xlane.f32.xlu0 %v2337_v26 }
 0x1da   : > { %2485 = vperm.xlu1 %6239, %v7022_v21  }
 0x1de   : > { %2480 = vperm.xlu1 %6239, %v7025_v29  }
 0x1f8   : > { %v2273_v51 = vpop.xlane.xlu0 %2272 }
 0x1f9   : > { %v7115_v45 = vmax.f32 %v2221_v60, %v2273_v51  ;;  %v2222_v51 = vld [vmem:[#allocation2 + $0x50] sm:$0xff] }
 0x1fb   : > { %4542 = vst.msk [vmem:[#allocation2 + $0x48] sm:$0xff] %vm593_vm2, %v7115_v45  ;;  %v2381_v26 = vsub.f32 %v2221_v60, %v7115_v45  ;;  %v2328_v60 = vsel %vm658_vm0, %v7077_v4, -inf }
 0x1fc   : > { %v2270_v31 = vpop.xlane.xlu0 %2269  ;;  %v2279_v32 = vpop.xlane.xlu1 %2278 }
 0x1fd   : > { %v7125_v34 = vmax.f32 %v7117_v27, %v2270_v31  ;;  %v7128_v35 = vmax.f32 %v7119_v25, %v2279_v32  ;;  %v2422_v24 = vmul.f32 1.442695, %v2381_v26 }
 0x1ff   : > { %4541 = vst.msk [vmem:[#allocation2 + $0x40] sm:$0xff] %vm593_vm2, %v7125_v34  ;;  %4544 = vst.msk [vmem:[#allocation2 + $0x58] sm:$0xff] %vm593_vm2, %v7128_v35  ;;  %2525 = vperm.xlu0 %6238, %v7128_v35   ;;  %6240 = vpow2.f32 %v2422_v24  ;;  %v7158_v24 = vld [vmem:[#allocation2 + $0x80] sm:$0xff] }
 0x200   : > { %v2285_v49 = vpop.xlane.xlu0 %2284  ;;  %v2276_v31 = vpop.xlane.xlu1 %2275 }
 0x201   : > { %v7140_v32 = vmax.f32 %v7130_v28, %v2285_v49  ;;  %v2350_v29 = vmax.f32 %v2222_v51, %v2276_v31 }
 0x202   : > { %2329 = vmax.xlane.f32.xlu1 %v2328_v60  ;;  %v2226_v60 = vld [vmem:[#allocation2 + $0x70] sm:$0xff] }
 0x203   : > { %4546 = vst.msk [vmem:[#allocation2 + $0x68] sm:$0xff] %vm593_vm2, %v7140_v32  ;;  %4543 = vst.msk [vmem:[#allocation2 + $0x50] sm:$0xff] %vm593_vm2, %v2350_v29  ;;  %2520 = vperm.xlu0 %6238, %v2350_v29   ;;  %v2382_v15 = vsub.f32 %v2222_v51, %v2350_v29 }
 0x204   : > { %v2282_v4 = vpop.xlane.xlu0 %2281 }
 0x205   : > { %v7147_v26 = vmax.f32 %v2224_v0, %v2282_v4  ;;  %v2291_v49 = vpop.xlane.xlu1 %2290  ;;  %v2424_v31 = vmul.f32 1.442695, %v2382_v15  ;;  %v7190_v15 = vld [vmem:[#allocation2 + $0xa8] sm:$0xff] }
 0x206   : > { %v2355_v21 = vmax.f32 %v2227_v52, %v2291_v49  ;;  %2335 = vmax.xlane.f32.xlu1 %v2334_v20 }
 0x207   : > { %4545 = vst.msk [vmem:[#allocation2 + $0x60] sm:$0xff] %vm593_vm2, %v7147_v26  ;;  %6242 = vpow2.f32 %v2424_v31 }
 0x208   : > { %4548 = vst.msk [vmem:[#allocation2 + $0x78] sm:$0xff] %vm593_vm2, %v2355_v21  ;;  %2545 = vperm.xlu0 %6238, %v2355_v21   ;;  %v2387_v4 = vsub.f32 %v2227_v52, %v2355_v21  ;;  %v2384_v21 = vsub.f32 %v2224_v0, %v7147_v26 }
 0x209   : > { %v2288_v46 = vpop.xlane.xlu1 %2287  ;;  %v7160_v51 = vpop.eup %6240 }
 0x20a   : > { %v2354_v7 = vmax.f32 %v2226_v60, %v2288_v46  ;;  %8149 = vst [vmem:[#allocation36_spill] sm:$0xff] %v7160_v51  ;;  %v7166_v46 = vld [vmem:[#allocation2 + $0x98] sm:$0xff]  ;;  %v2434_v52 = vmul.f32 1.442695, %v2387_v4  ;;  %v2428_v0 = vmul.f32 1.442695, %v2384_v21 }
 0x20b   : > { %v7203_v21 = vld [vmem:[#allocation2 + $0xa0] sm:$0xff] }
 0x20c   : > { %4547 = vst.msk [vmem:[#allocation2 + $0x70] sm:$0xff] %vm593_vm2, %v2354_v7  ;;  %v2297_v29 = vpop.xlane.xlu0 %2296  ;;  %2540 = vperm.xlu0 %6238, %v2354_v7   ;;  %6244 = vpow2.f32 %v2434_v52  ;;  %v2386_v4 = vsub.f32 %v2226_v60, %v2354_v7 }
 0x20d   : > { %v7156_v20 = vmax.f32 %v7152_v5, %v2297_v29  ;;  %6246 = vpow2.f32 %v2428_v0 }
 0x20e   : > { %v2432_v7 = vmul.f32 1.442695, %v2386_v4 }
 0x20f   : > { %4550 = vst.msk [vmem:[#allocation2 + $0x88] sm:$0xff] %vm593_vm2, %v7156_v20 }
 0x210   : > { %v2294_v49 = vpop.xlane.xlu0 %2293  ;;  %3028 = vperm.xlu0 %6238, %v7160_v51   ;;  %6248 = vpow2.f32 %v2432_v7 }
 0x211   : > { %v7171_v31 = vmax.f32 %v7158_v24, %v2294_v49  ;;  %v2303_v29 = vpop.xlane.xlu1 %2302  ;;  %v7192_v41 = vpop.eup %6242 }
 0x212   : > { %v7174_v9 = vmax.f32 %v7166_v46, %v2303_v29  ;;  %8150 = vst [vmem:[#allocation37_spill] sm:$0xff] %v7192_v41 }
 0x213   : > { %4549 = vst.msk [vmem:[#allocation2 + $0x80] sm:$0xff] %vm593_vm2, %v7171_v31 }
 0x214   : > { %4552 = vst.msk [vmem:[#allocation2 + $0x98] sm:$0xff] %vm593_vm2, %v7174_v9  ;;  %2565 = vperm.xlu0 %6238, %v7174_v9  }
 0x215   : > { %v2300_v49 = vpop.xlane.xlu1 %2299 }
 0x216   : > { %v7188_v29 = vmax.f32 %v7180_v37, %v2300_v49  ;;  %v7210_v49 = vld [vmem:[#allocation2 + $0xb8] sm:$0xff] }
 0x217   : > { %2495 = vperm.xlu1 %6239, %v7044_v59   ;;  %v2380_v59 = vsub.f32 %v7117_v27, %v7125_v34 }
 0x218   : > { %4551 = vst.msk [vmem:[#allocation2 + $0x90] sm:$0xff] %vm593_vm2, %v7188_v29  ;;  %v2309_v56 = vpop.xlane.xlu0 %2308  ;;  %3033 = vperm.xlu0 %6238, %v7192_v41   ;;  %v7219_v41 = vpop.eup %6244 }
 0x219   : > { %v7201_v60 = vmax.f32 %v7190_v15, %v2309_v56  ;;  %8151 = vst [vmem:[#allocation38_spill] sm:$0xff] %v7219_v41  ;;  %v7236_v52 = vpop.eup %6246 }
 0x21a   : > { %8152 = vst [vmem:[#allocation39_spill] sm:$0xff] %v7236_v52  ;;  %v7248_v44 = vpop.eup %6248 }
 0x21b   : > { %4554 = vst.msk [vmem:[#allocation2 + $0xa8] sm:$0xff] %vm593_vm2, %v7201_v60  ;;  %2490 = vperm.xlu1 %6239, %v7055_v39   ;;  %v7226_v39 = vld [vmem:[#allocation2 + $0xb0] sm:$0xff]  ;;  %8153 = vst [vmem:[#allocation40_spill] sm:$0xff] %v7248_v44 }
 0x21c   : > { %v2306_v51 = vpop.xlane.xlu0 %2305  ;;  %2560 = vperm.xlu0 %6238, %v7188_v29  }
 0x21d   : > { %v7214_v0 = vmax.f32 %v7203_v21, %v2306_v51  ;;  %v2315_v56 = vpop.xlane.xlu1 %2314 }
 0x21e   : > { %v7217_v4 = vmax.f32 %v7210_v49, %v2315_v56 }
 0x21f   : > { %4553 = vst.msk [vmem:[#allocation2 + $0xa0] sm:$0xff] %vm593_vm2, %v7214_v0  ;;  %2505 = vperm.xlu1 %6239, %v7066_v62   ;;  %v2383_v62 = vsub.f32 %v7119_v25, %v7128_v35 }
 0x220   : > { %4556 = vst.msk [vmem:[#allocation2 + $0xb8] sm:$0xff] %vm593_vm2, %v7217_v4  ;;  %3058 = vperm.xlu0 %6238, %v7219_v41  }
 0x221   : > { %v2312_v7 = vpop.xlane.xlu1 %2311  ;;  %v2426_v25 = vmul.f32 1.442695, %v2383_v62  ;;  %v2385_v62 = vsub.f32 %v7130_v28, %v7140_v32  ;;  %v7285_v28 = vld [vmem:[#allocation2 + $0xc8] sm:$0xff] }
 0x222   : > { %v7234_v56 = vmax.f32 %v7226_v39, %v2312_v7 }
 0x223   : > { %2500 = vperm.xlu1 %6239, %v7075_v6  }
 0x224   : > { %4555 = vst.msk [vmem:[#allocation2 + $0xb0] sm:$0xff] %vm593_vm2, %v7234_v56  ;;  %v2476_v51 = vpop.permute.xlu0 %2475  ;;  %3043 = vperm.xlu0 %6238, %v7236_v52  }
 0x225   : > { %v2629_v41 = vsub.f32 %v6729_v54, %v2476_v51  ;;  %v2471_v7 = vpop.permute.xlu1 %2470  ;;  %v2420_v54 = vmul.f32 1.442695, %v2380_v59  ;;  %v7291_v51 = vld [vmem:[#allocation2 + $0xd8] sm:$0xff] }
 0x226   : > { %v2628_v48 = vsub.f32 %v6731_v55, %v2471_v7  ;;  %v6182_v55 = vunpack.i.h.bf16 %v6923_v10 }
 0x227   : > { %v2662_v6 = vmul.f32 1.442695, %v2629_v41  ;;  %2515 = vperm.xlu1 %6239, %v7115_v45   ;;  %v6181_v41 = vunpack.i.l.bf16 %v6923_v10  ;;  %v2430_v10 = vmul.f32 1.442695, %v2385_v62  ;;  %v7305_v62 = vld [vmem:[#allocation2 + $0xc0] sm:$0xff] }
 0x228   : > { %v2660_v35 = vmul.f32 1.442695, %v2628_v48  ;;  %3053 = vperm.xlu0 %6238, %v7248_v44   ;;  %v7321_v44 = vld [vmem:[#allocation2 + $0xe8] sm:$0xff] }
 0x229   : > { %v7269_v59 = vpack.c.bf16 %v6182_v55, %v6181_v41 }
 0x22a   : > { %6250 = vpow2.f32 %v2660_v35 }
 0x22b   : > { %6252 = vpow2.f32 %v2662_v6  ;;  %2510 = vperm.xlu1 %6239, %v7125_v34  }
 0x22c   : > { %6254 = vpow2.f32 %v2426_v25  ;;  %2580 = vperm.xlu0 %6238, %v7234_v56   ;;  %v7297_v25 = vld [vmem:[#allocation2 + $0xd0] sm:$0xff] }
 0x22d   : > { %6256 = vpow2.f32 %v2420_v54 }
 0x22e   : > { %6258 = vpow2.f32 %v2430_v10 }
 0x22f   : > { %2535 = vperm.xlu1 %6239, %v7140_v32  }
 0x233   : > { %2530 = vperm.xlu1 %6239, %v7147_v26  }
 0x234   : > { %v7260_v48 = vpop.eup %6250 }
 0x235   : > { %v6253_v6 = vpop.eup %6252  ;;  %5773 = vmatprep.mubr.msk.f32.mxu0 %vm658_vm0, %v7260_v48 }
 0x236   : > { %v7266_v45 = vpop.eup %6254  ;;  %5774 = vmatmul.mubr.msk.f32.vlgmr.msra.gmra.mrb[12].mxu0 %vm658_vm0, %v6253_v6 }
 0x237   : > { %8154 = vst [vmem:[#allocation41_spill] sm:$0xff] %v7266_v45  ;;  %6016 = vmatpush3.bf16.msra.mxu0 %v7091_v2  ;;  %3038 = vperm.xlu1 %6239, %v7266_v45   ;;  %v7275_v27 = vpop.eup %6256  ;;  %v2791_v2 = vsel %vm658_vm0, %v6253_v6, 0.0 }
 0x238   : > { %6022 = vmatprep.subr.bf16.mxu0 %v7269_v59  ;;  %8155 = vst [vmem:[#allocation42_spill] sm:$0xff] %v7275_v27  ;;  %v7279_v34 = vpop.eup %6258 }
 0x239   : > { %8156 = vst [vmem:[#allocation43_spill] sm:$0xff] %v7279_v34 }
 0x23b   : > { %2555 = vperm.xlu1 %6239, %v7156_v20  }
 0x23f   : > { %3023 = vperm.xlu1 %6239, %v7275_v27  }
 0x243   : > { %2550 = vperm.xlu1 %6239, %v7171_v31  }
 0x247   : > { %3048 = vperm.xlu1 %6239, %v7279_v34  }
 0x24b   : > { %2792 = vadd.xlane.f32.xlu0 %v2791_v2  ;;  %2575 = vperm.xlu1 %6239, %v7201_v60  }
 0x24f   : > { %2585 = vperm.xlu1 %6239, %v7217_v4  }
 0x251   : > { %v2321_v32 = vpop.xlane.xlu0 %2320 }
 0x252   : > { %v7288_v26 = vmax.f32 %v7285_v28, %v2321_v32  ;;  %v8157_v32 = vsub.f32 %v7180_v37, %v7188_v29 }
 0x253   : > { %2570 = vperm.xlu1 %6239, %v7214_v0  }
 0x254   : > { %4558 = vst.msk [vmem:[#allocation2 + $0xc8] sm:$0xff] %vm593_vm2, %v7288_v26 }
 0x255   : > { %v2327_v35 = vpop.xlane.xlu0 %2326 }
 0x256   : > { %v7300_v54 = vmax.f32 %v7291_v51, %v2327_v35  ;;  %v2324_v55 = vpop.xlane.xlu1 %2323  ;;  %v2440_v35 = vmul.f32 1.442695, %v8157_v32 }
 0x257   : > { %v7303_v41 = vmax.f32 %v7297_v25, %v2324_v55 }
 0x258   : > { %4560 = vst.msk [vmem:[#allocation2 + $0xd8] sm:$0xff] %vm593_vm2, %v7300_v54  ;;  %6260 = vpow2.f32 %v2440_v35 }
 0x259   : > { %4559 = vst.msk [vmem:[#allocation2 + $0xd0] sm:$0xff] %vm593_vm2, %v7303_v41  ;;  %v2318_v2 = vpop.xlane.xlu0 %2317 }
 0x25a   : > { %v7319_v55 = vmax.f32 %v7305_v62, %v2318_v2  ;;  %v2486_v7 = vpop.permute.xlu1 %2485  ;;  %v7332_v2 = vld [vmem:[#allocation2 + $0xf8] sm:$0xff] }
 0x25b   : > { %v2631_v10 = vsub.f32 %v6737_v57, %v2486_v7  ;;  %8158 = vst [vmem:[#allocation44_spill] sm:$0xff] %v7332_v2 }
 0x25c   : > { %4557 = vst.msk [vmem:[#allocation2 + $0xc0] sm:$0xff] %vm593_vm2, %v7319_v55 }
 0x25d   : > { %v2333_v52 = vpop.xlane.xlu0 %2332  ;;  %v2666_v32 = vmul.f32 1.442695, %v2631_v10 }
 0x25e   : > { %v2481_v34 = vpop.permute.xlu1 %2480  ;;  %v7329_v37 = vmax.f32 %v7321_v44, %v2333_v52  ;;  %v6187_v52 = vunpack.i.h.bf16 %v6927_v12 }
 0x25f   : > { %v2630_v29 = vsub.f32 %v6739_v58, %v2481_v34  ;;  %v6186_v34 = vunpack.i.l.bf16 %v6927_v12  ;;  %v8160_v12 = vsub.f32 %v7152_v5, %v7156_v20 }
 0x260   : > { %4562 = vst.msk [vmem:[#allocation2 + $0xe8] sm:$0xff] %vm593_vm2, %v7329_v37 }
 0x261   : > { %v2664_v6 = vmul.f32 1.442695, %v2630_v29  ;;  %2595 = vperm.xlu0 %6238, %v7288_v26   ;;  %v2339_v27 = vpop.xlane.xlu0 %2338  ;;  %v2438_v35 = vmul.f32 1.442695, %v8160_v12  ;;  %v8161_v29 = vsub.f32 %v7166_v46, %v7174_v9  ;;  %v7379_v46 = vld [vmem:[#allocation2 + $0xe0] sm:$0xff] }
 0x262   : > { %v7338_v57 = vmax.f32 %v7332_v2, %v2339_v27  ;;  %v7343_v58 = vpop.eup %6260  ;;  %v7353_v27 = vpack.c.bf16 %v6187_v52, %v6186_v34 }
 0x263   : > { %6262 = vpow2.f32 %v2664_v6  ;;  %8159 = vst [vmem:[#allocation45_spill] sm:$0xff] %v7343_v58  ;;  %v2788_v6 = vsel %vm658_vm0, %v7260_v48, 0.0 }
 0x264   : > { %6264 = vpow2.f32 %v2666_v32  ;;  %4564 = vst.msk [vmem:[#allocation2 + $0xf8] sm:$0xff] %vm593_vm2, %v7338_v57  ;;  %v2442_v32 = vmul.f32 1.442695, %v8161_v29 }
 0x265   : > { %2605 = vperm.xlu0 %6238, %v7300_v54   ;;  %6266 = vpow2.f32 %v2438_v35 }
 0x266   : > { %6268 = vpow2.f32 %v2442_v32  ;;  %v7392_v32 = vld [vmem:[#allocation2 + $0xf0] sm:$0xff] }
 0x269   : > { %3073 = vperm.xlu0 %6238, %v7343_v58  }
 0x26d   : > { %v7348_v7 = vpop.eup %6262 }
 0x26e   : > { %v6265_v10 = vpop.eup %6264  ;;  %5780 = vmatprep.mubr.msk.f32.mxu1 %vm658_vm0, %v7348_v7 }
 0x26f   : > { %5781 = vmatmul.mubr.msk.f32.vlgmr.msra.gmra.mrb[20].mxu1 %vm658_vm0, %v6265_v10  ;;  %v7370_v48 = vpop.eup %6266  ;;  %v2797_v5 = vsel %vm658_vm0, %v6265_v10, 0.0 }
 0x270   : > { %6020 = vmatpush3.bf16.msra.mxu1 %v7112_v47  ;;  %v8162_v47 = vsub.f32 %v7158_v24, %v7171_v31  ;;  %8163 = vst [vmem:[#allocation46_spill] sm:$0xff] %v7370_v48  ;;  %v7376_v9 = vpop.eup %6268  ;;  %v8166_v31 = vsub.f32 %v7210_v49, %v7217_v4 }
 0x271   : > { %6026 = vmatprep.subr.bf16.mxu1 %v7353_v27  ;;  %8164 = vst [vmem:[#allocation47_spill] sm:$0xff] %v7376_v9 }
 0x272   : > { %v2436_v52 = vmul.f32 1.442695, %v8162_v47  ;;  %v2450_v12 = vmul.f32 1.442695, %v8166_v31 }
 0x274   : > { %6270 = vpow2.f32 %v2436_v52 }
 0x275   : > { %6272 = vpow2.f32 %v2450_v12  ;;  %v8169_v12 = vsub.f32 %v7203_v21, %v7214_v0 }
 0x277   : > { %2789 = vadd.xlane.f32.xlu1 %v2788_v6 }
 0x27e   : > { %v7365_v58 = vpop.permute.xlu0 %2525  ;;  %v7381_v24 = vpop.eup %6270 }
 0x27f   : > { %8165 = vst [vmem:[#allocation48_spill] sm:$0xff] %v7381_v24 }
 0x282   : > { %v2521_v34 = vpop.permute.xlu0 %2520 }
 0x283   : > { %v2638_v21 = vsub.f32 %v6941_v19, %v2521_v34 }
 0x287   : > { %v7372_v6 = vpop.permute.xlu0 %2545 }
 0x288   : > { %2798 = vadd.xlane.f32.xlu0 %v2797_v5  ;;  %3068 = vperm.xlu1 %6239, %v7370_v48   ;;  %v7412_v48 = vpop.eup %6272 }
 0x28b   : > { %v2541_v20 = vpop.permute.xlu0 %2540 }
 0x28c   : > { %3078 = vperm.xlu1 %6239, %v7376_v9  }
 0x28f   : > { %v2330_v35 = vpop.xlane.xlu1 %2329  ;;  %v7386_v29 = vpop.permute.xlu0 %3028 }
 0x290   : > { %8167 = vst [vmem:[#allocation49_spill] sm:$0xff] %v7386_v29  ;;  %v7389_v10 = vmax.f32 %v7379_v46, %v2330_v35  ;;  %3063 = vperm.xlu1 %6239, %v7381_v24   ;;  %v2444_v35 = vmul.f32 1.442695, %v8169_v12  ;;  %v2680_v12 = vmul.f32 1.442695, %v2638_v21 }
 0x292   : > { %4561 = vst.msk [vmem:[#allocation2 + $0xe0] sm:$0xff] %vm593_vm2, %v7389_v10  ;;  %6274 = vpow2.f32 %v2444_v35  ;;  %v2642_v35 = vsub.f32 %v6963_v38, %v2541_v20 }
 0x293   : > { %v7396_v47 = vpop.permute.xlu0 %2565  ;;  %v2336_v52 = vpop.xlane.xlu1 %2335 }
 0x294   : > { %v7399_v49 = vmax.f32 %v7392_v32, %v2336_v52  ;;  %2590 = vperm.xlu1 %6239, %v7319_v55   ;;  %v2688_v38 = vmul.f32 1.442695, %v2642_v35 }
 0x296   : > { %4563 = vst.msk [vmem:[#allocation2 + $0xf0] sm:$0xff] %vm593_vm2, %v7399_v49 }
 0x297   : > { %v7404_v4 = vpop.permute.xlu0 %3033  ;;  %v2496_v5 = vpop.permute.xlu1 %2495 }
 0x298   : > { %8168 = vst [vmem:[#allocation50_spill] sm:$0xff] %v7404_v4  ;;  %2600 = vperm.xlu1 %6239, %v7303_v41   ;;  %v2633_v31 = vsub.f32 %v6745_v61, %v2496_v5  ;;  %v2639_v5 = vsub.f32 %v6939_v18, %v7365_v58  ;;  %v6191_v18 = vunpack.i.l.bf16 %v6921_v8 }
 0x29a   : > { %v2670_v45 = vmul.f32 1.442695, %v2633_v31  ;;  %v2682_v58 = vmul.f32 1.442695, %v2639_v5 }
 0x29b   : > { %v2561_v24 = vpop.permute.xlu0 %2560  ;;  %v2491_v9 = vpop.permute.xlu1 %2490 }
 0x29c   : > { %v2632_v52 = vsub.f32 %v6749_v63, %v2491_v9 }
 0x29e   : > { %v2668_v29 = vmul.f32 1.442695, %v2632_v52  ;;  %3098 = vperm.xlu0 %6238, %v7412_v48  }
 0x29f   : > { %v7415_v4 = vpop.permute.xlu0 %3058  ;;  %v2506_v2 = vpop.permute.xlu1 %2505 }
 0x2a0   : > { %6276 = vpow2.f32 %v2668_v29  ;;  %v2635_v61 = vsub.f32 %v6753_v1, %v2506_v2  ;;  %v7431_v2 = vpop.eup %6274 }
 0x2a1   : > { %6278 = vpow2.f32 %v2670_v45  ;;  %v2643_v45 = vsub.f32 %v6959_v36, %v7372_v6  ;;  %v2646_v6 = vsub.f32 %v6991_v53, %v2561_v24 }
 0x2a2   : > { %2615 = vperm.xlu0 %6238, %v7329_v37   ;;  %v2674_v31 = vmul.f32 1.442695, %v2635_v61 }
 0x2a3   : > { %v7420_v0 = vpop.permute.xlu0 %3043  ;;  %v2501_v63 = vpop.permute.xlu1 %2500  ;;  %v2690_v36 = vmul.f32 1.442695, %v2643_v45 }
 0x2a4   : > { %v2634_v9 = vsub.f32 %v6757_v3, %v2501_v63  ;;  %v6192_v3 = vunpack.i.h.bf16 %v6921_v8  ;;  %v2647_v63 = vsub.f32 %v6987_v50, %v7396_v47 }
 0x2a6   : > { %v2672_v29 = vmul.f32 1.442695, %v2634_v9  ;;  %2625 = vperm.xlu0 %6238, %v7338_v57   ;;  %v2698_v50 = vmul.f32 1.442695, %v2647_v63 }
 0x2a7   : > { %v7427_v1 = vpop.permute.xlu0 %3053  ;;  %v2516_v19 = vpop.permute.xlu1 %2515 }
 0x2a8   : > { %6280 = vpow2.f32 %v2672_v29  ;;  %v2637_v34 = vsub.f32 %v6929_v13, %v2516_v19  ;;  %v7447_v13 = vpack.c.bf16 %v6192_v3, %v6191_v18 }
 0x2a9   : > { %6282 = vpow2.f32 %v2674_v31  ;;  %v6196_v31 = vunpack.i.l.bf16 %v6937_v17 }
 0x2aa   : > { %6284 = vpow2.f32 %v2680_v12  ;;  %3083 = vperm.xlu0 %6238, %v7431_v2   ;;  %v7437_v20 = vpop.eup %6276  ;;  %v2678_v9 = vmul.f32 1.442695, %v2637_v34  ;;  %v2696_v12 = vmul.f32 1.442695, %v2646_v6  ;;  %v6217_v6 = vunpack.i.h.bf16 %v6955_v30 }
 0x2ab   : > { %v2511_v52 = vpop.permute.xlu1 %2510  ;;  %v7439_v61 = vpop.eup %6278  ;;  %5787 = vmatprep.mubr.msk.f32.mxu0 %vm658_vm0, %v7437_v20  ;;  %6286 = vpow2.f32 %v2682_v58 }
 0x2ac   : > { %v2581_v21 = vpop.permute.xlu0 %2580  ;;  %v2636_v8 = vsub.f32 %v6931_v14, %v2511_v52  ;;  %5788 = vmatmul.mubr.msk.f32.vlgmr.msra.gmra.mrb[14].mxu0 %vm658_vm0, %v7439_v61  ;;  %6288 = vpow2.f32 %v2688_v38  ;;  %v6197_v14 = vunpack.i.h.bf16 %v6937_v17  ;;  %v6206_v17 = vunpack.i.l.bf16 %v6957_v33 }
 0x2ad   : > { %6024 = vmatpush3.bf16.msra.mxu0 %v7269_v59  ;;  %v2650_v53 = vsub.f32 %v7035_v42, %v2581_v21  ;;  %6290 = vpow2.f32 %v2690_v36  ;;  %v6207_v42 = vunpack.i.h.bf16 %v6957_v33  ;;  %v6201_v52 = vunpack.i.l.bf16 %v6925_v11 }
 0x2ae   : > { %v2676_v5 = vmul.f32 1.442695, %v2636_v8  ;;  %6030 = vmatprep.subr.bf16.mxu0 %v7447_v13  ;;  %v6033_v3 = vpack.c.bf16 %v6197_v14, %v6196_v31  ;;  %v6216_v21 = vunpack.i.l.bf16 %v6955_v30 }
 0x2af   : > { %v2536_v24 = vpop.permute.xlu1 %2535  ;;  %v2704_v59 = vmul.f32 1.442695, %v2650_v53  ;;  %v6226_v53 = vunpack.i.l.bf16 %v6967_v40 }
 0x2b0   : > { %6292 = vpow2.f32 %v2676_v5  ;;  %v2641_v35 = vsub.f32 %v6947_v22, %v2536_v24  ;;  %v6049_v31 = vpack.c.bf16 %v6217_v6, %v6216_v21  ;;  %v2803_v6 = vsel %vm658_vm0, %v7439_v61, 0.0  ;;  %v8178_v61 = vld [vmem:[#allocation19_spill] sm:$0xff] }
 0x2b1   : > { %6294 = vpow2.f32 %v2678_v9  ;;  %v2794_v9 = vsel %vm658_vm0, %v7348_v7, 0.0  ;;  %v8170_v7 = vsub.f32 %v7190_v15, %v7201_v60 }
 0x2b2   : > { %v7457_v29 = vpop.eup %6280  ;;  %6296 = vpow2.f32 %v2696_v12  ;;  %v2686_v18 = vmul.f32 1.442695, %v2641_v35  ;;  %v6212_v35 = vunpack.i.h.bf16 %v6935_v16 }
 0x2b3   : > { %v7459_v47 = vpop.eup %6282  ;;  %5794 = vmatprep.mubr.msk.f32.mxu1 %vm658_vm0, %v7457_v29  ;;  %v2531_v19 = vpop.permute.xlu1 %2530  ;;  %6298 = vpow2.f32 %v2698_v50  ;;  %v2446_v14 = vmul.f32 1.442695, %v8170_v7  ;;  %v6211_v50 = vunpack.i.l.bf16 %v6935_v16  ;;  %v8177_v7 = vld [vmem:[#allocation5_spill] sm:$0xff] }
 0x2b4   : > { %v7464_v45 = vpop.eup %6284  ;;  %v2640_v22 = vsub.f32 %v6949_v23, %v2531_v19  ;;  %5795 = vmatmul.mubr.msk.f32.vlgmr.msra.gmra.mrb[22].mxu1 %vm658_vm0, %v7459_v47  ;;  %6300 = vpow2.f32 %v2704_v59  ;;  %v6041_v23 = vpack.c.bf16 %v6207_v42, %v6206_v17  ;;  %v8171_v59 = vsub.f32 %v7226_v39, %v7234_v56  ;;  %v8172_v17 = vld [vmem:[#allocation6_spill] sm:$0xff]  ;;  %v8173_v56 = vld [vmem:[#allocation9_spill] sm:$0xff] }
 0x2b5   : > { %6028 = vmatpush3.bf16.msra.mxu1 %v7353_v27  ;;  %5808 = vmatprep.mubr.msk.f32.mxu1 %vm658_vm0, %v7464_v45  ;;  %v7473_v38 = vpop.eup %6286  ;;  %v6202_v27 = vunpack.i.h.bf16 %v6925_v11  ;;  %v6227_v11 = vunpack.i.h.bf16 %v6967_v40 }
 0x2b6   : > { %v2684_v58 = vmul.f32 1.442695, %v2640_v22  ;;  %6034 = vmatprep.subr.bf16.mxu1 %v6033_v3  ;;  %v7477_v34 = vpop.eup %6288  ;;  %v2448_v19 = vmul.f32 1.442695, %v8171_v59 }
 0x2b7   : > { %v7475_v33 = vpop.permute.xlu1 %3038  ;;  %v7485_v36 = vpop.eup %6290  ;;  %v6037_v30 = vpack.c.bf16 %v6202_v27, %v6201_v52  ;;  %v7522_v60 = vpack.c.bf16 %v6227_v11, %v6226_v53 }
 0x2b8   : > { %6302 = vpow2.f32 %v2684_v58  ;;  %5809 = vmatmul.mubr.msk.f32.vlgmr.msra.gmra.mrb[24].mxu1 %vm658_vm0, %v7473_v38 }
 0x2b9   : > { %6304 = vpow2.f32 %v2686_v18  ;;  %6036 = vmatpush3.bf16.msra.mxu1 %v6033_v3  ;;  %5822 = vmatprep.mubr.msk.f32.mxu1 %vm658_vm0, %v7477_v34  ;;  %v6045_v3 = vpack.c.bf16 %v6212_v35, %v6211_v50  ;;  %v8174_v18 = vld [vmem:[#allocation11_spill] sm:$0xff]  ;;  %v8179_v50 = vld [vmem:[#allocation14_spill] sm:$0xff] }
 0x2ba   : > { %6042 = vmatprep.subr.bf16.mxu1 %v6041_v23  ;;  %v7489_v8 = vpop.eup %6292  ;;  %6306 = vpow2.f32 %v2446_v14  ;;  %v8175_v58 = vsub.f32 %v8173_v56, %v8174_v18  ;;  %v6222_v14 = vunpack.i.h.bf16 %v8177_v7 }
 0x2bb   : > { %v2556_v63 = vpop.permute.xlu1 %2555  ;;  %v7493_v5 = vpop.eup %6294  ;;  %5801 = vmatprep.mubr.msk.f32.mxu0 %vm658_vm0, %v7489_v8  ;;  %6308 = vpow2.f32 %v2448_v19 }
 0x2bc   : > { %2795 = vadd.xlane.f32.xlu1 %v2794_v9  ;;  %5802 = vmatmul.mubr.msk.f32.vlgmr.msra.gmra.mrb[16].mxu0 %vm658_vm0, %v7493_v5  ;;  %v7503_v24 = vpop.eup %6296  ;;  %v2645_v15 = vsub.f32 %v6973_v43, %v2556_v63  ;;  %v8176_v9 = vsub.f32 %v7305_v62, %v7319_v55  ;;  %v8180_v62 = vsub.f32 %v7297_v25, %v7303_v41 }
 0x2bd   : > { %5823 = vmatmul.mubr.msk.f32.vlgmr.msra.gmra.mrb[26].mxu1 %vm658_vm0, %v7485_v36  ;;  %6032 = vmatpush3.bf16.msra.mxu0 %v7447_v13  ;;  %v7513_v12 = vpop.eup %6298 }
 0x2be   : > { %6044 = vmatpush3.bf16.msra.mxu1 %v6041_v23  ;;  %6038 = vmatprep.subr.bf16.mxu0 %v6037_v30  ;;  %v7517_v42 = vpop.eup %6300  ;;  %v2694_v39 = vmul.f32 1.442695, %v2645_v15  ;;  %v2406_v23 = vmul.f32 1.442695, %v8175_v58  ;;  %v2452_v11 = vmul.f32 1.442695, %v8176_v9 }
 0x2bf   : > { %5836 = vmatprep.mubr.msk.f32.mxu1 %vm658_vm0, %v7503_v24  ;;  %v7511_v40 = vpop.permute.xlu1 %3023  ;;  %6050 = vmatprep.subr.bf16.mxu1 %v6049_v31  ;;  %v2456_v55 = vmul.f32 1.442695, %v8180_v62  ;;  %v2725_v58 = vld [vmem:[#allocation3 + $0x8] sm:$0xff]  ;;  %v8185_v62 = vld [vmem:[#allocation12_spill] sm:$0xff] }
 0x2c1   : > { %5837 = vmatmul.mubr.msk.f32.vlgmr.msra.gmra.mrb[28].mxu1 %vm658_vm0, %v7513_v12 }
 0x2c2   : > { %v7524_v13 = vpop.eup %6302  ;;  %6052 = vmatpush3.bf16.msra.mxu1 %v6049_v31  ;;  %5850 = vmatprep.mubr.msk.f32.mxu1 %vm658_vm0, %v7517_v42  ;;  %v6221_v31 = vunpack.i.l.bf16 %v8177_v7 }
 0x2c3   : > { %v7531_v16 = vpop.eup %6304  ;;  %6058 = vmatprep.subr.bf16.mxu1 %v7522_v60  ;;  %5815 = vmatprep.mubr.msk.f32.mxu0 %vm658_vm0, %v7524_v13  ;;  %v2551_v43 = vpop.permute.xlu1 %2550 }
 0x2c4   : > { %v2644_v22 = vsub.f32 %v8172_v17, %v2551_v43  ;;  %5816 = vmatmul.mubr.msk.f32.vlgmr.msra.gmra.mrb[18].mxu0 %vm658_vm0, %v7531_v16  ;;  %v7546_v63 = vpop.eup %6306  ;;  %v6053_v18 = vpack.c.bf16 %v6222_v14, %v6221_v31  ;;  %v8183_v14 = vld [vmem:[#allocation8_spill] sm:$0xff] }
 0x2c5   : > { %6040 = vmatpush3.bf16.msra.mxu0 %v6037_v30  ;;  %v7552_v30 = vpop.eup %6308  ;;  %v6232_v31 = vunpack.i.h.bf16 %v8183_v14 }
 0x2c6   : > { %v2692_v27 = vmul.f32 1.442695, %v2644_v22  ;;  %6046 = vmatprep.subr.bf16.mxu0 %v6045_v3 }
 0x2c7   : > { %v7542_v52 = vpop.permute.xlu1 %3048 }
 0x2c8   : > { %6310 = vpow2.f32 %v2692_v27 }
 0x2c9   : > { %6312 = vpow2.f32 %v2694_v39  ;;  %2804 = vadd.xlane.f32.xlu0 %v2803_v6  ;;  %v8181_v39 = vld [vmem:[#allocation16_spill] sm:$0xff] }
 0x2ca   : > { %6314 = vpow2.f32 %v2406_v23 }
 0x2cb   : > { %v2576_v21 = vpop.permute.xlu1 %2575  ;;  %6316 = vpow2.f32 %v2452_v11 }
 0x2cc   : > { %v2649_v15 = vsub.f32 %v8179_v50, %v2576_v21  ;;  %v8182_v21 = vld [vmem:[#allocation7_spill] sm:$0xff] }
 0x2cd   : > { %3088 = vperm.xlu1 %6239, %v7546_v63   ;;  %v6237_v9 = vunpack.i.h.bf16 %v8182_v21  ;;  %v6236_v11 = vunpack.i.l.bf16 %v8182_v21 }
 0x2ce   : > { %v2702_v23 = vmul.f32 1.442695, %v2649_v15 }
 0x2cf   : > { %v2586_v53 = vpop.permute.xlu1 %2585  ;;  %v7586_v7 = vpack.c.bf16 %v6237_v9, %v6236_v11 }
 0x2d0   : > { %v2651_v35 = vsub.f32 %v8178_v61, %v2586_v53  ;;  %v6231_v61 = vunpack.i.l.bf16 %v8183_v14 }
 0x2d1   : > { %3093 = vperm.xlu1 %6239, %v7552_v30  }
 0x2d2   : > { %v7559_v59 = vpop.eup %6310  ;;  %v2706_v19 = vmul.f32 1.442695, %v2651_v35 }
 0x2d3   : > { %v7561_v43 = vpop.eup %6312  ;;  %5829 = vmatprep.mubr.msk.f32.mxu0 %vm658_vm0, %v7559_v59  ;;  %v2571_v17 = vpop.permute.xlu1 %2570 }
 0x2d4   : > { %v7568_v22 = vpop.eup %6314  ;;  %6318 = vpow2.f32 %v2706_v19  ;;  %v2648_v56 = vsub.f32 %v8181_v39, %v2571_v17  ;;  %5830 = vmatmul.mubr.msk.f32.vlgmr.msra.gmra.mrb[20].mxu0 %vm658_vm0, %v7561_v43  ;;  %v7603_v19 = vpack.c.bf16 %v6232_v31, %v6231_v61  ;;  %v2800_v39 = vsel %vm658_vm0, %v7437_v20, 0.0 }
 0x2d5   : > { %6048 = vmatpush3.bf16.msra.mxu0 %v6045_v3  ;;  %2610 = vperm.xlu1 %6239, %v7389_v10   ;;  %6320 = vpow2.f32 %v2456_v55  ;;  %v2757_v41 = vmul.f32 %v7568_v22, %v2725_v58  ;;  %v7579_v3 = vpop.eup %6316  ;;  %v8188_v58 = vld [vmem:[#allocation13_spill] sm:$0xff]  ;;  %v8190_v20 = vsub.f32 %v7291_v51, %v7300_v54 }
 0x2d6   : > { %v2700_v25 = vmul.f32 1.442695, %v2648_v56  ;;  %6054 = vmatprep.subr.bf16.mxu0 %v6053_v18  ;;  %v8187_v56 = vld [vmem:[#allocation17_spill] sm:$0xff] }
 0x2d7   : > { %v2458_v9 = vmul.f32 1.442695, %v8190_v20 }
 0x2d8   : > { %6322 = vpow2.f32 %v2700_v25  ;;  %v2793_v27 = vpop.xlane.xlu0 %2792  ;;  %v8189_v25 = vsub.f32 %v7285_v28, %v7288_v26  ;;  %v2400_v28 = vsub.f32 %v7379_v46, %v7389_v10 }
 0x2d9   : > { %6324 = vpow2.f32 %v2702_v23  ;;  %v2885_v6 = vadd.f32 %v2793_v27, %v2757_v41  ;;  %2620 = vperm.xlu1 %6239, %v7399_v49   ;;  %v2375_v23 = vsub.f32 %v8188_v58, %v8187_v56  ;;  %v2727_v56 = vld [vmem:[#allocation3 + $0x18] sm:$0xff]  ;;  %v8192_v58 = vld [vmem:[#allocation23_spill] sm:$0xff] }
 0x2da   : > { %v2454_v41 = vmul.f32 1.442695, %v8189_v25  ;;  %v2460_v61 = vmul.f32 1.442695, %v2400_v28 }
 0x2db   : > { %2918 = vst.msk [vmem:[#allocation3 + $0x8] sm:$0xff] %vm593_vm2, %v2885_v6  ;;  %v2809_v6 = vsel %vm658_vm0, %v7459_v47, 0.0  ;;  %v2410_v21 = vmul.f32 1.442695, %v2375_v23 }
 0x2de   : > { %v7581_v53 = vpop.eup %6318 }
 0x2df   : > { %3103 = vperm.xlu0 %6238, %v7579_v3   ;;  %5851 = vmatmul.mubr.msk.f32.vlgmr.msra.gmra.mrb[30].mxu1 %vm658_vm0, %v7581_v53  ;;  %v7591_v35 = vpop.eup %6320 }
 0x2e0   : > { %6060 = vmatpush3.bf16.msra.mxu1 %v7522_v60  ;;  %v8184_v60 = vld [vmem:[#allocation10_spill] sm:$0xff]  ;;  %v2596_v26 = vpop.permute.xlu0 %2595 }
 0x2e1   : > { %6066 = vmatprep.subr.bf16.mxu1 %v7586_v7  ;;  %v8186_v55 = vsub.f32 %v8184_v60, %v8185_v62  ;;  %v2653_v23 = vsub.f32 %v8192_v58, %v2596_v26 }
 0x2e2   : > { %v7594_v50 = vpop.eup %6322 }
 0x2e3   : > { %v7596_v15 = vpop.eup %6324  ;;  %3113 = vperm.xlu0 %6238, %v7591_v35   ;;  %5843 = vmatprep.mubr.msk.f32.mxu0 %vm658_vm0, %v7594_v50  ;;  %v2404_v17 = vmul.f32 1.442695, %v8186_v55  ;;  %v2710_v20 = vmul.f32 1.442695, %v2653_v23 }
 0x2e4   : > { %5844 = vmatmul.mubr.msk.f32.vlgmr.msra.gmra.mrb[22].mxu0 %vm658_vm0, %v7596_v15  ;;  %v2606_v51 = vpop.permute.xlu0 %2605 }
 0x2e5   : > { %6056 = vmatpush3.bf16.msra.mxu0 %v6053_v18  ;;  %6326 = vpow2.f32 %v2404_v17  ;;  %v2724_v18 = vld [vmem:[#allocation3] sm:$0xff] }
 0x2e6   : > { %6062 = vmatprep.subr.bf16.mxu0 %v7603_v19  ;;  %6328 = vpow2.f32 %v2454_v41 }
 0x2e7   : > { %6330 = vpow2.f32 %v2410_v21 }
 0x2e8   : > { %6332 = vpow2.f32 %v2458_v9  ;;  %v8194_v9 = vld [vmem:[#allocation27_spill] sm:$0xff] }
 0x2e9   : > { %6334 = vpow2.f32 %v2460_v61  ;;  %v8195_v61 = vld [vmem:[#allocation28_spill] sm:$0xff] }
 0x2ef   : > { %v7616_v27 = vpop.eup %6326 }
 0x2f0   : > { %v2756_v11 = vmul.f32 %v7616_v27, %v2724_v18  ;;  %v7635_v55 = vpop.eup %6328  ;;  %v8193_v18 = vld [vmem:[#allocation24_spill] sm:$0xff] }
 0x2f1   : > { %v7638_v46 = vpop.eup %6330 }
 0x2f2   : > { %v7642_v17 = vpop.eup %6332  ;;  %v2759_v41 = vmul.f32 %v7638_v46, %v2727_v56 }
 0x2f3   : > { %v7651_v28 = vpop.eup %6334 }
 0x2fd   : > { %2801 = vadd.xlane.f32.xlu1 %v2800_v39  ;;  %v7644_v39 = vpop.permute.xlu0 %3073 }
 0x302   : > { %2810 = vadd.xlane.f32.xlu0 %v2809_v6 }
 0x304   : > { %v2790_v14 = vpop.xlane.xlu1 %2789 }
 0x305   : > { %v2884_v31 = vadd.f32 %v2790_v14, %v2756_v11  ;;  %v2655_v11 = vsub.f32 %v8194_v9, %v2606_v51 }
 0x307   : > { %2917 = vst.msk [vmem:[#allocation3] sm:$0xff] %vm593_vm2, %v2884_v31  ;;  %v2714_v56 = vmul.f32 1.442695, %v2655_v11 }
 0x308   : > { %v7627_v47 = vpop.permute.xlu1 %3068 }
 0x309   : > { %v7629_v60 = vpop.f32.mrb[12].mxu0 }
 0x30a   : > { %8191 = vst [vmem:[#allocation6_spill] sm:$0xff] %v7629_v60  ;;  %v7631_v62 = vpop.f32.mrb[13].mxu0 }
 0x30c   : > { %v7633_v54 = vpop.permute.xlu1 %3078 }
 0x30e   : > { %3108 = vperm.xlu1 %6239, %v7635_v55  }
 0x310   : > { %v7640_v10 = vpop.permute.xlu1 %3063 }
 0x312   : > { %3118 = vperm.xlu1 %6239, %v7642_v17  }
 0x314   : > { %v2591_v25 = vpop.permute.xlu1 %2590 }
 0x315   : > { %v2652_v6 = vsub.f32 %v8193_v18, %v2591_v25  ;;  %v2799_v21 = vpop.xlane.xlu0 %2798  ;;  %v8197_v18 = vld [vmem:[#allocation15_spill] sm:$0xff] }
 0x316   : > { %v2887_v14 = vadd.f32 %v2799_v21, %v2759_v41  ;;  %v2401_v21 = vsub.f32 %v7321_v44, %v7329_v37  ;;  %v2827_v37 = vsel %vm658_vm0, %v7531_v16, 0.0 }
 0x317   : > { %v2708_v31 = vmul.f32 1.442695, %v2652_v6 }
 0x318   : > { %2920 = vst.msk [vmem:[#allocation3 + $0x18] sm:$0xff] %vm593_vm2, %v2887_v14  ;;  %3123 = vperm.xlu0 %6238, %v7651_v28   ;;  %v2601_v26 = vpop.permute.xlu1 %2600  ;;  %v2462_v11 = vmul.f32 1.442695, %v2401_v21  ;;  %v2402_v14 = vsub.f32 %v7392_v32, %v7399_v49  ;;  %v2833_v32 = vsel %vm658_vm0, %v7485_v36, 0.0 }
 0x319   : > { %6336 = vpow2.f32 %v2708_v31  ;;  %v2654_v58 = vsub.f32 %v8195_v61, %v2601_v26  ;;  %v8199_v31 = vld [vmem:[#allocation20_spill] sm:$0xff] }
 0x31a   : > { %6338 = vpow2.f32 %v2710_v20  ;;  %v2821_v20 = vsel %vm658_vm0, %v7473_v38, 0.0  ;;  %v2464_v44 = vmul.f32 1.442695, %v2402_v14 }
 0x31b   : > { %v2712_v60 = vmul.f32 1.442695, %v2654_v58 }
 0x31d   : > { %6340 = vpow2.f32 %v2712_v60  ;;  %v8196_v60 = vld [vmem:[#allocation18_spill] sm:$0xff]  ;;  %v7690_v26 = vpop.permute.xlu0 %3098 }
 0x31e   : > { %6342 = vpow2.f32 %v2714_v56  ;;  %v2374_v6 = vsub.f32 %v8197_v18, %v8196_v60  ;;  %v2726_v56 = vld [vmem:[#allocation3 + $0x10] sm:$0xff]  ;;  %v2839_v18 = vsel %vm658_vm0, %v7561_v43, 0.0 }
 0x31f   : > { %v8200_v43 = vld [vmem:[#allocation31_spill] sm:$0xff] }
 0x320   : > { %v2408_v9 = vmul.f32 1.442695, %v2374_v6 }
 0x321   : > { %v2616_v60 = vpop.permute.xlu0 %2615 }
 0x322   : > { %6344 = vpow2.f32 %v2408_v9 }
 0x323   : > { %v7656_v23 = vpop.eup %6336  ;;  %6346 = vpow2.f32 %v2462_v11  ;;  %v2657_v11 = vsub.f32 %v8200_v43, %v2616_v60  ;;  %v8203_v43 = vld [vmem:[#allocation35_spill] sm:$0xff] }
 0x324   : > { %v7658_v51 = vpop.eup %6338  ;;  %5857 = vmatprep.mubr.msk.f32.mxu0 %vm658_vm0, %v7656_v23  ;;  %6348 = vpow2.f32 %v2464_v44 }
 0x325   : > { %5858 = vmatmul.mubr.msk.f32.vlgmr.msra.gmra.mrb[24].mxu0 %vm658_vm0, %v7658_v51  ;;  %v2626_v9 = vpop.permute.xlu0 %2625  ;;  %v2718_v44 = vmul.f32 1.442695, %v2657_v11 }
 0x326   : > { %6064 = vmatpush3.bf16.msra.mxu0 %v7603_v19  ;;  %v2806_v19 = vsel %vm658_vm0, %v7457_v29, 0.0  ;;  %v8198_v29 = vld [vmem:[#allocation21_spill] sm:$0xff] }
 0x327   : > { %v7665_v25 = vpop.eup %6340  ;;  %v2377_v38 = vsub.f32 %v8199_v31, %v8198_v29 }
 0x328   : > { %v7667_v41 = vpop.eup %6342  ;;  %5864 = vmatprep.mubr.msk.f32.mxu1 %vm658_vm0, %v7665_v25 }
 0x329   : > { %5865 = vmatmul.mubr.msk.f32.vlgmr.msra.gmra.mrb[32].mxu1 %vm658_vm0, %v7667_v41 }
 0x32a   : > { %6068 = vmatpush3.bf16.msra.mxu1 %v7586_v7  ;;  %v2812_v7 = vsel %vm658_vm0, %v7489_v8, 0.0  ;;  %v2414_v8 = vmul.f32 1.442695, %v2377_v38  ;;  %v7722_v38 = vpop.permute.xlu0 %3083 }
 0x32c   : > { %v7698_v58 = vpop.eup %6344  ;;  %6350 = vpow2.f32 %v2414_v8  ;;  %v2729_v8 = vld [vmem:[#allocation3 + $0x28] sm:$0xff] }
 0x32d   : > { %v7700_v16 = vpop.eup %6346  ;;  %v2758_v6 = vmul.f32 %v7698_v58, %v2726_v56  ;;  %6352 = vpow2.f32 %v2718_v44 }
 0x32e   : > { %v7706_v21 = vpop.eup %6348 }
 0x336   : > { %2807 = vadd.xlane.f32.xlu1 %v2806_v19 }
 0x337   : > { %2822 = vadd.xlane.f32.xlu0 %v2821_v20  ;;  %v2845_v20 = vsel %vm658_vm0, %v7513_v12, 0.0  ;;  %v7720_v12 = vpop.eup %6350 }
 0x33b   : > { %2813 = vadd.xlane.f32.xlu0 %v2812_v7  ;;  %v2836_v7 = vsel %vm658_vm0, %v7559_v59, 0.0  ;;  %v2761_v59 = vmul.f32 %v7720_v12, %v2729_v8 }
 0x33f   : > { %2828 = vadd.xlane.f32.xlu0 %v2827_v37  ;;  %v8201_v37 = vld [vmem:[#allocation34_spill] sm:$0xff] }
 0x340   : > { %v2659_v29 = vsub.f32 %v8201_v37, %v2626_v9  ;;  %v2869_v37 = vsel %vm658_vm0, %v7667_v41, 0.0  ;;  %v8204_v41 = vld [vmem:[#allocation44_spill] sm:$0xff] }
 0x342   : > { %v7692_v61 = vpop.f32.mrb[20].mxu1  ;;  %v2722_v56 = vmul.f32 1.442695, %v2659_v29 }
 0x343   : > { %v7696_v49 = vpop.f32.mrb[21].mxu1  ;;  %2834 = vadd.xlane.f32.xlu0 %v2833_v32  ;;  %v2851_v32 = vsel %vm658_vm0, %v7596_v15, 0.0 }
 0x344   : > { %6354 = vpow2.f32 %v2722_v56 }
 0x347   : > { %3128 = vperm.xlu1 %6239, %v7700_v16   ;;  %2840 = vadd.xlane.f32.xlu0 %v2839_v18  ;;  %v8202_v18 = vld [vmem:[#allocation33_spill] sm:$0xff] }
 0x349   : > { %v2796_v36 = vpop.xlane.xlu1 %2795 }
 0x34a   : > { %v2886_v19 = vadd.f32 %v2796_v36, %v2758_v6 }
 0x34b   : > { %3133 = vperm.xlu1 %6239, %v7706_v21   ;;  %2846 = vadd.xlane.f32.xlu0 %v2845_v20 }
 0x34c   : > { %2919 = vst.msk [vmem:[#allocation3 + $0x10] sm:$0xff] %vm593_vm2, %v2886_v19  ;;  %v2857_v19 = vsel %vm658_vm0, %v7581_v53, 0.0  ;;  %v6353_v53 = vpop.eup %6352 }
 0x34d   : > { %v7713_v14 = vpop.permute.xlu1 %3088  ;;  %v2875_v29 = vsel %vm658_vm0, %v6353_v53, 0.0 }
 0x34f   : > { %2837 = vadd.xlane.f32.xlu0 %v2836_v7  ;;  %v2863_v7 = vsel %vm658_vm0, %v7658_v51, 0.0 }
 0x351   : > { %v7718_v31 = vpop.permute.xlu1 %3093 }
 0x353   : > { %2852 = vadd.xlane.f32.xlu0 %v2851_v32  ;;  %v6355_v32 = vpop.eup %6354 }
 0x354   : > { %v2881_v51 = vsel %vm658_vm0, %v6355_v32, 0.0 }
 0x355   : > { %v2611_v60 = vpop.permute.xlu1 %2610 }
 0x356   : > { %v2656_v6 = vsub.f32 %v8202_v18, %v2611_v60  ;;  %v2805_v36 = vpop.xlane.xlu0 %2804  ;;  %v2403_v60 = vsub.f32 %v8204_v41, %v7338_v57  ;;  %v2815_v18 = vsel %vm658_vm0, %v7493_v5, 0.0  ;;  %v2830_v5 = vsel %vm658_vm0, %v7477_v34, 0.0 }
 0x357   : > { %v2889_v20 = vadd.f32 %v2805_v36, %v2761_v59  ;;  %2858 = vadd.xlane.f32.xlu0 %v2857_v19  ;;  %v8205_v36 = vld [vmem:[#allocation25_spill] sm:$0xff]  ;;  %v8206_v19 = vld [vmem:[#allocation22_spill] sm:$0xff]  ;;  %v2848_v34 = vsel %vm658_vm0, %v7594_v50, 0.0 }
 0x358   : > { %v2716_v9 = vmul.f32 1.442695, %v2656_v6  ;;  %v2466_v59 = vmul.f32 1.442695, %v2403_v60  ;;  %v2818_v6 = vsel %vm658_vm0, %v7464_v45, 0.0  ;;  %v2959_v60 = vld [vmem:[#allocation4 + $0x50] sm:$0xff] }
 0x359   : > { %2922 = vst.msk [vmem:[#allocation3 + $0x28] sm:$0xff] %vm593_vm2, %v2889_v20  ;;  %v2621_v15 = vpop.permute.xlu1 %2620  ;;  %v2376_v20 = vsub.f32 %v8206_v19, %v8205_v36  ;;  %v8209_v36 = vld [vmem:[#allocation50_spill] sm:$0xff] }
 0x35a   : > { %6356 = vpow2.f32 %v2716_v9  ;;  %v2658_v11 = vsub.f32 %v8203_v43, %v2621_v15  ;;  %v2824_v9 = vsel %vm658_vm0, %v7524_v13, 0.0  ;;  %v8207_v15 = vld [vmem:[#allocation29_spill] sm:$0xff]  ;;  %v8208_v43 = vld [vmem:[#allocation26_spill] sm:$0xff] }
 0x35b   : > { %2864 = vadd.xlane.f32.xlu0 %v2863_v7  ;;  %v2412_v57 = vmul.f32 1.442695, %v2376_v20 }
 0x35c   : > { %v2720_v44 = vmul.f32 1.442695, %v2658_v11  ;;  %v2379_v11 = vsub.f32 %v8208_v43, %v8207_v15  ;;  %v2958_v15 = vld [vmem:[#allocation4 + $0x48] sm:$0xff]  ;;  %v2964_v43 = vld [vmem:[#allocation4 + $0x78] sm:$0xff] }
 0x35e   : > { %6358 = vpow2.f32 %v2720_v44  ;;  %v2418_v45 = vmul.f32 1.442695, %v2379_v11  ;;  %v2842_v44 = vsel %vm658_vm0, %v7503_v24, 0.0  ;;  %v2854_v24 = vsel %vm658_vm0, %v7517_v42, 0.0 }
 0x35f   : > { %2870 = vadd.xlane.f32.xlu0 %v2869_v37  ;;  %6360 = vpow2.f32 %v2466_v59  ;;  %v3151_v42 = vmul.f32 %v8209_v36, %v2959_v60 }
 0x360   : > { %6362 = vpow2.f32 %v2412_v57  ;;  %v2731_v57 = vld [vmem:[#allocation3 + $0x38] sm:$0xff] }
 0x361   : > { %6364 = vpow2.f32 %v2418_v45  ;;  %v2963_v45 = vld [vmem:[#allocation4 + $0x70] sm:$0xff] }
 0x362   : > { %v3155_v60 = vmul.f32 %v7427_v1, %v2963_v45 }
 0x363   : > { %2876 = vadd.xlane.f32.xlu0 %v2875_v29 }
 0x364   : > { %v7737_v8 = vpop.eup %6356 }
 0x365   : > { %5871 = vmatprep.mubr.msk.f32.mxu0 %vm658_vm0, %v7737_v8 }
 0x366   : > { %5872 = vmatmul.mubr.msk.f32.vlgmr.msra.gmra.mrb[26].mxu0 %vm658_vm0, %v6353_v53  ;;  %v7774_v53 = vpop.permute.xlu0 %3103 }
 0x367   : > { %2882 = vadd.xlane.f32.xlu0 %v2881_v51  ;;  %v2960_v51 = vld [vmem:[#allocation4 + $0x58] sm:$0xff] }
 0x368   : > { %v7743_v56 = vpop.eup %6358  ;;  %v3152_v50 = vmul.f32 %v7475_v33, %v2960_v51  ;;  %v2957_v33 = vld [vmem:[#allocation4 + $0x40] sm:$0xff] }
 0x369   : > { %5878 = vmatprep.mubr.msk.f32.mxu1 %vm658_vm0, %v7743_v56  ;;  %v7762_v7 = vpop.eup %6360 }
 0x36a   : > { %5879 = vmatmul.mubr.msk.f32.vlgmr.msra.gmra.mrb[34].mxu1 %vm658_vm0, %v6355_v32  ;;  %v6363_v29 = vpop.eup %6362  ;;  %v2728_v32 = vld [vmem:[#allocation3 + $0x20] sm:$0xff]  ;;  %v7789_v19 = vpop.permute.xlu0 %3113 }
 0x36f   : > { %2816 = vadd.xlane.f32.xlu1 %v2815_v18 }
 0x373   : > { %2819 = vadd.xlane.f32.xlu1 %v2818_v6  ;;  %v7786_v6 = vpop.eup %6364 }
 0x377   : > { %2825 = vadd.xlane.f32.xlu1 %v2824_v9 }
 0x37b   : > { %2831 = vadd.xlane.f32.xlu1 %v2830_v5 }
 0x37d   : > { %3138 = vperm.xlu0 %6238, %v7762_v7  }
 0x37f   : > { %2843 = vadd.xlane.f32.xlu1 %v2842_v44  ;;  %v7767_v13 = vpop.f32.mrb[14].mxu0 }
 0x380   : > { %v7769_v37 = vpop.f32.mrb[15].mxu0 }
 0x381   : > { %2983 = vperm.xlu0 %6238, %v7616_v27   ;;  %v2760_v27 = vmul.f32 %v6363_v29, %v2728_v32  ;;  %v3156_v32 = vmul.f32 %v7415_v4, %v2964_v43  ;;  %v2872_v43 = vsel %vm658_vm0, %v7737_v8, 0.0 }
 0x383   : > { %2849 = vadd.xlane.f32.xlu1 %v2848_v34  ;;  %v2866_v34 = vsel %vm658_vm0, %v7665_v25, 0.0 }
 0x385   : > { %2993 = vperm.xlu0 %6238, %v7698_v58   ;;  %v2860_v58 = vsel %vm658_vm0, %v7656_v23, 0.0  ;;  %v2763_v23 = vmul.f32 %v7786_v6, %v2731_v57 }
 0x387   : > { %v7779_v41 = vpop.f32.mrb[22].mxu1  ;;  %2855 = vadd.xlane.f32.xlu1 %v2854_v24 }
 0x388   : > { %v7781_v59 = vpop.f32.mrb[23].mxu1 }
 0x389   : > { %3003 = vperm.xlu0 %6238, %v6363_v29   ;;  %v8210_v29 = vld [vmem:[#allocation49_spill] sm:$0xff] }
 0x38a   : > { %v2802_v18 = vpop.xlane.xlu1 %2801  ;;  %v3150_v24 = vmul.f32 %v8210_v29, %v2958_v15 }
 0x38b   : > { %v2888_v20 = vadd.f32 %v2802_v18, %v2760_v27  ;;  %v5810_v9 = vpop.f32.mrb[24].mxu1  ;;  %2861 = vadd.xlane.f32.xlu1 %v2860_v58  ;;  %v3149_v27 = vmul.f32 %v7511_v40, %v2957_v33  ;;  %v2961_v40 = vld [vmem:[#allocation4 + $0x60] sm:$0xff] }
 0x38c   : > { %v4480_v11 = vadd.f32 %v5810_v9, %v3152_v50  ;;  %v3650_v5 = vpop.f32.mrb[25].mxu1  ;;  %v2968_v50 = vld [vmem:[#allocation4 + $0x98] sm:$0xff] }
 0x38d   : > { %2921 = vst.msk [vmem:[#allocation3 + $0x20] sm:$0xff] %vm593_vm2, %v2888_v20  ;;  %v4479_v44 = vadd.f32 %v3650_v5, %v3151_v42  ;;  %v2967_v42 = vld [vmem:[#allocation4 + $0x90] sm:$0xff]  ;;  %v3160_v1 = vmul.f32 %v7633_v54, %v2968_v50  ;;  %v2878_v54 = vsel %vm658_vm0, %v7743_v56, 0.0 }
 0x38e   : > { %4512 = vst.msk [vmem:[#allocation4 + $0x58] sm:$0xff] %vm658_vm0, %v4480_v11  ;;  %v2962_v11 = vld [vmem:[#allocation4 + $0x68] sm:$0xff]  ;;  %v3159_v5 = vmul.f32 %v7644_v39, %v2967_v42 }
 0x38f   : > { %4511 = vst.msk [vmem:[#allocation4 + $0x50] sm:$0xff] %vm658_vm0, %v4479_v44  ;;  %v2811_v51 = vpop.xlane.xlu0 %2810  ;;  %2867 = vadd.xlane.f32.xlu1 %v2866_v34  ;;  %v5803_v58 = vpop.f32.mrb[16].mxu0  ;;  %v3154_v8 = vmul.f32 %v7542_v52, %v2962_v11  ;;  %v3153_v34 = vmul.f32 %v7420_v0, %v2961_v40  ;;  %v2966_v52 = vld [vmem:[#allocation4 + $0x88] sm:$0xff] }
 0x390   : > { %v2891_v18 = vadd.f32 %v2811_v51, %v2763_v23  ;;  %v5824_v36 = vpop.f32.mrb[26].mxu1  ;;  %v4478_v20 = vadd.f32 %v5803_v58, %v3150_v24  ;;  %v3569_v25 = vpop.f32.mrb[17].mxu0  ;;  %v2965_v51 = vld [vmem:[#allocation4 + $0x80] sm:$0xff]  ;;  %v8211_v58 = vld [vmem:[#allocation32_spill] sm:$0xff] }
 0x391   : > { %v4484_v9 = vadd.f32 %v5824_v36, %v3156_v32  ;;  %v3812_v57 = vpop.f32.mrb[27].mxu1  ;;  %v4477_v4 = vadd.f32 %v3569_v25, %v3149_v27  ;;  %v3157_v56 = vmul.f32 %v7640_v10, %v2965_v51  ;;  %v8212_v36 = vld [vmem:[#allocation30_spill] sm:$0xff] }
 0x392   : > { %2924 = vst.msk [vmem:[#allocation3 + $0x38] sm:$0xff] %vm593_vm2, %v2891_v18  ;;  %v4483_v15 = vadd.f32 %v3812_v57, %v3155_v60  ;;  %v3158_v60 = vmul.f32 %v7627_v47, %v2966_v52  ;;  %v2378_v42 = vsub.f32 %v8212_v36, %v8211_v58  ;;  %v8214_v51 = vld [vmem:[#allocation42_spill] sm:$0xff]  ;;  %v2739_v36 = vld [vmem:[#allocation3 + $0x78] sm:$0xff] }
 0x393   : > { %4510 = vst.msk [vmem:[#allocation4 + $0x48] sm:$0xff] %vm658_vm0, %v4478_v20  ;;  %4516 = vst.msk [vmem:[#allocation4 + $0x78] sm:$0xff] %vm658_vm0, %v4484_v9  ;;  %2873 = vadd.xlane.f32.xlu1 %v2872_v43  ;;  %v2972_v20 = vld [vmem:[#allocation4 + $0xb8] sm:$0xff]  ;;  %v2971_v9 = vld [vmem:[#allocation4 + $0xb0] sm:$0xff] }
 0x394   : > { %4509 = vst.msk [vmem:[#allocation4 + $0x40] sm:$0xff] %vm658_vm0, %v4477_v4  ;;  %4515 = vst.msk [vmem:[#allocation4 + $0x70] sm:$0xff] %vm658_vm0, %v4483_v15  ;;  %v5838_v45 = vpop.f32.mrb[28].mxu1  ;;  %v2416_v47 = vmul.f32 1.442695, %v2378_v42  ;;  %v3164_v10 = vmul.f32 %v7690_v26, %v2972_v20  ;;  %v3163_v25 = vmul.f32 %v7718_v31, %v2971_v9  ;;  %v2970_v4 = vld [vmem:[#allocation4 + $0xa8] sm:$0xff] }
 0x395   : > { %v4488_v33 = vadd.f32 %v5838_v45, %v3160_v1  ;;  %v3974_v44 = vpop.f32.mrb[29].mxu1  ;;  %v2969_v43 = vld [vmem:[#allocation4 + $0xa0] sm:$0xff]  ;;  %v7832_v45 = vpop.permute.xlu1 %3108  ;;  %v8216_v9 = vld [vmem:[#allocation38_spill] sm:$0xff] }
 0x396   : > { %v4487_v23 = vadd.f32 %v3974_v44, %v3159_v5  ;;  %6366 = vpow2.f32 %v2416_v47  ;;  %v3161_v1 = vmul.f32 %v7722_v38, %v2969_v43  ;;  %v2771_v47 = vmul.f32 %v8216_v9, %v2739_v36 }
 0x397   : > { %4520 = vst.msk [vmem:[#allocation4 + $0x98] sm:$0xff] %vm658_vm0, %v4488_v33  ;;  %v5817_v29 = vpop.f32.mrb[18].mxu0  ;;  %2879 = vadd.xlane.f32.xlu1 %v2878_v54 }
 0x398   : > { %4519 = vst.msk [vmem:[#allocation4 + $0x90] sm:$0xff] %vm658_vm0, %v4487_v23  ;;  %v4482_v39 = vadd.f32 %v5817_v29, %v3154_v8  ;;  %v3731_v24 = vpop.f32.mrb[19].mxu0  ;;  %v2730_v8 = vld [vmem:[#allocation3 + $0x30] sm:$0xff]  ;;  %v2735_v23 = vld [vmem:[#allocation3 + $0x58] sm:$0xff] }
 0x399   : > { %v4481_v32 = vadd.f32 %v3731_v24, %v3153_v34  ;;  %v7838_v44 = vpop.permute.xlu1 %3118  ;;  %v8213_v34 = vld [vmem:[#allocation41_spill] sm:$0xff] }
 0x39a   : > { %4514 = vst.msk [vmem:[#allocation4 + $0x68] sm:$0xff] %vm658_vm0, %v4482_v39  ;;  %v2767_v29 = vmul.f32 %v8213_v34, %v2735_v23 }
 0x39b   : > { %4513 = vst.msk [vmem:[#allocation4 + $0x60] sm:$0xff] %vm658_vm0, %v4481_v32  ;;  %v2732_v32 = vld [vmem:[#allocation3 + $0x40] sm:$0xff] }
 0x3a0   : > { %v7836_v33 = vpop.eup %6366 }
 0x3a1   : > { %v2762_v38 = vmul.f32 %v7836_v33, %v2730_v8 }
 0x3a7   : > { %v5831_v0 = vpop.f32.mrb[20].mxu0 }
 0x3a8   : > { %v4486_v27 = vadd.f32 %v5831_v0, %v3158_v60  ;;  %v3893_v50 = vpop.f32.mrb[21].mxu0  ;;  %2988 = vperm.xlu1 %6239, %v7568_v22   ;;  %v2764_v60 = vmul.f32 %v8214_v51, %v2732_v32  ;;  %v2737_v0 = vld [vmem:[#allocation3 + $0x68] sm:$0xff] }
 0x3a9   : > { %v4485_v18 = vadd.f32 %v3893_v50, %v3157_v56  ;;  %v8215_v50 = vld [vmem:[#allocation43_spill] sm:$0xff] }
 0x3aa   : > { %4518 = vst.msk [vmem:[#allocation4 + $0x88] sm:$0xff] %vm658_vm0, %v4486_v27 }
 0x3ab   : > { %4517 = vst.msk [vmem:[#allocation4 + $0x80] sm:$0xff] %vm658_vm0, %v4485_v18  ;;  %v2769_v18 = vmul.f32 %v8215_v50, %v2737_v0 }
 0x3ac   : > { %2998 = vperm.xlu1 %6239, %v7638_v46   ;;  %v3162_v46 = vmul.f32 %v7713_v14, %v2970_v4  ;;  %v7840_v14 = vpop.permute.xlu0 %3123 }
 0x3b2   : > { %v5852_v57 = vpop.f32.mrb[30].mxu1 }
 0x3b3   : > { %v4492_v22 = vadd.f32 %v5852_v57, %v3164_v10  ;;  %v4136_v15 = vpop.f32.mrb[31].mxu1 }
 0x3b4   : > { %v4491_v11 = vadd.f32 %v4136_v15, %v3163_v25  ;;  %v2741_v25 = vld [vmem:[#allocation3 + $0x88] sm:$0xff] }
 0x3b5   : > { %4524 = vst.msk [vmem:[#allocation4 + $0xb8] sm:$0xff] %vm658_vm0, %v4492_v22  ;;  %v8217_v22 = vld [vmem:[#allocation46_spill] sm:$0xff] }
 0x3b6   : > { %4523 = vst.msk [vmem:[#allocation4 + $0xb0] sm:$0xff] %vm658_vm0, %v4491_v11  ;;  %v2773_v15 = vmul.f32 %v8217_v22, %v2741_v25  ;;  %v2743_v11 = vld [vmem:[#allocation3 + $0x98] sm:$0xff] }
 0x3b7   : > { %v5845_v40 = vpop.f32.mrb[22].mxu0 }
 0x3b8   : > { %v4490_v5 = vadd.f32 %v5845_v40, %v3162_v46  ;;  %v4055_v26 = vpop.f32.mrb[23].mxu0  ;;  %v8218_v40 = vld [vmem:[#allocation47_spill] sm:$0xff] }
 0x3b9   : > { %v4489_v31 = vadd.f32 %v4055_v26, %v3161_v1 }
 0x3ba   : > { %4522 = vst.msk [vmem:[#allocation4 + $0xa8] sm:$0xff] %vm658_vm0, %v4490_v5  ;;  %v2775_v5 = vmul.f32 %v8218_v40, %v2743_v11 }
 0x3bb   : > { %4521 = vst.msk [vmem:[#allocation4 + $0xa0] sm:$0xff] %vm658_vm0, %v4489_v31  ;;  %v2740_v31 = vld [vmem:[#allocation3 + $0x80] sm:$0xff] }
 0x3c3   : > { %v2808_v54 = vpop.xlane.xlu1 %2807 }
 0x3c4   : > { %v2890_v39 = vadd.f32 %v2808_v54, %v2762_v38  ;;  %v2823_v24 = vpop.xlane.xlu0 %2822  ;;  %v8219_v54 = vld [vmem:[#allocation48_spill] sm:$0xff] }
 0x3c5   : > { %v2895_v52 = vadd.f32 %v2823_v24, %v2767_v29  ;;  %v2772_v34 = vmul.f32 %v8219_v54, %v2740_v31  ;;  %v2974_v31 = vld [vmem:[#allocation4 + $0xc8] sm:$0xff] }
 0x3c6   : > { %2923 = vst.msk [vmem:[#allocation3 + $0x30] sm:$0xff] %vm593_vm2, %v2890_v39  ;;  %v2745_v39 = vld [vmem:[#allocation3 + $0xa8] sm:$0xff] }
 0x3c7   : > { %2928 = vst.msk [vmem:[#allocation3 + $0x58] sm:$0xff] %vm593_vm2, %v2895_v52  ;;  %v2777_v52 = vmul.f32 %v7546_v63, %v2745_v39  ;;  %v2976_v39 = vld [vmem:[#allocation4 + $0xd8] sm:$0xff] }
 0x3c8   : > { %v2814_v56 = vpop.xlane.xlu0 %2813 }
 0x3c9   : > { %v2892_v27 = vadd.f32 %v2814_v56, %v2764_v60  ;;  %v2747_v60 = vld [vmem:[#allocation3 + $0xb8] sm:$0xff] }
 0x3ca   : > { %v2779_v50 = vmul.f32 %v7412_v48, %v2747_v60 }
 0x3cb   : > { %2925 = vst.msk [vmem:[#allocation3 + $0x40] sm:$0xff] %vm593_vm2, %v2892_v27 }
 0x3cc   : > { %v2829_v58 = vpop.xlane.xlu0 %2828 }
 0x3cd   : > { %v2897_v42 = vadd.f32 %v2829_v58, %v2769_v18  ;;  %v2749_v58 = vld [vmem:[#allocation3 + $0xc8] sm:$0xff] }
 0x3ce   : > { %v4579_v20 = vld [vmem:[#allocation3 + $0x58] sm:$0xff]  ;;  %v2781_v63 = vmul.f32 %v7635_v55, %v2749_v58 }
 0x3cf   : > { %6368 = vrcp.f32 %v4579_v20  ;;  %2930 = vst.msk [vmem:[#allocation3 + $0x68] sm:$0xff] %vm593_vm2, %v2897_v42 }
 0x3d0   : > { %v2835_v10 = vpop.xlane.xlu0 %2834 }
 0x3d1   : > { %v2899_v57 = vadd.f32 %v2835_v10, %v2771_v47  ;;  %v2751_v47 = vld [vmem:[#allocation3 + $0xd8] sm:$0xff] }
 0x3d2   : > { %v4576_v4 = vld [vmem:[#allocation3 + $0x40] sm:$0xff]  ;;  %v2783_v48 = vmul.f32 %v7642_v17, %v2751_v47 }
 0x3d3   : > { %6370 = vrcp.f32 %v4576_v4  ;;  %2932 = vst.msk [vmem:[#allocation3 + $0x78] sm:$0xff] %vm593_vm2, %v2899_v57  ;;  %v2753_v4 = vld [vmem:[#allocation3 + $0xe8] sm:$0xff] }
 0x3d4   : > { %v2841_v43 = vpop.xlane.xlu0 %2840  ;;  %v2785_v55 = vmul.f32 %v7700_v16, %v2753_v4  ;;  %v3166_v16 = vmul.f32 %v7832_v45, %v2974_v31  ;;  %v2738_v31 = vld [vmem:[#allocation3 + $0x70] sm:$0xff] }
 0x3d5   : > { %v2901_v46 = vadd.f32 %v2841_v43, %v2773_v15 }
 0x3d6   : > { %v4581_v1 = vld [vmem:[#allocation3 + $0x68] sm:$0xff] }
 0x3d7   : > { %6372 = vrcp.f32 %v4581_v1  ;;  %2934 = vst.msk [vmem:[#allocation3 + $0x88] sm:$0xff] %vm593_vm2, %v2901_v46  ;;  %v2755_v46 = vld [vmem:[#allocation3 + $0xf8] sm:$0xff] }
 0x3d8   : > { %v2847_v26 = vpop.xlane.xlu0 %2846  ;;  %v2787_v17 = vmul.f32 %v7762_v7, %v2755_v46 }
 0x3d9   : > { %v6369_v8 = vpop.eup %6368  ;;  %v2903_v23 = vadd.f32 %v2847_v26, %v2775_v5  ;;  %v7867_v26 = vpop.permute.xlu1 %3128 }
 0x3da   : > { %v4583_v38 = vld [vmem:[#allocation3 + $0x78] sm:$0xff]  ;;  %4721 = vperm.xlu1 %6239, %v6369_v8  }
 0x3db   : > { %6374 = vrcp.f32 %v4583_v38  ;;  %2936 = vst.msk [vmem:[#allocation3 + $0x98] sm:$0xff] %vm593_vm2, %v2903_v23  ;;  %v2973_v38 = vld [vmem:[#allocation4 + $0xc0] sm:$0xff] }
 0x3dc   : > { %v2838_v29 = vpop.xlane.xlu0 %2837 }
 0x3dd   : > { %v6371_v24 = vpop.eup %6370  ;;  %v2900_v32 = vadd.f32 %v2838_v29, %v2772_v34  ;;  %v3165_v29 = vmul.f32 %v7774_v53, %v2973_v38 }
 0x3de   : > { %4706 = vperm.xlu1 %6239, %v6371_v24  }
 0x3df   : > { %2933 = vst.msk [vmem:[#allocation3 + $0x80] sm:$0xff] %vm593_vm2, %v2900_v32 }
 0x3e0   : > { %v2853_v51 = vpop.xlane.xlu0 %2852 }
 0x3e1   : > { %v6373_v56 = vpop.eup %6372  ;;  %v2905_v0 = vadd.f32 %v2853_v51, %v2777_v52  ;;  %v2975_v52 = vld [vmem:[#allocation4 + $0xd0] sm:$0xff]  ;;  %v7874_v51 = vpop.permute.xlu1 %3133 }
 0x3e2   : > { %v4587_v27 = vld [vmem:[#allocation3 + $0x98] sm:$0xff]  ;;  %4731 = vperm.xlu1 %6239, %v6373_v56   ;;  %v2733_v56 = vld [vmem:[#allocation3 + $0x48] sm:$0xff]  ;;  %v3167_v45 = vmul.f32 %v7789_v19, %v2975_v52 }
 0x3e3   : > { %6376 = vrcp.f32 %v4587_v27  ;;  %2938 = vst.msk [vmem:[#allocation3 + $0xa8] sm:$0xff] %vm593_vm2, %v2905_v0  ;;  %v3168_v27 = vmul.f32 %v7838_v44, %v2976_v39  ;;  %v2949_v44 = vld [vmem:[#allocation4] sm:$0xff] }
 0x3e4   : > { %v2859_v18 = vpop.xlane.xlu0 %2858 }
 0x3e5   : > { %v6375_v36 = vpop.eup %6374  ;;  %v2907_v42 = vadd.f32 %v2859_v18, %v2779_v50  ;;  %v8220_v18 = vld [vmem:[#allocation36_spill] sm:$0xff] }
 0x3e6   : > { %v4584_v20 = vld [vmem:[#allocation3 + $0x80] sm:$0xff]  ;;  %4741 = vperm.xlu1 %6239, %v6375_v36   ;;  %v2765_v58 = vmul.f32 %v8220_v18, %v2733_v56 }
 0x3e7   : > { %6378 = vrcp.f32 %v4584_v20  ;;  %2940 = vst.msk [vmem:[#allocation3 + $0xb8] sm:$0xff] %vm593_vm2, %v2907_v42 }
 0x3e8   : > { %v2865_v9 = vpop.xlane.xlu0 %2864 }
 0x3e9   : > { %v2909_v10 = vadd.f32 %v2865_v9, %v2781_v63  ;;  %v2734_v9 = vld [vmem:[#allocation3 + $0x50] sm:$0xff] }
 0x3ea   : > { %v4589_v25 = vld [vmem:[#allocation3 + $0xa8] sm:$0xff] }
 0x3eb   : > { %6380 = vrcp.f32 %v4589_v25  ;;  %2942 = vst.msk [vmem:[#allocation3 + $0xc8] sm:$0xff] %vm593_vm2, %v2909_v10  ;;  %v8221_v25 = vld [vmem:[#allocation37_spill] sm:$0xff] }
 0x3ec   : > { %v2871_v57 = vpop.xlane.xlu0 %2870 }
 0x3ed   : > { %v6377_v22 = vpop.eup %6376  ;;  %v2911_v15 = vadd.f32 %v2871_v57, %v2783_v48  ;;  %v2766_v48 = vmul.f32 %v8221_v25, %v2734_v9 }
 0x3ee   : > { %v4591_v43 = vld [vmem:[#allocation3 + $0xb8] sm:$0xff]  ;;  %4761 = vperm.xlu1 %6239, %v6377_v22  }
 0x3ef   : > { %6382 = vrcp.f32 %v4591_v43  ;;  %2944 = vst.msk [vmem:[#allocation3 + $0xd8] sm:$0xff] %vm593_vm2, %v2911_v15  ;;  %v2736_v15 = vld [vmem:[#allocation3 + $0x60] sm:$0xff] }
 0x3f0   : > { %v2877_v11 = vpop.xlane.xlu0 %2876 }
 0x3f1   : > { %v6379_v1 = vpop.eup %6378  ;;  %v2913_v40 = vadd.f32 %v2877_v11, %v2785_v55  ;;  %v2951_v55 = vld [vmem:[#allocation4 + $0x10] sm:$0xff] }
 0x3f2   : > { %v4593_v5 = vld [vmem:[#allocation3 + $0xc8] sm:$0xff]  ;;  %4746 = vperm.xlu1 %6239, %v6379_v1   ;;  %v8222_v1 = vld [vmem:[#allocation39_spill] sm:$0xff] }
 0x3f3   : > { %6384 = vrcp.f32 %v4593_v5  ;;  %2946 = vst.msk [vmem:[#allocation3 + $0xe8] sm:$0xff] %vm593_vm2, %v2913_v40  ;;  %v2768_v40 = vmul.f32 %v8222_v1, %v2736_v15 }
 0x3f4   : > { %v2883_v8 = vpop.xlane.xlu0 %2882 }
 0x3f5   : > { %v6381_v23 = vpop.eup %6380  ;;  %v2915_v54 = vadd.f32 %v2883_v8, %v2787_v17 }
 0x3f6   : > { %v4595_v34 = vld [vmem:[#allocation3 + $0xd8] sm:$0xff]  ;;  %4771 = vperm.xlu1 %6239, %v6381_v23   ;;  %v2953_v23 = vld [vmem:[#allocation4 + $0x20] sm:$0xff] }
 0x3f7   : > { %6386 = vrcp.f32 %v4595_v34  ;;  %2948 = vst.msk [vmem:[#allocation3 + $0xf8] sm:$0xff] %vm593_vm2, %v2915_v54 }
 0x3f8   : > { %v5859_v24 = vpop.f32.mrb[24].mxu0 }
 0x3f9   : > { %v6383_v32 = vpop.eup %6382  ;;  %v4494_v7 = vadd.f32 %v5859_v24, %v3166_v16  ;;  %v4217_v60 = vpop.f32.mrb[25].mxu0  ;;  %v2742_v24 = vld [vmem:[#allocation3 + $0x90] sm:$0xff] }
 0x3fa   : > { %v4493_v0 = vadd.f32 %v4217_v60, %v3165_v29  ;;  %4781 = vperm.xlu1 %6239, %v6383_v32   ;;  %v8224_v60 = vld [vmem:[#allocation45_spill] sm:$0xff] }
 0x3fb   : > { %4526 = vst.msk [vmem:[#allocation4 + $0xc8] sm:$0xff] %vm658_vm0, %v4494_v7 }
 0x3fc   : > { %4525 = vst.msk [vmem:[#allocation4 + $0xc0] sm:$0xff] %vm658_vm0, %v4493_v0  ;;  %v7880_v53 = vpop.permute.xlu0 %3138  ;;  %v5866_v50 = vpop.f32.mrb[32].mxu1  ;;  %v2744_v0 = vld [vmem:[#allocation3 + $0xa0] sm:$0xff] }
 0x3fd   : > { %v6385_v36 = vpop.eup %6384  ;;  %v4496_v42 = vadd.f32 %v5866_v50, %v3168_v27  ;;  %v2817_v20 = vpop.xlane.xlu1 %2816  ;;  %v2776_v50 = vmul.f32 %v7431_v2, %v2744_v0  ;;  %v4568_v0 = vld [vmem:[#allocation3] sm:$0xff] }
 0x3fe   : > { %v4298_v63 = vpop.f32.mrb[33].mxu1  ;;  %v2893_v47 = vadd.f32 %v2817_v20, %v2765_v58  ;;  %4791 = vperm.xlu1 %6239, %v6385_v36   ;;  %v2746_v58 = vld [vmem:[#allocation3 + $0xb0] sm:$0xff] }
 0x3ff   : > { %v4495_v10 = vadd.f32 %v4298_v63, %v3167_v45  ;;  %4528 = vst.msk [vmem:[#allocation4 + $0xd8] sm:$0xff] %vm658_vm0, %v4496_v42  ;;  %v2778_v20 = vmul.f32 %v7552_v30, %v2746_v58  ;;  %v4585_v63 = vld [vmem:[#allocation3 + $0x88] sm:$0xff] }
 0x400   : > { %2926 = vst.msk [vmem:[#allocation3 + $0x48] sm:$0xff] %vm593_vm2, %v2893_v47  ;;  %v2984_v19 = vpop.permute.xlu0 %2983  ;;  %v2748_v47 = vld [vmem:[#allocation3 + $0xc0] sm:$0xff]  ;;  %v2978_v58 = vld [vmem:[#allocation4 + $0xe8] sm:$0xff] }
 0x401   : > { %4527 = vst.msk [vmem:[#allocation4 + $0xd0] sm:$0xff] %vm658_vm0, %v4495_v10  ;;  %v6387_v57 = vpop.eup %6386  ;;  %v3141_v4 = vmul.f32 %v2984_v19, %v2949_v44  ;;  %v2820_v22 = vpop.xlane.xlu1 %2819  ;;  %v2780_v2 = vmul.f32 %v7579_v3, %v2748_v47  ;;  %v2980_v47 = vld [vmem:[#allocation4 + $0xf8] sm:$0xff] }
 0x402   : > { %v2894_v43 = vadd.f32 %v2820_v22, %v2766_v48  ;;  %4801 = vperm.xlu1 %6239, %v6387_v57   ;;  %v2750_v48 = vld [vmem:[#allocation3 + $0xd0] sm:$0xff] }
 0x403   : > { %v4469_v11 = vadd.f32 %v7631_v62, %v3141_v4  ;;  %v8223_v62 = vld [vmem:[#allocation40_spill] sm:$0xff]  ;;  %v2782_v30 = vmul.f32 %v7591_v35, %v2750_v48  ;;  %v3172_v48 = vmul.f32 %v7880_v53, %v2980_v47  ;;  %v4574_v53 = vld [vmem:[#allocation3 + $0x30] sm:$0xff]  ;;  %v4649_v47 = vld [vmem:[#allocation4 + $0x88] sm:$0xff] }
 0x404   : > { %2927 = vst.msk [vmem:[#allocation3 + $0x50] sm:$0xff] %vm593_vm2, %v2894_v43  ;;  %v2994_v46 = vpop.permute.xlu0 %2993  ;;  %v2770_v16 = vmul.f32 %v8223_v62, %v2738_v31  ;;  %v2752_v43 = vld [vmem:[#allocation3 + $0xe0] sm:$0xff] }
 0x405   : > { %4501 = vst.msk [vmem:[#allocation4] sm:$0xff] %vm658_vm0, %v4469_v11  ;;  %v3143_v5 = vmul.f32 %v2994_v46, %v2951_v55  ;;  %v2826_v17 = vpop.xlane.xlu1 %2825  ;;  %v2784_v3 = vmul.f32 %v7651_v28, %v2752_v43 }
 0x406   : > { %v2896_v8 = vadd.f32 %v2826_v17, %v2768_v40  ;;  %v2754_v40 = vld [vmem:[#allocation3 + $0xf0] sm:$0xff] }
 0x407   : > { %v4577_v38 = vld [vmem:[#allocation3 + $0x48] sm:$0xff]  ;;  %v4471_v54 = vadd.f32 %v7696_v49, %v3143_v5  ;;  %v2774_v49 = vmul.f32 %v8224_v60, %v2742_v24  ;;  %v2786_v35 = vmul.f32 %v7706_v21, %v2754_v40  ;;  %v4599_v24 = vld [vmem:[#allocation3 + $0xf8] sm:$0xff] }
 0x408   : > { %6388 = vrcp.f32 %v4577_v38  ;;  %2929 = vst.msk [vmem:[#allocation3 + $0x60] sm:$0xff] %vm593_vm2, %v2896_v8  ;;  %v3004_v34 = vpop.permute.xlu0 %3003 }
 0x409   : > { %4503 = vst.msk [vmem:[#allocation4 + $0x10] sm:$0xff] %vm658_vm0, %v4471_v54  ;;  %v3145_v29 = vmul.f32 %v3004_v34, %v2953_v23  ;;  %v2832_v39 = vpop.xlane.xlu1 %2831  ;;  %v2950_v54 = vld [vmem:[#allocation4 + $0x8] sm:$0xff] }
 0x40a   : > { %v2898_v32 = vadd.f32 %v2832_v39, %v2770_v16  ;;  %v4597_v34 = vld [vmem:[#allocation3 + $0xe8] sm:$0xff]  ;;  %v2952_v39 = vld [vmem:[#allocation4 + $0x18] sm:$0xff] }
 0x40b   : > { %v4578_v52 = vld [vmem:[#allocation3 + $0x50] sm:$0xff]  ;;  %v4473_v7 = vadd.f32 %v7769_v37, %v3145_v29 }
 0x40c   : > { %6390 = vrcp.f32 %v4578_v52  ;;  %2931 = vst.msk [vmem:[#allocation3 + $0x70] sm:$0xff] %vm593_vm2, %v2898_v32  ;;  %v8225_v32 = vld [vmem:[#allocation6_spill] sm:$0xff] }
 0x40d   : > { %4505 = vst.msk [vmem:[#allocation4 + $0x20] sm:$0xff] %vm658_vm0, %v4473_v7  ;;  %v2844_v56 = vpop.xlane.xlu1 %2843 }
 0x40e   : > { %v2902_v27 = vadd.f32 %v2844_v56, %v2774_v49 }
 0x40f   : > { %v4580_v45 = vld [vmem:[#allocation3 + $0x60] sm:$0xff] }
 0x410   : > { %6392 = vrcp.f32 %v4580_v45  ;;  %2935 = vst.msk [vmem:[#allocation3 + $0x90] sm:$0xff] %vm593_vm2, %v2902_v27 }
 0x411   : > { %v2850_v18 = vpop.xlane.xlu1 %2849 }
 0x412   : > { %v6389_v36 = vpop.eup %6388  ;;  %v2904_v37 = vadd.f32 %v2850_v18, %v2776_v50  ;;  %v4569_v18 = vld [vmem:[#allocation3 + $0x8] sm:$0xff] }
 0x413   : > { %v4582_v42 = vld [vmem:[#allocation3 + $0x70] sm:$0xff]  ;;  %4711 = vperm.xlu0 %6238, %v6389_v36  }
 0x414   : > { %6394 = vrcp.f32 %v4582_v42  ;;  %2937 = vst.msk [vmem:[#allocation3 + $0xa0] sm:$0xff] %vm593_vm2, %v2904_v37  ;;  %v2977_v37 = vld [vmem:[#allocation4 + $0xe0] sm:$0xff]  ;;  %v4571_v42 = vld [vmem:[#allocation3 + $0x18] sm:$0xff] }
 0x415   : > { %v2856_v9 = vpop.xlane.xlu1 %2855  ;;  %6396 = vrcp.f32 %v4585_v63  ;;  %v4570_v63 = vld [vmem:[#allocation3 + $0x10] sm:$0xff] }
 0x416   : > { %v6391_v10 = vpop.eup %6390  ;;  %v2906_v44 = vadd.f32 %v2856_v9, %v2778_v20  ;;  %v3169_v9 = vmul.f32 %v7840_v14, %v2977_v37 }
 0x417   : > { %4716 = vperm.xlu0 %6238, %v6391_v10   ;;  %v4586_v19 = vld [vmem:[#allocation3 + $0x90] sm:$0xff] }
 0x418   : > { %2939 = vst.msk [vmem:[#allocation3 + $0xb0] sm:$0xff] %vm593_vm2, %v2906_v44  ;;  %6398 = vrcp.f32 %v4586_v19 }
 0x419   : > { %v2862_v25 = vpop.xlane.xlu1 %2861 }
 0x41a   : > { %v6393_v57 = vpop.eup %6392  ;;  %v2908_v4 = vadd.f32 %v2862_v25, %v2780_v2  ;;  %v4573_v25 = vld [vmem:[#allocation3 + $0x28] sm:$0xff] }
 0x41b   : > { %4726 = vperm.xlu0 %6238, %v6393_v57   ;;  %v4588_v22 = vld [vmem:[#allocation3 + $0xa0] sm:$0xff] }
 0x41c   : > { %2941 = vst.msk [vmem:[#allocation3 + $0xc0] sm:$0xff] %vm593_vm2, %v2908_v4  ;;  %6400 = vrcp.f32 %v4588_v22  ;;  %v4572_v57 = vld [vmem:[#allocation3 + $0x20] sm:$0xff] }
 0x41d   : > { %v2868_v15 = vpop.xlane.xlu1 %2867 }
 0x41e   : > { %v6395_v55 = vpop.eup %6394  ;;  %v2910_v11 = vadd.f32 %v2868_v15, %v2782_v30 }
 0x41f   : > { %4736 = vperm.xlu0 %6238, %v6395_v55   ;;  %v4590_v46 = vld [vmem:[#allocation3 + $0xb0] sm:$0xff]  ;;  %v6397_v5 = vpop.eup %6396 }
 0x420   : > { %2943 = vst.msk [vmem:[#allocation3 + $0xd0] sm:$0xff] %vm593_vm2, %v2910_v11  ;;  %6402 = vrcp.f32 %v4590_v46  ;;  %v4575_v11 = vld [vmem:[#allocation3 + $0x38] sm:$0xff] }
 0x421   : > { %v2874_v1 = vpop.xlane.xlu1 %2873 }
 0x422   : > { %v2912_v17 = vadd.f32 %v2874_v1, %v2784_v3  ;;  %v6399_v23 = vpop.eup %6398 }
 0x423   : > { %v4592_v31 = vld [vmem:[#allocation3 + $0xc0] sm:$0xff]  ;;  %4751 = vperm.xlu0 %6238, %v6397_v5  }
 0x424   : > { %6404 = vrcp.f32 %v4592_v31  ;;  %2945 = vst.msk [vmem:[#allocation3 + $0xe0] sm:$0xff] %vm593_vm2, %v2912_v17  ;;  %v4640_v31 = vld [vmem:[#allocation4 + $0x40] sm:$0xff] }
 0x425   : > { %v2880_v8 = vpop.xlane.xlu1 %2879  ;;  %6406 = vrcp.f32 %v4597_v34  ;;  %v4641_v34 = vld [vmem:[#allocation4 + $0x48] sm:$0xff] }
 0x426   : > { %v2914_v38 = vadd.f32 %v2880_v8, %v2786_v35  ;;  %v6401_v16 = vpop.eup %6400 }
 0x427   : > { %4756 = vperm.xlu0 %6238, %v6399_v23   ;;  %v4594_v28 = vld [vmem:[#allocation3 + $0xd0] sm:$0xff] }
 0x428   : > { %2947 = vst.msk [vmem:[#allocation3 + $0xf0] sm:$0xff] %vm593_vm2, %v2914_v38  ;;  %6408 = vrcp.f32 %v4594_v28 }
 0x429   : > { %v2989_v62 = vpop.permute.xlu1 %2988  ;;  %6410 = vrcp.f32 %v4599_v24 }
 0x42a   : > { %v3142_v29 = vmul.f32 %v2989_v62, %v2950_v54  ;;  %v6403_v21 = vpop.eup %6402 }
 0x42b   : > { %4766 = vperm.xlu0 %6238, %v6401_v16   ;;  %v4596_v7 = vld [vmem:[#allocation3 + $0xe0] sm:$0xff]  ;;  %v4643_v16 = vld [vmem:[#allocation4 + $0x58] sm:$0xff] }
 0x42c   : > { %v4470_v52 = vadd.f32 %v8225_v32, %v3142_v29  ;;  %6412 = vrcp.f32 %v4596_v7  ;;  %v4642_v29 = vld [vmem:[#allocation4 + $0x50] sm:$0xff]  ;;  %v4644_v7 = vld [vmem:[#allocation4 + $0x60] sm:$0xff] }
 0x42d   : > { %v2999_v60 = vpop.permute.xlu1 %2998  ;;  %6414 = vrcp.f32 %v4568_v0  ;;  %v4978_v0 = vld [vmem:[%s8069_s5] sm:$0xff] }
 0x42e   : > { %v6405_v49 = vpop.eup %6404  ;;  %4502 = vst.msk [vmem:[#allocation4 + $0x8] sm:$0xff] %vm658_vm0, %v4470_v52  ;;  %v3144_v56 = vmul.f32 %v2999_v60, %v2952_v39 }
 0x42f   : > { %4776 = vperm.xlu0 %6238, %v6403_v21   ;;  %4786 = vperm.xlu1 %6239, %v6405_v49   ;;  %v4598_v45 = vld [vmem:[#allocation3 + $0xf0] sm:$0xff]  ;;  %v6407_v50 = vpop.eup %6406  ;;  %v4645_v21 = vld [vmem:[#allocation4 + $0x68] sm:$0xff] }
 0x430   : > { %v4472_v27 = vadd.f32 %v7692_v61, %v3144_v56  ;;  %6416 = vrcp.f32 %v4598_v45  ;;  %v3170_v61 = vmul.f32 %v7867_v26, %v2978_v58  ;;  %v4646_v58 = vld [vmem:[#allocation4 + $0x70] sm:$0xff] }
 0x431   : > { %6418 = vrcp.f32 %v4569_v18 }
 0x432   : > { %4504 = vst.msk [vmem:[#allocation4 + $0x18] sm:$0xff] %vm658_vm0, %v4472_v27  ;;  %v6409_v36 = vpop.eup %6408  ;;  %6420 = vrcp.f32 %v4571_v42  ;;  %v4979_v27 = vld [vmem:[%s8069_s5 + $0x8] sm:$0xff] }
 0x433   : > { %3013 = vperm.xlu0 %6238, %v7836_v33   ;;  %3008 = vperm.xlu1 %6239, %v7720_v12   ;;  %v6411_v20 = vpop.eup %6410  ;;  %v2979_v12 = vld [vmem:[#allocation4 + $0xf0] sm:$0xff]  ;;  %6422 = vrcp.f32 %v4570_v63  ;;  %v6069_v45 = vpack.c.bf16 %v4979_v27, %v4978_v0 }
 0x434   : > { %v3171_v14 = vmul.f32 %v7874_v51, %v2979_v12  ;;  %6424 = vrcp.f32 %v4573_v25 }
 0x435   : > { %6426 = vrcp.f32 %v4572_v57  ;;  %6070 = vmatprep.subr.bf16.mxu0 %v6069_v45 }
 0x436   : > { %v6413_v10 = vpop.eup %6412  ;;  %6428 = vrcp.f32 %v4574_v53  ;;  %6072 = vmatpush3.bf16.msra.mxu0 %v6069_v45 }
 0x437   : > { %4811 = vperm.xlu1 %6239, %v6407_v50   ;;  %4796 = vperm.xlu0 %6238, %v6409_v36   ;;  %v6415_v26 = vpop.eup %6414  ;;  %6430 = vrcp.f32 %v4575_v11  ;;  %v4647_v50 = vld [vmem:[#allocation4 + $0x78] sm:$0xff] }
 0x439   : > { %v5873_v33 = vpop.f32.mrb[26].mxu0 }
 0x43a   : > { %v4498_v44 = vadd.f32 %v5873_v33, %v3170_v61  ;;  %v4379_v2 = vpop.f32.mrb[27].mxu0  ;;  %v6417_v30 = vpop.eup %6416  ;;  %v4980_v61 = vld [vmem:[%s8069_s5 + $0x10] sm:$0xff] }
 0x43b   : > { %v4497_v19 = vadd.f32 %v4379_v2, %v3169_v9  ;;  %4821 = vperm.xlu1 %6239, %v6411_v20   ;;  %4806 = vperm.xlu0 %6238, %v6413_v10   ;;  %v6419_v55 = vpop.eup %6418  ;;  %v4981_v20 = vld [vmem:[%s8069_s5 + $0x18] sm:$0xff]  ;;  %v4648_v9 = vld [vmem:[#allocation4 + $0x80] sm:$0xff] }
 0x43c   : > { %4530 = vst.msk [vmem:[#allocation4 + $0xe8] sm:$0xff] %vm658_vm0, %v4498_v44  ;;  %v6421_v51 = vpop.eup %6420  ;;  %v6073_v63 = vpack.c.bf16 %v4981_v20, %v4980_v61  ;;  %v4982_v2 = vld [vmem:[%s8069_s5 + $0x20] sm:$0xff] }
 0x43d   : > { %4529 = vst.msk [vmem:[#allocation4 + $0xe0] sm:$0xff] %vm658_vm0, %v4497_v19  ;;  %v5880_v4 = vpop.f32.mrb[34].mxu1  ;;  %v6423_v46 = vpop.eup %6422  ;;  %v4983_v19 = vld [vmem:[%s8069_s5 + $0x28] sm:$0xff] }
 0x43e   : > { %v4500_v22 = vadd.f32 %v5880_v4, %v3172_v48  ;;  %v4460_v15 = vpop.f32.mrb[35].mxu1  ;;  %v6425_v3 = vpop.eup %6424  ;;  %6074 = vmatprep.subr.bf16.mxu0 %v6073_v63  ;;  %v6077_v25 = vpack.c.bf16 %v4983_v19, %v4982_v2  ;;  %v4651_v48 = vld [vmem:[#allocation4 + $0x98] sm:$0xff] }
 0x43f   : > { %v4499_v43 = vadd.f32 %v4460_v15, %v3171_v14  ;;  %4666 = vperm.xlu1 %6239, %v6415_v26   ;;  %4816 = vperm.xlu0 %6238, %v6417_v30   ;;  %v6427_v1 = vpop.eup %6426  ;;  %v4650_v26 = vld [vmem:[#allocation4 + $0x90] sm:$0xff] }
 0x440   : > { %4532 = vst.msk [vmem:[#allocation4 + $0xf8] sm:$0xff] %vm658_vm0, %v4500_v22  ;;  %v6429_v40 = vpop.eup %6428  ;;  %6076 = vmatpush3.bf16.msra.mxu0 %v6073_v63  ;;  %v4984_v30 = vld [vmem:[%s8069_s5 + $0x30] sm:$0xff]  ;;  %v4985_v22 = vld [vmem:[%s8069_s5 + $0x38] sm:$0xff] }
 0x441   : > { %4531 = vst.msk [vmem:[#allocation4 + $0xf0] sm:$0xff] %vm658_vm0, %v4499_v43  ;;  %v6431_v5 = vpop.eup %6430  ;;  %6078 = vmatprep.subr.bf16.mxu0 %v6077_v25  ;;  %v6081_v15 = vpack.c.bf16 %v4985_v22, %v4984_v30  ;;  %v4653_v43 = vld [vmem:[#allocation4 + $0xa8] sm:$0xff] }
 0x443   : > { %4671 = vperm.xlu1 %6239, %v6419_v55   ;;  %3018 = vperm.xlu0 %6238, %v7786_v6   ;;  %v4652_v55 = vld [vmem:[#allocation4 + $0xa0] sm:$0xff] }
 0x444   : > { %6080 = vmatpush3.bf16.msra.mxu0 %v6077_v25  ;;  %v4660_v45 = vld [vmem:[#allocation4 + $0xe0] sm:$0xff] }
 0x445   : > { %6082 = vmatprep.subr.bf16.mxu0 %v6081_v15 }
 0x447   : > { %4681 = vperm.xlu1 %6239, %v6421_v51   ;;  %4676 = vperm.xlu0 %6238, %v6423_v46  }
 0x448   : > { %6084 = vmatpush3.bf16.msra.mxu0 %v6081_v15 }
 0x44b   : > { %4691 = vperm.xlu1 %6239, %v6425_v3   ;;  %4686 = vperm.xlu0 %6238, %v6427_v1   ;;  %v4655_v3 = vld [vmem:[#allocation4 + $0xb8] sm:$0xff]  ;;  %v4654_v1 = vld [vmem:[#allocation4 + $0xb0] sm:$0xff] }
 0x44f   : > { %4696 = vperm.xlu1 %6239, %v6429_v40  }
 0x453   : > { %4701 = vperm.xlu1 %6239, %v6431_v5  }
 0x459   : > { %v4722_v17 = vpop.permute.xlu1 %4721 }
 0x45a   : > { %v4835_v24 = vmul.f32 %v4722_v17, %v4643_v16 }
 0x45d   : > { %v4707_v35 = vpop.permute.xlu1 %4706 }
 0x45e   : > { %v4832_v8 = vmul.f32 %v4707_v35, %v4640_v31  ;;  %v2955_v35 = vld [vmem:[#allocation4 + $0x30] sm:$0xff] }
 0x460   : > { %4864 = vrot.lane.b32.xlu0 %v4832_v8, %s6462_s18  ;;  %v2954_v8 = vld [vmem:[#allocation4 + $0x28] sm:$0xff] }
 0x461   : > { %v4732_v6 = vpop.permute.xlu1 %4731 }
 0x462   : > { %v4837_v49 = vmul.f32 %v4732_v6, %v4645_v21  ;;  %v4657_v6 = vld [vmem:[#allocation4 + $0xc8] sm:$0xff] }
 0x465   : > { %v4742_v23 = vpop.permute.xlu1 %4741 }
 0x466   : > { %v4839_v37 = vmul.f32 %v4742_v23, %v4647_v50  ;;  %v4659_v23 = vld [vmem:[#allocation4 + $0xd8] sm:$0xff] }
 0x46d   : > { %v4762_v38 = vpop.permute.xlu1 %4761 }
 0x46e   : > { %v4843_v14 = vmul.f32 %v4762_v38, %v4651_v48 }
 0x471   : > { %v4747_v54 = vpop.permute.xlu1 %4746 }
 0x472   : > { %v4840_v10 = vmul.f32 %v4747_v54, %v4648_v9 }
 0x475   : > { %v4772_v52 = vpop.permute.xlu1 %4771 }
 0x476   : > { %v4845_v11 = vmul.f32 %v4772_v52, %v4653_v43  ;;  %v4661_v52 = vld [vmem:[#allocation4 + $0xe8] sm:$0xff] }
 0x479   : > { %v4782_v18 = vpop.permute.xlu1 %4781 }
 0x47a   : > { %v4847_v17 = vmul.f32 %v4782_v18, %v4655_v3 }
 0x47d   : > { %v4792_v44 = vpop.permute.xlu1 %4791 }
 0x481   : > { %v4802_v53 = vpop.permute.xlu1 %4801 }
 0x492   : > { %v4712_v28 = vpop.permute.xlu0 %4711 }
 0x493   : > { %v4833_v62 = vmul.f32 %v4712_v28, %v4641_v34  ;;  %v4849_v34 = vmul.f32 %v4792_v44, %v4657_v6  ;;  %v4851_v28 = vmul.f32 %v4802_v53, %v4659_v23 }
 0x495   : > { %4866 = vrot.lane.b32.xlu1 %v4833_v62, %s6462_s18 }
 0x496   : > { %v4717_v39 = vpop.permute.xlu0 %4716 }
 0x497   : > { %v4834_v32 = vmul.f32 %v4717_v39, %v4642_v29 }
 0x499   : > { %4870 = vrot.lane.b32.xlu1 %v4835_v24, %s6462_s18  ;;  %4868 = vrot.lane.b32.xlu0 %v4834_v32, %s6462_s18  ;;  %v4656_v24 = vld [vmem:[#allocation4 + $0xc0] sm:$0xff] }
 0x49a   : > { %v4727_v60 = vpop.permute.xlu0 %4726 }
 0x49b   : > { %v4836_v56 = vmul.f32 %v4727_v60, %v4644_v7 }
 0x49d   : > { %4872 = vrot.lane.b32.xlu0 %v4836_v56, %s6462_s18  ;;  %4874 = vrot.lane.b32.xlu1 %v4837_v49, %s6462_s18  ;;  %v4663_v49 = vld [vmem:[#allocation4 + $0xf8] sm:$0xff] }
 0x49e   : > { %v4737_v36 = vpop.permute.xlu0 %4736 }
 0x49f   : > { %v4838_v42 = vmul.f32 %v4737_v36, %v4646_v58  ;;  %v2956_v58 = vld [vmem:[#allocation4 + $0x38] sm:$0xff]  ;;  %v4662_v36 = vld [vmem:[#allocation4 + $0xf0] sm:$0xff] }
 0x4a1   : > { %4876 = vrot.lane.b32.xlu0 %v4838_v42, %s6462_s18  ;;  %4878 = vrot.lane.b32.xlu1 %v4839_v37, %s6462_s18  ;;  %s6464_s18 = smov 48  }
 0x4a2   : > { %v4752_v33 = vpop.permute.xlu0 %4751 }
 0x4a3   : > { %v4841_v12 = vmul.f32 %v4752_v33, %v4649_v47 }
 0x4a5   : > { %4898 = vrot.lane.b32.xlu1 %v4841_v12, %s6463_s13  ;;  %4896 = vrot.lane.b32.xlu0 %v4840_v10, %s6463_s13 }
 0x4a6   : > { %v4757_v57 = vpop.permute.xlu0 %4756 }
 0x4a7   : > { %v4842_v4 = vmul.f32 %v4757_v57, %v4650_v26 }
 0x4a9   : > { %4902 = vrot.lane.b32.xlu1 %v4843_v14, %s6463_s13  ;;  %4900 = vrot.lane.b32.xlu0 %v4842_v4, %s6463_s13 }
 0x4aa   : > { %v4767_v51 = vpop.permute.xlu0 %4766 }
 0x4ab   : > { %v4844_v46 = vmul.f32 %v4767_v51, %v4652_v55 }
 0x4ad   : > { %4904 = vrot.lane.b32.xlu0 %v4844_v46, %s6463_s13  ;;  %4906 = vrot.lane.b32.xlu1 %v4845_v11, %s6463_s13  ;;  %v4632_v46 = vld [vmem:[#allocation4] sm:$0xff] }
 0x4ae   : > { %v4777_v40 = vpop.permute.xlu0 %4776  ;;  %v4787_v5 = vpop.permute.xlu1 %4786 }
 0x4af   : > { %v4846_v31 = vmul.f32 %v4777_v40, %v4654_v1  ;;  %v4848_v7 = vmul.f32 %v4787_v5, %v4656_v24  ;;  %v4633_v40 = vld [vmem:[#allocation4 + $0x8] sm:$0xff] }
 0x4b1   : > { %4908 = vrot.lane.b32.xlu0 %v4846_v31, %s6463_s13  ;;  %4910 = vrot.lane.b32.xlu1 %v4847_v17, %s6463_s13 }
 0x4b2   : > { %v3014_v38 = vpop.permute.xlu0 %3013  ;;  %v3009_v54 = vpop.permute.xlu1 %3008 }
 0x4b3   : > { %v3147_v62 = vmul.f32 %v3014_v38, %v2955_v35  ;;  %v3146_v16 = vmul.f32 %v3009_v54, %v2954_v8  ;;  %v4634_v35 = vld [vmem:[#allocation4 + $0x10] sm:$0xff]  ;;  %v4635_v54 = vld [vmem:[#allocation4 + $0x18] sm:$0xff] }
 0x4b5   : > { %v4475_v29 = vadd.f32 %v7781_v59, %v3147_v62  ;;  %v4474_v39 = vadd.f32 %v7767_v13, %v3146_v16  ;;  %4930 = vrot.lane.b32.xlu0 %v4849_v34, %s6464_s18  ;;  %4934 = vrot.lane.b32.xlu1 %v4851_v28, %s6464_s18  ;;  %v4658_v13 = vld [vmem:[#allocation4 + $0xd0] sm:$0xff] }
 0x4b6   : > { %v4797_v32 = vpop.permute.xlu0 %4796  ;;  %v4812_v21 = vpop.permute.xlu1 %4811 }
 0x4b7   : > { %4507 = vst.msk [vmem:[#allocation4 + $0x30] sm:$0xff] %vm658_vm0, %v4475_v29  ;;  %4506 = vst.msk [vmem:[#allocation4 + $0x28] sm:$0xff] %vm658_vm0, %v4474_v39  ;;  %v4853_v60 = vmul.f32 %v4812_v21, %v4661_v52  ;;  %v4850_v0 = vmul.f32 %v4797_v32, %v4658_v13  ;;  %v4636_v39 = vld [vmem:[#allocation4 + $0x20] sm:$0xff] }
 0x4b9   : > { %4928 = vrot.lane.b32.xlu0 %v4848_v7, %s6464_s18  ;;  %4938 = vrot.lane.b32.xlu1 %v4853_v60, %s6464_s18 }
 0x4ba   : > { %v4807_v59 = vpop.permute.xlu0 %4806  ;;  %v4822_v56 = vpop.permute.xlu1 %4821 }
 0x4bb   : > { %v4855_v27 = vmul.f32 %v4822_v56, %v4663_v49  ;;  %v4852_v18 = vmul.f32 %v4807_v59, %v4660_v45 }
 0x4bd   : > { %4932 = vrot.lane.b32.xlu0 %v4850_v0, %s6464_s18  ;;  %4942 = vrot.lane.b32.xlu1 %v4855_v27, %s6464_s18 }
 0x4be   : > { %v4817_v50 = vpop.permute.xlu0 %4816  ;;  %v4667_v63 = vpop.permute.xlu1 %4666  ;;  %v4637_v7 = vld [vmem:[#allocation4 + $0x28] sm:$0xff]  ;;  %v4638_v27 = vld [vmem:[#allocation4 + $0x30] sm:$0xff] }
 0x4bf   : > { %v4854_v42 = vmul.f32 %v4817_v50, %v4662_v36  ;;  %v4824_v1 = vmul.f32 %v4667_v63, %v4632_v46  ;;  %v5129_v46 = vld [vmem:[%s536_s9 + $0x10] sm:$0xff] }
 0x4c1   : > { %4936 = vrot.lane.b32.xlu0 %v4852_v18, %s6464_s18 }
 0x4c2   : > { %v3019_v37 = vpop.permute.xlu0 %3018  ;;  %v4672_v9 = vpop.permute.xlu1 %4671 }
 0x4c3   : > { %v3148_v61 = vmul.f32 %v3019_v37, %v2956_v58  ;;  %v4825_v5 = vmul.f32 %v4672_v9, %v4633_v40 }
 0x4c5   : > { %v4476_v20 = vadd.f32 %v7779_v41, %v3148_v61  ;;  %4940 = vrot.lane.b32.xlu0 %v4854_v42, %s6464_s18 }
 0x4c6   : > { %v4682_v47 = vpop.permute.xlu1 %4681  ;;  %v4677_v10 = vpop.permute.xlu0 %4676 }
 0x4c7   : > { %4508 = vst.msk [vmem:[#allocation4 + $0x38] sm:$0xff] %vm658_vm0, %v4476_v20  ;;  %v4826_v38 = vmul.f32 %v4677_v10, %v4634_v35  ;;  %v4827_v62 = vmul.f32 %v4682_v47, %v4635_v54  ;;  %v5133_v35 = vld [vmem:[%s536_s9 + $0x30] sm:$0xff] }
 0x4ca   : > { %v4692_v33 = vpop.permute.xlu1 %4691  ;;  %v4687_v44 = vpop.permute.xlu0 %4686 }
 0x4cb   : > { %v4828_v21 = vmul.f32 %v4687_v44, %v4636_v39  ;;  %v4829_v49 = vmul.f32 %v4692_v33, %v4637_v7 }
 0x4ce   : > { %v4697_v12 = vpop.permute.xlu1 %4696  ;;  %v4639_v36 = vld [vmem:[#allocation4 + $0x38] sm:$0xff] }
 0x4cf   : > { %v4830_v58 = vmul.f32 %v4697_v12, %v4638_v27 }
 0x4d2   : > { %v7981_v2 = vpop.permute.xlu1 %4701  ;;  %v4865_v19 = vpop.permute.xlu0 %4864 }
 0x4d3   : > { %v4952_v17 = vsel %vm658_vm0, %v4824_v1, %v4865_v19  ;;  %v4831_v61 = vmul.f32 %v7981_v2, %v4639_v36  ;;  %v5135_v19 = vlaneseq  ;;  %v5131_v1 = vld [vmem:[%s536_s9 + $0x20] sm:$0xff] }
 0x507   : > { %v4867_v25 = vpop.permute.xlu1 %4866 }
 0x508   : > { %v4953_v8 = vsel %vm658_vm0, %v4825_v5, %v4867_v25  ;;  %v5136_v25 = vshrl.u32 %v5135_v19, 7 }
 0x50b   : > { %v4869_v48 = vpop.permute.xlu0 %4868  ;;  %v4871_v26 = vpop.permute.xlu1 %4870 }
 0x50c   : > { %v4954_v29 = vsel %vm658_vm0, %v4826_v38, %v4869_v48  ;;  %v4955_v24 = vsel %vm658_vm0, %v4827_v62, %v4871_v26  ;;  %v5137_v48 = vsub.s32 2, %v5136_v25  ;;  %v5123_v26 = vld [vmem:[%s8020_s22] sm:$0x7] }
 0x50f   : > { %v4873_v57 = vpop.permute.xlu0 %4872  ;;  %v4875_v14 = vpop.permute.xlu1 %4874 }
 0x510   : > { %v4956_v0 = vsel %vm658_vm0, %v4828_v21, %v4873_v57  ;;  %v4957_v45 = vsel %vm658_vm0, %v4829_v49, %v4875_v14  ;;  %v5496_v57 = vld [vmem:[%s8070_s6] ss:$0 sm:$0xff]  ;;  %v5138_v14 = vrot.slane %v5123_v26, %v5137_v48 }
 0x513   : > { %v4877_v41 = vpop.permute.xlu0 %4876  ;;  %v4879_v4 = vpop.permute.xlu1 %4878 }
 0x514   : > { %v4958_v63 = vsel %vm658_vm0, %v4830_v58, %v4877_v41  ;;  %v4959_v47 = vsel %vm658_vm0, %v4831_v61, %v4879_v4  ;;  %v5124_v4 = vld [vmem:[%s8020_s22 + $0x4] sm:$0x7] }
 0x517   : > { %v4897_v30 = vpop.permute.xlu0 %4896  ;;  %v4899_v22 = vpop.permute.xlu1 %4898 }
 0x518   : > { %v4961_v6 = vsel %vm4960_vm3, %v4952_v17, %v4897_v30  ;;  %v4962_v34 = vsel %vm4960_vm3, %v4953_v8, %v4899_v22  ;;  %v5125_v17 = vld [vmem:[%s8020_s22 + $0x8] sm:$0x7] }
 0x51b   : > { %v4901_v15 = vpop.permute.xlu0 %4900  ;;  %v4903_v43 = vpop.permute.xlu1 %4902 }
 0x51c   : > { %v4963_v32 = vsel %vm4960_vm3, %v4954_v29, %v4901_v15  ;;  %v4964_v60 = vsel %vm4960_vm3, %v4955_v24, %v4903_v43  ;;  %v5128_v15 = vld [vmem:[%s536_s9 + $0x8] sm:$0xff] }
 0x51d   : > { %v5126_v29 = vld [vmem:[%s8020_s22 + $0xc] sm:$0x7] }
 0x51f   : > { %v4905_v53 = vpop.permute.xlu0 %4904  ;;  %v4907_v55 = vpop.permute.xlu1 %4906 }
 0x520   : > { %v4965_v50 = vsel %vm4960_vm3, %v4956_v0, %v4905_v53  ;;  %v4966_v37 = vsel %vm4960_vm3, %v4957_v45, %v4907_v55  ;;  %v5127_v53 = vld [vmem:[%s536_s9] sm:$0xff]  ;;  %v5130_v55 = vld [vmem:[%s536_s9 + $0x18] sm:$0xff] }
 0x523   : > { %v4909_v51 = vpop.permute.xlu0 %4908  ;;  %v4911_v11 = vpop.permute.xlu1 %4910 }
 0x524   : > { %v4967_v33 = vsel %vm4960_vm3, %v4958_v63, %v4909_v51  ;;  %v4968_v12 = vsel %vm4960_vm3, %v4959_v47, %v4911_v11  ;;  %v5142_v11 = vrot.slane %v5124_v4, %v5137_v48 }
 0x527   : > { %v4931_v3 = vpop.permute.xlu0 %4930  ;;  %v4935_v31 = vpop.permute.xlu1 %4934 }
 0x528   : > { %v4971_v16 = vsel %vm4969_vm4, %v4962_v34, %v4931_v3  ;;  %v4973_v56 = vsel %vm4969_vm4, %v4964_v60, %v4935_v31  ;;  %v5132_v3 = vld [vmem:[%s536_s9 + $0x28] sm:$0xff]  ;;  %v5134_v31 = vld [vmem:[%s536_s9 + $0x38] sm:$0xff]  ;;  %v5150_v60 = vrot.slane %v5126_v29, %v5137_v48 }
 0x52b   : > { %v4929_v23 = vpop.permute.xlu0 %4928  ;;  %v4939_v13 = vpop.permute.xlu1 %4938 }
 0x52c   : > { %v4970_v28 = vsel %vm4969_vm4, %v4961_v6, %v4929_v23  ;;  %v4975_v20 = vsel %vm4969_vm4, %v4966_v37, %v4939_v13 }
 0x52d   : > { %5897 = vmatprep.mubr.msk.f32.mxu0 %vm4993_vm5, %v4970_v28  ;;  %v5146_v28 = vrot.slane %v5125_v17, %v5137_v48 }
 0x52e   : > { %5898 = vmatmul.mubr.msk.f32.vlgmr.msra.gmra.mrb[28].mxu0 %vm4993_vm5, %v4971_v16 }
 0x52f   : > { %v4933_v52 = vpop.permute.xlu0 %4932  ;;  %v4943_v9 = vpop.permute.xlu1 %4942 }
 0x530   : > { %v4972_v59 = vsel %vm4969_vm4, %v4963_v32, %v4933_v52  ;;  %v4977_v2 = vsel %vm4969_vm4, %v4968_v12, %v4943_v9 }
 0x531   : > { %5900 = vmatprep.mubr.msk.f32.mxu0 %vm4993_vm5, %v4972_v59 }
 0x532   : > { %5901 = vmatmul.mubr.msk.f32.gmra.mrb[30].mxu0 %vm4993_vm5, %v4973_v56 }
 0x533   : > { %v4937_v18 = vpop.permute.xlu0 %4936 }
 0x534   : > { %v4974_v42 = vsel %vm4969_vm4, %v4965_v50, %v4937_v18 }
 0x535   : > { %5903 = vmatprep.mubr.msk.f32.mxu0 %vm4993_vm5, %v4974_v42 }
 0x536   : > { %5904 = vmatmul.mubr.msk.f32.gmra.mrb[32].mxu0 %vm4993_vm5, %v4975_v20 }
 0x537   : > { %v4941_v10 = vpop.permute.xlu0 %4940 }
 0x538   : > { %v4976_v44 = vsel %vm4969_vm4, %v4967_v33, %v4941_v10 }
 0x539   : > { %5906 = vmatprep.mubr.msk.f32.mxu0 %vm4993_vm5, %v4976_v44 }
 0x53a   : > { %5907 = vmatmul.mubr.msk.f32.gmra.mrb[34].mxu0 %vm4993_vm5, %v4977_v2 }
 0x601   : > { %v5899_v41 = vpop.f32.mrb[28].mxu0 }
 0x602   : > { %v5090_v30 = vadd.f32 %v5899_v41, %v5496_v57  ;;  %v5084_v22 = vpop.f32.mrb[29].mxu0 }
 0x603   : > { %v5085_v43 = vadd.f32 %v5496_v57, %v5084_v22 }
 0x604   : > { %v5152_v51 = vmul.f32 %v5138_v14, %v5090_v30 }
 0x605   : > { %v5151_v40 = vmul.f32 %v5138_v14, %v5085_v43  ;;  %v5902_v5 = vpop.f32.mrb[30].mxu0 }
 0x606   : > { %v5160_v8 = vadd.f32 %v5152_v51, %v5128_v15  ;;  %v5100_v6 = vadd.f32 %v5902_v5, %v5496_v57  ;;  %v5094_v23 = vpop.f32.mrb[31].mxu0 }
 0x607   : > { %v5159_v38 = vadd.f32 %v5151_v40, %v5127_v53  ;;  %v5095_v54 = vadd.f32 %v5496_v57, %v5094_v23 }
 0x608   : > { %v5154_v34 = vmul.f32 %v5142_v11, %v5100_v6  ;;  %5168 = vst.msk [vmem:[%s8035_s11 + $0x8] sm:$0xff] %vm4993_vm5, %v5160_v8 }
 0x609   : > { %v5153_v62 = vmul.f32 %v5142_v11, %v5095_v54  ;;  %v5905_v16 = vpop.f32.mrb[32].mxu0  ;;  %5167 = vst.msk [vmem:[%s8035_s11] sm:$0xff] %vm4993_vm5, %v5159_v38 }
 0x60a   : > { %v5162_v39 = vadd.f32 %v5154_v34, %v5130_v55  ;;  %v5110_v24 = vadd.f32 %v5905_v16, %v5496_v57  ;;  %v5104_v32 = vpop.f32.mrb[33].mxu0 }
 0x60b   : > { %v5161_v52 = vadd.f32 %v5153_v62, %v5129_v46  ;;  %v5105_v21 = vadd.f32 %v5496_v57, %v5104_v32 }
 0x60c   : > { %v5156_v7 = vmul.f32 %v5146_v28, %v5110_v24  ;;  %5170 = vst.msk [vmem:[%s8035_s11 + $0x18] sm:$0xff] %vm4993_vm5, %v5162_v39 }
 0x60d   : > { %v5155_v13 = vmul.f32 %v5146_v28, %v5105_v21  ;;  %v5908_v59 = vpop.f32.mrb[34].mxu0  ;;  %5169 = vst.msk [vmem:[%s8035_s11 + $0x10] sm:$0xff] %vm4993_vm5, %v5161_v52 }
 0x60e   : > { %v5164_v49 = vadd.f32 %v5156_v7, %v5132_v3  ;;  %v5120_v56 = vadd.f32 %v5908_v59, %v5496_v57  ;;  %v5114_v0 = vpop.f32.mrb[35].mxu0 }
 0x60f   : > { %v5163_v27 = vadd.f32 %v5155_v13, %v5131_v1  ;;  %v5115_v45 = vadd.f32 %v5496_v57, %v5114_v0 }
 0x610   : > { %v5158_v50 = vmul.f32 %v5150_v60, %v5120_v56  ;;  %5172 = vst.msk [vmem:[%s8035_s11 + $0x28] sm:$0xff] %vm4993_vm5, %v5164_v49 }
 0x611   : > { %v5157_v18 = vmul.f32 %v5150_v60, %v5115_v45  ;;  %5171 = vst.msk [vmem:[%s8035_s11 + $0x20] sm:$0xff] %vm4993_vm5, %v5163_v27 }
 0x612   : > { %v5166_v58 = vadd.f32 %v5158_v50, %v5134_v31 }
 0x613   : > { %v5165_v36 = vadd.f32 %v5157_v18, %v5133_v35 }
 0x614   : > { %5174 = vst.msk [vmem:[%s8035_s11 + $0x38] sm:$0xff] %vm4993_vm5, %v5166_v58 }
 0x615   : > { %5173 = vst.msk [vmem:[%s8035_s11 + $0x30] sm:$0xff] %vm4993_vm5, %v5165_v36 }
 0x616 PF: > { %s17_s26 = sadd.s32 1, %s6454_s26   ;;  %s8226_s24 = smov %s6450_s25 }
 0x617   : > { %p14_p5 = scmp.ge.s32.totalorder %s17_s26, 4   ;;  %s8227_s25 = smov %s8229_s27 }
 0x619   :  { %16 = sbr.rel (!%p14_p5) target bundleno = 2 (0x2), region = 98 }

</bundles_post_ra>
